<compile_context>
chip_gen: v5e
topology: v5e:2x2
jax: 0.10.0
libtpu: 0.0.40
codegen_flags: <defaults>
</compile_context>

<pallas_src>
import jax
import jax.numpy as jnp
import numpy as np
from jax import lax
from jax.experimental import pallas as pl
from jax.experimental.pallas import tpu as pltpu

_LANE = 128
_SUBLANE = 8


def _round_up(x, m):
    return -(-x // m) * m


def _accumulating_conv3x3(slice_fn, w_ref, c_in, c_out, m):
    """3x3 conv as accumulating shifted matmuls (no 9x im2col buffer).

    slice_fn(dy, dx) -> (m, c_in) activation window for kernel tap (dy, dx).
    w_ref holds the (9*c_in, c_out) im2col weight; rows [k*c_in, (k+1)*c_in)
    belong to tap k = dy*3 + dx.  Taps are paired (K = 2*c_in) when c_in == 128
    to fill the 256-deep MXU on v6e/v7x (single taps already give K >= 256 for
    larger channel counts; v5e's 128-deep MXU is full either way).
    """
    group = 2 if c_in <= 128 else 1
    acc = jnp.zeros((m, c_out), jnp.float32)
    k = 0
    while k < 9:
        g = min(group, 9 - k)
        if g == 1:
            a = slice_fn(k // 3, k % 3)
        else:
            a = jnp.concatenate(
                [slice_fn((k + j) // 3, (k + j) % 3) for j in range(g)],
                axis=-1)
        w = w_ref[k * c_in:(k + g) * c_in, :]
        acc = acc + jnp.dot(a, w, preferred_element_type=jnp.float32)
        k += g
    return acc


def _center_block_kernel(x_ref, w1_ref, w2_ref, wres_ref, bres_ref,
                         b1_ref, b2_ref, o_ref, y1p_ref):
    # x_ref:    (nb, Hp+2, Wpad, Cpi)   pooled input, halo pre-padded (bf16)
    # w1_ref:   (9*Cpi, Cpo)            conv1 im2col weight, BN1 scale folded
    # w2_ref:   (9*Cpo, Cpo)            conv2 im2col weight, BN2 scale folded
    # wres_ref: (Cpi, Cpo)              1x1 residual conv weight
    # bres/b1/b2_ref: (1, Cpo)          biases (f32)
    # o_ref:    (nb, Hp, Wp, Cpo)       output (bf16, lane-dense Cpo)
    # y1p_ref:  (nb, Hp+2, Wpad, Cpo)   halo scratch for conv2 input (bf16)
    nb, _, wpad, cpi = x_ref.shape
    _, hp, wp, cpo = o_ref.shape
    m = nb * hp * wp

    # ---- residual: 1x1 conv + bias on the interior of the padded tile ----
    x_in = x_ref[:, 1:hp + 1, 1:wp + 1, :].reshape(m, cpi)
    res = jnp.dot(x_in, wres_ref[...], preferred_element_type=jnp.float32)
    res = res + bres_ref[...]

    # ---- conv1 (3x3, pad=1) + folded BN1 + ReLU ----
    y1 = _accumulating_conv3x3(
        lambda dy, dx: x_ref[:, dy:dy + hp, dx:dx + wp, :].reshape(m, cpi),
        w1_ref, cpi, cpo, m)
    y1 = jnp.maximum(y1 + b1_ref[...], 0.0)

    # ---- stage conv1 output into the halo scratch ----
    # Zero only the halo ring; the interior is fully overwritten below.  The
    # scratch persists across grid steps, so ALL padded columns wp+1..Wpad-1
    # are re-zeroed (conv2's dx=2 shift reads column wp+1), not just one.
    zrow = jnp.zeros((nb, 1, wpad, cpo), y1p_ref.dtype)
    y1p_ref[:, 0:1, :, :] = zrow
    y1p_ref[:, hp + 1:hp + 2, :, :] = zrow
    y1p_ref[:, 1:hp + 1, 0:1, :] = jnp.zeros((nb, hp, 1, cpo), y1p_ref.dtype)
    y1p_ref[:, 1:hp + 1, wp + 1:wpad, :] = jnp.zeros(
        (nb, hp, wpad - (wp + 1), cpo), y1p_ref.dtype)
    y1p_ref[:, 1:hp + 1, 1:wp + 1, :] = (
        y1.reshape(nb, hp, wp, cpo).astype(y1p_ref.dtype))

    # ---- conv2 (3x3, pad=1) + folded BN2 (operands sliced from the ref) ----
    y2 = _accumulating_conv3x3(
        lambda dy, dx: y1p_ref[:, dy:dy + hp, dx:dx + wp, :].reshape(m, cpo),
        w2_ref, cpo, cpo, m)
    y2 = y2 + b2_ref[...]

    # ---- residual add + final ReLU ----
    out = jnp.maximum(y2 + res, 0.0)
    o_ref[...] = out.reshape(nb, hp, wp, cpo).astype(o_ref.dtype)


def _vmem_limit_bytes(frac=0.70, default=48 << 20, cap=100 << 20):
    """Generation-aware VMEM limit (~70% of physical; 48 MiB fallback, which is
    safe on every generation including v7x's 64 MiB)."""
    try:
        vmem = getattr(pltpu.get_tpu_info(), "vmem_capacity_bytes", None)
        if vmem:
            return int(min(vmem * frac, cap))
    except Exception:
        pass
    return default


def _choose_batch_tile(n, per_elem_bytes, weight_bytes, vmem_budget):
    """Largest divisor of n that fits the VMEM budget, preferring an EVEN grid
    count (balanced work across v7x's two TensorCores) with >= 2 steps."""
    cap = max(1, (vmem_budget - weight_bytes) // max(per_elem_bytes, 1))
    divisors = [d for d in range(1, n + 1) if n % d == 0 and d <= cap]
    if not divisors:
        return 1
    even = [d for d in divisors if (n // d) % 2 == 0]
    pool = even if even else divisors
    multi = [d for d in pool if n // d >= 2]
    pool = multi if multi else pool
    return max(pool)


def center_block_forward(x_nchw, p, *, pool=True, eps=1e-5,
                         matmul_dtype=jnp.bfloat16, out_dtype=jnp.bfloat16):
    """CenterBlock forward (eval-mode BN). Input/output are NCHW."""
    # TODO(synk): the 2x2 max-pool, NCHW<->NHWC relayout and halo/channel pad
    #             still run as XLA glue; fusing them into the kernel would save
    #             the remaining HBM round trips of the pooled activation.
    x = jnp.transpose(x_nchw, (0, 2, 3, 1)).astype(jnp.float32)    # -> NHWC
    if pool:
        N, H, W, C = x.shape
        assert H % 2 == 0 and W % 2 == 0, "2x2 max-pool needs even H, W"
        x = x.reshape(N, H // 2, 2, W // 2, 2, C).max(axis=(2, 4))
    N, Hp, Wp, Cin = x.shape
    Cout = p['w1'].shape[-1]

    # ---- fold eval-mode BN into scale/bias, fold scale into conv weights ----
    s1 = p['g1'] * lax.rsqrt(p['v1'] + eps)
    b1 = p['be1'] - p['m1'] * s1
    s2 = p['g2'] * lax.rsqrt(p['v2'] + eps)
    b2 = p['be2'] - p['m2'] * s2
    w1 = p['w1'] * s1                                              # (3,3,Cin,Cout)
    w2 = p['w2'] * s2                                              # (3,3,Cout,Cout)
    wres, bres = p['wres'], p['bres']

    # ---- channel padding to lane width; spatial halo + sublane-aligned width
    # TODO(synk): for tiny channel counts (e.g. the Cin=4/Cout=8 test shape)
    #             per-tap padding to 128 lanes wastes most MXU/DMA work; a
    #             denser K packing would be needed if such shapes were real.
    Cpi = _round_up(Cin, _LANE)
    Cpo = _round_up(Cout, _LANE)
    Wpad = _round_up(Wp + 2, _SUBLANE)

    xp = jnp.pad(x.astype(matmul_dtype),
                 ((0, 0), (1, 1), (1, Wpad - Wp - 1), (0, Cpi - Cin)))

    def pad_w(w, ci, co):                       # (kh,kw,ci,co) -> (kh*kw*cpi, Cpo)
        kh, kw = w.shape[:2]
        cpi_ = _round_up(ci, _LANE)
        wpk = jnp.zeros((kh, kw, cpi_, Cpo), matmul_dtype)
        wpk = wpk.at[:, :, :ci, :co].set(w.astype(matmul_dtype))
        return wpk.reshape(kh * kw * cpi_, Cpo)

    def pad_b(b):
        return jnp.zeros((1, Cpo), jnp.float32).at[0, :Cout].set(
            b.astype(jnp.float32))

    w1k = pad_w(w1, Cin, Cout)                  # (9*Cpi, Cpo)
    w2k = pad_w(w2, Cout, Cout)                 # (9*Cpo, Cpo)
    wrk = pad_w(wres, Cin, Cout)                # (Cpi,   Cpo)
    b1k, b2k, brk = pad_b(b1), pad_b(b2), pad_b(bres)

    # ---- VMEM budgeting (generation-aware, weight double-buffering counted) --
    ib = jnp.dtype(matmul_dtype).itemsize
    ob = jnp.dtype(out_dtype).itemsize
    per_elem = ((Hp + 2) * Wpad * Cpi * ib * 2        # input (double-buffered)
                + Hp * Wp * Cpo * ob * 2              # output (double-buffered)
                + (Hp + 2) * Wpad * Cpo * ib          # conv2 halo scratch
                + Hp * Wp * 2 * max(Cpi, Cpo) * ib    # paired-tap temporary
                + Hp * Wp * Cpo * 4 * 4)              # f32 acc/res/y1/out values
    weight_bytes = 2 * ((w1k.size + w2k.size + wrk.size) * ib + 3 * Cpo * 4)
    vmem_limit = _vmem_limit_bytes()
    nb = _choose_batch_tile(N, per_elem, weight_bytes,
                            vmem_budget=int(vmem_limit * 0.85))
    grid = N // nb

    out = pl.pallas_call(
        _center_block_kernel,
        out_shape=jax.ShapeDtypeStruct((N, Hp, Wp, Cpo), out_dtype),
        grid_spec=pltpu.PrefetchScalarGridSpec(
            num_scalar_prefetch=0,
            grid=(grid,),
            in_specs=[
                pl.BlockSpec((nb, Hp + 2, Wpad, Cpi), lambda n: (n, 0, 0, 0)),
                # Weight/bias index_maps are grid-invariant; their (possible)
                # double-buffering is already counted in weight_bytes above.
                pl.BlockSpec(w1k.shape, lambda n: (0, 0)),
                pl.BlockSpec(w2k.shape, lambda n: (0, 0)),
                pl.BlockSpec(wrk.shape, lambda n: (0, 0)),
                pl.BlockSpec(brk.shape, lambda n: (0, 0)),
                pl.BlockSpec(b1k.shape, lambda n: (0, 0)),
                pl.BlockSpec(b2k.shape, lambda n: (0, 0)),
            ],
            out_specs=pl.BlockSpec((nb, Hp, Wp, Cpo), lambda n: (n, 0, 0, 0)),
            scratch_shapes=[
                pltpu.VMEM((nb, Hp + 2, Wpad, Cpo), matmul_dtype),
            ],
        ),
        compiler_params=pltpu.CompilerParams(
            dimension_semantics=("parallel",),
            vmem_limit_bytes=vmem_limit),
    )(xp, w1k, w2k, wrk, brk, b1k, b2k)

    # TODO(synk): if Wp % 8 != 0, a flattened (N, Hp*Wp, Cpo) output slab would
    #             keep stores sublane-dense; here Wp is a multiple of 8.
    out = out[:, :, :, :Cout]                           # strip channel padding
    return jnp.transpose(out, (0, 3, 1, 2))             # -> NCHW


def init_params(key, cin, cout):
    """Deterministic synthetic params (conv weights HWIO, BN raw stats)."""
    ks = jax.random.split(key, 12)
    return dict(
        w1=0.1 * jax.random.normal(ks[0], (3, 3, cin, cout), jnp.float32),
        w2=0.1 * jax.random.normal(ks[1], (3, 3, cout, cout), jnp.float32),
        wres=0.1 * jax.random.normal(ks[2], (1, 1, cin, cout), jnp.float32),
        bres=0.1 * jax.random.normal(ks[3], (cout,), jnp.float32),
        g1=jax.random.uniform(ks[4], (cout,), jnp.float32, 0.5, 1.5),
        be1=0.1 * jax.random.normal(ks[5], (cout,), jnp.float32),
        m1=0.1 * jax.random.normal(ks[6], (cout,), jnp.float32),
        v1=jax.random.uniform(ks[7], (cout,), jnp.float32, 0.5, 1.5),
        g2=jax.random.uniform(ks[8], (cout,), jnp.float32, 0.5, 1.5),
        be2=0.1 * jax.random.normal(ks[9], (cout,), jnp.float32),
        m2=0.1 * jax.random.normal(ks[10], (cout,), jnp.float32),
        v2=jax.random.uniform(ks[11], (cout,), jnp.float32, 0.5, 1.5),
    )


def reference_forward(x_nchw, p, *, pool=True, eps=1e-5):
    """Pure-JAX f32 reference (XLA convs, HIGHEST precision)."""
    dn = ('NHWC', 'HWIO', 'NHWC')
    prec = lax.Precision.HIGHEST
    s1 = p['g1'] * lax.rsqrt(p['v1'] + eps)
    b1 = p['be1'] - p['m1'] * s1
    s2 = p['g2'] * lax.rsqrt(p['v2'] + eps)
    b2 = p['be2'] - p['m2'] * s2
    x = jnp.transpose(x_nchw, (0, 2, 3, 1)).astype(jnp.float32)
    if pool:
        N, H, W, C = x.shape
        x = x.reshape(N, H // 2, 2, W // 2, 2, C).max(axis=(2, 4))
    res = lax.conv_general_dilated(x, p['wres'], (1, 1), 'VALID',
                                   dimension_numbers=dn,
                                   precision=prec) + p['bres']
    y1 = lax.conv_general_dilated(x, p['w1'], (1, 1), 'SAME',
                                  dimension_numbers=dn, precision=prec)
    y1 = jnp.maximum(y1 * s1 + b1, 0.0)
    y2 = lax.conv_general_dilated(y1, p['w2'], (1, 1), 'SAME',
                                  dimension_numbers=dn,
                                  precision=prec) * s2 + b2
    out = jnp.maximum(y2 + res, 0.0)
    return jnp.transpose(out, (0, 3, 1, 2))


if __name__ == "__main__":
    key = jax.random.PRNGKey(0)
    kx, kp = jax.random.split(key)

    N, Cin, H, W = 2, 4, 16, 16          # NCHW (PyTorch convention)
    Cout = 8

    x = jax.random.normal(kx, (N, Cin, H, W), jnp.float32)
    params = init_params(kp, Cin, Cout)

    out = center_block_forward(x, params, pool=True)
    out = jax.block_until_ready(out)

    ref = reference_forward(x, params, pool=True)
    # Tolerance covers the intentional bf16 MXU inputs / bf16 output store
    # (f32 accumulation inside the kernel).
    np.testing.assert_allclose(np.asarray(out.astype(jnp.float32)),
                               np.asarray(ref), rtol=5e-2, atol=5e-2)
    assert out.shape == (N, Cout, H // 2, W // 2)

    print("KERNEL_OK")
</pallas_src>

<mosaic_0001>
module attributes {stable_mosaic.version = 11 : i64} {
  func.func @_center_block_kernel(%arg0: i32, %arg1: memref<1x10x16x128xbf16, #tpu.memory_space<vmem>>, %arg2: memref<1152x128xbf16, #tpu.memory_space<vmem>>, %arg3: memref<1152x128xbf16, #tpu.memory_space<vmem>>, %arg4: memref<128x128xbf16, #tpu.memory_space<vmem>>, %arg5: memref<1x128xf32, #tpu.memory_space<vmem>>, %arg6: memref<1x128xf32, #tpu.memory_space<vmem>>, %arg7: memref<1x128xf32, #tpu.memory_space<vmem>>, %arg8: memref<1x8x8x128xbf16, #tpu.memory_space<vmem>>, %arg9: memref<1x10x16x128xbf16, #tpu.memory_space<vmem>>) attributes {dimension_semantics = [#tpu.dimension_semantics<parallel>], iteration_bounds = array<i64: 2>, scalar_prefetch = 0 : i64, scratch_operands = 1 : i64, tpu.core_type = #tpu.core_type<tc>, window_params = [{transform_indices = @transform_0, window_bounds = array<i64: 1, 10, 16, 128>}, {pipeline_mode = #tpu.pipeline_mode<synchronous>, transform_indices = @transform_1, window_bounds = array<i64: 1152, 128>}, {pipeline_mode = #tpu.pipeline_mode<synchronous>, transform_indices = @transform_2, window_bounds = array<i64: 1152, 128>}, {pipeline_mode = #tpu.pipeline_mode<synchronous>, transform_indices = @transform_3, window_bounds = array<i64: 128, 128>}, {pipeline_mode = #tpu.pipeline_mode<synchronous>, transform_indices = @transform_4, window_bounds = array<i64: 1, 128>}, {pipeline_mode = #tpu.pipeline_mode<synchronous>, transform_indices = @transform_5, window_bounds = array<i64: 1, 128>}, {pipeline_mode = #tpu.pipeline_mode<synchronous>, transform_indices = @transform_6, window_bounds = array<i64: 1, 128>}, {transform_indices = @transform_7, window_bounds = array<i64: 1, 8, 8, 128>}]} {
    %c0 = arith.constant 0 : index
    %c1 = arith.constant 1 : index
    %c1_0 = arith.constant 1 : index
    %c0_1 = arith.constant 0 : index
    %0 = vector.load %arg1[%c0, %c1, %c1_0, %c0_1] : memref<1x10x16x128xbf16, #tpu.memory_space<vmem>>, vector<1x8x8x128xbf16>
    %1 = vector.shape_cast %0 : vector<1x8x8x128xbf16> to vector<64x128xbf16>
    %c0_2 = arith.constant 0 : index
    %c0_3 = arith.constant 0 : index
    %2 = vector.load %arg4[%c0_2, %c0_3] : memref<128x128xbf16, #tpu.memory_space<vmem>>, vector<128x128xbf16>
    %cst = arith.constant dense<0.000000e+00> : vector<64x128xf32>
    %3 = tpu.matmul %1, %2, %cst {dimension_numbers = #tpu.dot_dimension_numbers<[1], [0], [0], [1], [0, 0, 1, 1], [], []>} : vector<64x128xbf16>, vector<128x128xbf16>, vector<64x128xf32> -> vector<64x128xf32>
    %c0_4 = arith.constant 0 : index
    %c0_5 = arith.constant 0 : index
    %4 = vector.load %arg5[%c0_4, %c0_5] : memref<1x128xf32, #tpu.memory_space<vmem>>, vector<1x128xf32>
    %5 = vector.broadcast %4 : vector<1x128xf32> to vector<64x128xf32>
    %6 = arith.addf %3, %5 : vector<64x128xf32>
    %cst_6 = arith.constant 0.000000e+00 : f32
    %7 = vector.broadcast %cst_6 : f32 to vector<64x128xf32>
    %c0_7 = arith.constant 0 : index
    %c0_8 = arith.constant 0 : index
    %c0_9 = arith.constant 0 : index
    %c0_10 = arith.constant 0 : index
    %8 = vector.load %arg1[%c0_7, %c0_8, %c0_9, %c0_10] : memref<1x10x16x128xbf16, #tpu.memory_space<vmem>>, vector<1x8x8x128xbf16>
    %9 = vector.shape_cast %8 : vector<1x8x8x128xbf16> to vector<64x128xbf16>
    %c0_11 = arith.constant 0 : index
    %c0_12 = arith.constant 0 : index
    %c1_13 = arith.constant 1 : index
    %c0_14 = arith.constant 0 : index
    %10 = vector.load %arg1[%c0_11, %c0_12, %c1_13, %c0_14] : memref<1x10x16x128xbf16, #tpu.memory_space<vmem>>, vector<1x8x8x128xbf16>
    %11 = vector.shape_cast %10 : vector<1x8x8x128xbf16> to vector<64x128xbf16>
    %12 = tpu.concatenate %9, %11 in 1 : vector<64x128xbf16>, vector<64x128xbf16> -> vector<64x256xbf16>
    %c0_15 = arith.constant 0 : index
    %c0_16 = arith.constant 0 : index
    %13 = vector.load %arg2[%c0_15, %c0_16] : memref<1152x128xbf16, #tpu.memory_space<vmem>>, vector<256x128xbf16>
    %cst_17 = arith.constant dense<0.000000e+00> : vector<64x128xf32>
    %14 = tpu.matmul %12, %13, %cst_17 {dimension_numbers = #tpu.dot_dimension_numbers<[1], [0], [0], [1], [0, 0, 1, 1], [], []>} : vector<64x256xbf16>, vector<256x128xbf16>, vector<64x128xf32> -> vector<64x128xf32>
    %15 = arith.addf %7, %14 : vector<64x128xf32>
    %c0_18 = arith.constant 0 : index
    %c0_19 = arith.constant 0 : index
    %c2 = arith.constant 2 : index
    %c0_20 = arith.constant 0 : index
    %16 = vector.load %arg1[%c0_18, %c0_19, %c2, %c0_20] : memref<1x10x16x128xbf16, #tpu.memory_space<vmem>>, vector<1x8x8x128xbf16>
    %17 = vector.shape_cast %16 : vector<1x8x8x128xbf16> to vector<64x128xbf16>
    %c0_21 = arith.constant 0 : index
    %c1_22 = arith.constant 1 : index
    %c0_23 = arith.constant 0 : index
    %c0_24 = arith.constant 0 : index
    %18 = vector.load %arg1[%c0_21, %c1_22, %c0_23, %c0_24] : memref<1x10x16x128xbf16, #tpu.memory_space<vmem>>, vector<1x8x8x128xbf16>
    %19 = vector.shape_cast %18 : vector<1x8x8x128xbf16> to vector<64x128xbf16>
    %20 = tpu.concatenate %17, %19 in 1 : vector<64x128xbf16>, vector<64x128xbf16> -> vector<64x256xbf16>
    %c256 = arith.constant 256 : index
    %c0_25 = arith.constant 0 : index
    %21 = vector.load %arg2[%c256, %c0_25] : memref<1152x128xbf16, #tpu.memory_space<vmem>>, vector<256x128xbf16>
    %cst_26 = arith.constant dense<0.000000e+00> : vector<64x128xf32>
    %22 = tpu.matmul %20, %21, %cst_26 {dimension_numbers = #tpu.dot_dimension_numbers<[1], [0], [0], [1], [0, 0, 1, 1], [], []>} : vector<64x256xbf16>, vector<256x128xbf16>, vector<64x128xf32> -> vector<64x128xf32>
    %23 = arith.addf %15, %22 : vector<64x128xf32>
    %c0_27 = arith.constant 0 : index
    %c1_28 = arith.constant 1 : index
    %c1_29 = arith.constant 1 : index
    %c0_30 = arith.constant 0 : index
    %24 = vector.load %arg1[%c0_27, %c1_28, %c1_29, %c0_30] : memref<1x10x16x128xbf16, #tpu.memory_space<vmem>>, vector<1x8x8x128xbf16>
    %25 = vector.shape_cast %24 : vector<1x8x8x128xbf16> to vector<64x128xbf16>
    %c0_31 = arith.constant 0 : index
    %c1_32 = arith.constant 1 : index
    %c2_33 = arith.constant 2 : index
    %c0_34 = arith.constant 0 : index
    %26 = vector.load %arg1[%c0_31, %c1_32, %c2_33, %c0_34] : memref<1x10x16x128xbf16, #tpu.memory_space<vmem>>, vector<1x8x8x128xbf16>
    %27 = vector.shape_cast %26 : vector<1x8x8x128xbf16> to vector<64x128xbf16>
    %28 = tpu.concatenate %25, %27 in 1 : vector<64x128xbf16>, vector<64x128xbf16> -> vector<64x256xbf16>
    %c512 = arith.constant 512 : index
    %c0_35 = arith.constant 0 : index
    %29 = vector.load %arg2[%c512, %c0_35] : memref<1152x128xbf16, #tpu.memory_space<vmem>>, vector<256x128xbf16>
    %cst_36 = arith.constant dense<0.000000e+00> : vector<64x128xf32>
    %30 = tpu.matmul %28, %29, %cst_36 {dimension_numbers = #tpu.dot_dimension_numbers<[1], [0], [0], [1], [0, 0, 1, 1], [], []>} : vector<64x256xbf16>, vector<256x128xbf16>, vector<64x128xf32> -> vector<64x128xf32>
    %31 = arith.addf %23, %30 : vector<64x128xf32>
    %c0_37 = arith.constant 0 : index
    %c2_38 = arith.constant 2 : index
    %c0_39 = arith.constant 0 : index
    %c0_40 = arith.constant 0 : index
    %32 = vector.load %arg1[%c0_37, %c2_38, %c0_39, %c0_40] : memref<1x10x16x128xbf16, #tpu.memory_space<vmem>>, vector<1x8x8x128xbf16>
    %33 = vector.shape_cast %32 : vector<1x8x8x128xbf16> to vector<64x128xbf16>
    %c0_41 = arith.constant 0 : index
    %c2_42 = arith.constant 2 : index
    %c1_43 = arith.constant 1 : index
    %c0_44 = arith.constant 0 : index
    %34 = vector.load %arg1[%c0_41, %c2_42, %c1_43, %c0_44] : memref<1x10x16x128xbf16, #tpu.memory_space<vmem>>, vector<1x8x8x128xbf16>
    %35 = vector.shape_cast %34 : vector<1x8x8x128xbf16> to vector<64x128xbf16>
    %36 = tpu.concatenate %33, %35 in 1 : vector<64x128xbf16>, vector<64x128xbf16> -> vector<64x256xbf16>
    %c768 = arith.constant 768 : index
    %c0_45 = arith.constant 0 : index
    %37 = vector.load %arg2[%c768, %c0_45] : memref<1152x128xbf16, #tpu.memory_space<vmem>>, vector<256x128xbf16>
    %cst_46 = arith.constant dense<0.000000e+00> : vector<64x128xf32>
    %38 = tpu.matmul %36, %37, %cst_46 {dimension_numbers = #tpu.dot_dimension_numbers<[1], [0], [0], [1], [0, 0, 1, 1], [], []>} : vector<64x256xbf16>, vector<256x128xbf16>, vector<64x128xf32> -> vector<64x128xf32>
    %39 = arith.addf %31, %38 : vector<64x128xf32>
    %c0_47 = arith.constant 0 : index
    %c2_48 = arith.constant 2 : index
    %c2_49 = arith.constant 2 : index
    %c0_50 = arith.constant 0 : index
    %40 = vector.load %arg1[%c0_47, %c2_48, %c2_49, %c0_50] : memref<1x10x16x128xbf16, #tpu.memory_space<vmem>>, vector<1x8x8x128xbf16>
    %41 = vector.shape_cast %40 : vector<1x8x8x128xbf16> to vector<64x128xbf16>
    %c1024 = arith.constant 1024 : index
    %c0_51 = arith.constant 0 : index
    %42 = vector.load %arg2[%c1024, %c0_51] : memref<1152x128xbf16, #tpu.memory_space<vmem>>, vector<128x128xbf16>
    %cst_52 = arith.constant dense<0.000000e+00> : vector<64x128xf32>
    %43 = tpu.matmul %41, %42, %cst_52 {dimension_numbers = #tpu.dot_dimension_numbers<[1], [0], [0], [1], [0, 0, 1, 1], [], []>} : vector<64x128xbf16>, vector<128x128xbf16>, vector<64x128xf32> -> vector<64x128xf32>
    %44 = arith.addf %39, %43 : vector<64x128xf32>
    %c0_53 = arith.constant 0 : index
    %c0_54 = arith.constant 0 : index
    %45 = vector.load %arg6[%c0_53, %c0_54] : memref<1x128xf32, #tpu.memory_space<vmem>>, vector<1x128xf32>
    %46 = vector.broadcast %45 : vector<1x128xf32> to vector<64x128xf32>
    %47 = arith.addf %44, %46 : vector<64x128xf32>
    %cst_55 = arith.constant 0.000000e+00 : f32
    %48 = vector.broadcast %cst_55 : f32 to vector<64x128xf32>
    %49 = arith.maximumf %47, %48 : vector<64x128xf32>
    %cst_56 = arith.constant 0.000000e+00 : bf16
    %50 = vector.broadcast %cst_56 : bf16 to vector<1x1x16x128xbf16>
    %c0_57 = arith.constant 0 : index
    %c0_58 = arith.constant 0 : index
    %c0_59 = arith.constant 0 : index
    %c0_60 = arith.constant 0 : index
    %51 = vector.load %arg9[%c0_57, %c0_58, %c0_59, %c0_60] : memref<1x10x16x128xbf16, #tpu.memory_space<vmem>>, vector<1x1x16x128xbf16>
    tpu.vector_store %arg9[%c0_57, %c0_58, %c0_59, %c0_60], %50 {strides = array<i32>} : memref<1x10x16x128xbf16, #tpu.memory_space<vmem>>, vector<1x1x16x128xbf16>,
    %c0_61 = arith.constant 0 : index
    %c9 = arith.constant 9 : index
    %c0_62 = arith.constant 0 : index
    %c0_63 = arith.constant 0 : index
    %52 = vector.load %arg9[%c0_61, %c9, %c0_62, %c0_63] : memref<1x10x16x128xbf16, #tpu.memory_space<vmem>>, vector<1x1x16x128xbf16>
    tpu.vector_store %arg9[%c0_61, %c9, %c0_62, %c0_63], %50 {strides = array<i32>} : memref<1x10x16x128xbf16, #tpu.memory_space<vmem>>, vector<1x1x16x128xbf16>,
    %cst_64 = arith.constant 0.000000e+00 : bf16
    %53 = vector.broadcast %cst_64 : bf16 to vector<1x8x1x128xbf16>
    %c0_65 = arith.constant 0 : index
    %c1_66 = arith.constant 1 : index
    %c0_67 = arith.constant 0 : index
    %c0_68 = arith.constant 0 : index
    %54 = vector.load %arg9[%c0_65, %c1_66, %c0_67, %c0_68] : memref<1x10x16x128xbf16, #tpu.memory_space<vmem>>, vector<1x8x1x128xbf16>
    tpu.vector_store %arg9[%c0_65, %c1_66, %c0_67, %c0_68], %53 {strides = array<i32>} : memref<1x10x16x128xbf16, #tpu.memory_space<vmem>>, vector<1x8x1x128xbf16>,
    %cst_69 = arith.constant 0.000000e+00 : bf16
    %55 = vector.broadcast %cst_69 : bf16 to vector<1x8x7x128xbf16>
    %c0_70 = arith.constant 0 : index
    %c1_71 = arith.constant 1 : index
    %c9_72 = arith.constant 9 : index
    %c0_73 = arith.constant 0 : index
    %56 = vector.load %arg9[%c0_70, %c1_71, %c9_72, %c0_73] : memref<1x10x16x128xbf16, #tpu.memory_space<vmem>>, vector<1x8x7x128xbf16>
    tpu.vector_store %arg9[%c0_70, %c1_71, %c9_72, %c0_73], %55 {strides = array<i32>} : memref<1x10x16x128xbf16, #tpu.memory_space<vmem>>, vector<1x8x7x128xbf16>,
    %57 = vector.shape_cast %49 : vector<64x128xf32> to vector<1x8x8x128xf32>
    %58 = arith.truncf %57 : vector<1x8x8x128xf32> to vector<1x8x8x128xbf16>
    %c0_74 = arith.constant 0 : index
    %c1_75 = arith.constant 1 : index
    %c1_76 = arith.constant 1 : index
    %c0_77 = arith.constant 0 : index
    %59 = vector.load %arg9[%c0_74, %c1_75, %c1_76, %c0_77] : memref<1x10x16x128xbf16, #tpu.memory_space<vmem>>, vector<1x8x8x128xbf16>
    tpu.vector_store %arg9[%c0_74, %c1_75, %c1_76, %c0_77], %58 {strides = array<i32>} : memref<1x10x16x128xbf16, #tpu.memory_space<vmem>>, vector<1x8x8x128xbf16>,
    %cst_78 = arith.constant 0.000000e+00 : f32
    %60 = vector.broadcast %cst_78 : f32 to vector<64x128xf32>
    %c0_79 = arith.constant 0 : index
    %c0_80 = arith.constant 0 : index
    %c0_81 = arith.constant 0 : index
    %c0_82 = arith.constant 0 : index
    %61 = vector.load %arg9[%c0_79, %c0_80, %c0_81, %c0_82] : memref<1x10x16x128xbf16, #tpu.memory_space<vmem>>, vector<1x8x8x128xbf16>
    %62 = vector.shape_cast %61 : vector<1x8x8x128xbf16> to vector<64x128xbf16>
    %c0_83 = arith.constant 0 : index
    %c0_84 = arith.constant 0 : index
    %c1_85 = arith.constant 1 : index
    %c0_86 = arith.constant 0 : index
    %63 = vector.load %arg9[%c0_83, %c0_84, %c1_85, %c0_86] : memref<1x10x16x128xbf16, #tpu.memory_space<vmem>>, vector<1x8x8x128xbf16>
    %64 = vector.shape_cast %63 : vector<1x8x8x128xbf16> to vector<64x128xbf16>
    %65 = tpu.concatenate %62, %64 in 1 : vector<64x128xbf16>, vector<64x128xbf16> -> vector<64x256xbf16>
    %c0_87 = arith.constant 0 : index
    %c0_88 = arith.constant 0 : index
    %66 = vector.load %arg3[%c0_87, %c0_88] : memref<1152x128xbf16, #tpu.memory_space<vmem>>, vector<256x128xbf16>
    %cst_89 = arith.constant dense<0.000000e+00> : vector<64x128xf32>
    %67 = tpu.matmul %65, %66, %cst_89 {dimension_numbers = #tpu.dot_dimension_numbers<[1], [0], [0], [1], [0, 0, 1, 1], [], []>} : vector<64x256xbf16>, vector<256x128xbf16>, vector<64x128xf32> -> vector<64x128xf32>
    %68 = arith.addf %60, %67 : vector<64x128xf32>
    %c0_90 = arith.constant 0 : index
    %c0_91 = arith.constant 0 : index
    %c2_92 = arith.constant 2 : index
    %c0_93 = arith.constant 0 : index
    %69 = vector.load %arg9[%c0_90, %c0_91, %c2_92, %c0_93] : memref<1x10x16x128xbf16, #tpu.memory_space<vmem>>, vector<1x8x8x128xbf16>
    %70 = vector.shape_cast %69 : vector<1x8x8x128xbf16> to vector<64x128xbf16>
    %c0_94 = arith.constant 0 : index
    %c1_95 = arith.constant 1 : index
    %c0_96 = arith.constant 0 : index
    %c0_97 = arith.constant 0 : index
    %71 = vector.load %arg9[%c0_94, %c1_95, %c0_96, %c0_97] : memref<1x10x16x128xbf16, #tpu.memory_space<vmem>>, vector<1x8x8x128xbf16>
    %72 = vector.shape_cast %71 : vector<1x8x8x128xbf16> to vector<64x128xbf16>
    %73 = tpu.concatenate %70, %72 in 1 : vector<64x128xbf16>, vector<64x128xbf16> -> vector<64x256xbf16>
    %c256_98 = arith.constant 256 : index
    %c0_99 = arith.constant 0 : index
    %74 = vector.load %arg3[%c256_98, %c0_99] : memref<1152x128xbf16, #tpu.memory_space<vmem>>, vector<256x128xbf16>
    %cst_100 = arith.constant dense<0.000000e+00> : vector<64x128xf32>
    %75 = tpu.matmul %73, %74, %cst_100 {dimension_numbers = #tpu.dot_dimension_numbers<[1], [0], [0], [1], [0, 0, 1, 1], [], []>} : vector<64x256xbf16>, vector<256x128xbf16>, vector<64x128xf32> -> vector<64x128xf32>
    %76 = arith.addf %68, %75 : vector<64x128xf32>
    %c0_101 = arith.constant 0 : index
    %c1_102 = arith.constant 1 : index
    %c1_103 = arith.constant 1 : index
    %c0_104 = arith.constant 0 : index
    %77 = vector.load %arg9[%c0_101, %c1_102, %c1_103, %c0_104] : memref<1x10x16x128xbf16, #tpu.memory_space<vmem>>, vector<1x8x8x128xbf16>
    %78 = vector.shape_cast %77 : vector<1x8x8x128xbf16> to vector<64x128xbf16>
    %c0_105 = arith.constant 0 : index
    %c1_106 = arith.constant 1 : index
    %c2_107 = arith.constant 2 : index
    %c0_108 = arith.constant 0 : index
    %79 = vector.load %arg9[%c0_105, %c1_106, %c2_107, %c0_108] : memref<1x10x16x128xbf16, #tpu.memory_space<vmem>>, vector<1x8x8x128xbf16>
    %80 = vector.shape_cast %79 : vector<1x8x8x128xbf16> to vector<64x128xbf16>
    %81 = tpu.concatenate %78, %80 in 1 : vector<64x128xbf16>, vector<64x128xbf16> -> vector<64x256xbf16>
    %c512_109 = arith.constant 512 : index
    %c0_110 = arith.constant 0 : index
    %82 = vector.load %arg3[%c512_109, %c0_110] : memref<1152x128xbf16, #tpu.memory_space<vmem>>, vector<256x128xbf16>
    %cst_111 = arith.constant dense<0.000000e+00> : vector<64x128xf32>
    %83 = tpu.matmul %81, %82, %cst_111 {dimension_numbers = #tpu.dot_dimension_numbers<[1], [0], [0], [1], [0, 0, 1, 1], [], []>} : vector<64x256xbf16>, vector<256x128xbf16>, vector<64x128xf32> -> vector<64x128xf32>
    %84 = arith.addf %76, %83 : vector<64x128xf32>
    %c0_112 = arith.constant 0 : index
    %c2_113 = arith.constant 2 : index
    %c0_114 = arith.constant 0 : index
    %c0_115 = arith.constant 0 : index
    %85 = vector.load %arg9[%c0_112, %c2_113, %c0_114, %c0_115] : memref<1x10x16x128xbf16, #tpu.memory_space<vmem>>, vector<1x8x8x128xbf16>
    %86 = vector.shape_cast %85 : vector<1x8x8x128xbf16> to vector<64x128xbf16>
    %c0_116 = arith.constant 0 : index
    %c2_117 = arith.constant 2 : index
    %c1_118 = arith.constant 1 : index
    %c0_119 = arith.constant 0 : index
    %87 = vector.load %arg9[%c0_116, %c2_117, %c1_118, %c0_119] : memref<1x10x16x128xbf16, #tpu.memory_space<vmem>>, vector<1x8x8x128xbf16>
    %88 = vector.shape_cast %87 : vector<1x8x8x128xbf16> to vector<64x128xbf16>
    %89 = tpu.concatenate %86, %88 in 1 : vector<64x128xbf16>, vector<64x128xbf16> -> vector<64x256xbf16>
    %c768_120 = arith.constant 768 : index
    %c0_121 = arith.constant 0 : index
    %90 = vector.load %arg3[%c768_120, %c0_121] : memref<1152x128xbf16, #tpu.memory_space<vmem>>, vector<256x128xbf16>
    %cst_122 = arith.constant dense<0.000000e+00> : vector<64x128xf32>
    %91 = tpu.matmul %89, %90, %cst_122 {dimension_numbers = #tpu.dot_dimension_numbers<[1], [0], [0], [1], [0, 0, 1, 1], [], []>} : vector<64x256xbf16>, vector<256x128xbf16>, vector<64x128xf32> -> vector<64x128xf32>
    %92 = arith.addf %84, %91 : vector<64x128xf32>
    %c0_123 = arith.constant 0 : index
    %c2_124 = arith.constant 2 : index
    %c2_125 = arith.constant 2 : index
    %c0_126 = arith.constant 0 : index
    %93 = vector.load %arg9[%c0_123, %c2_124, %c2_125, %c0_126] : memref<1x10x16x128xbf16, #tpu.memory_space<vmem>>, vector<1x8x8x128xbf16>
    %94 = vector.shape_cast %93 : vector<1x8x8x128xbf16> to vector<64x128xbf16>
    %c1024_127 = arith.constant 1024 : index
    %c0_128 = arith.constant 0 : index
    %95 = vector.load %arg3[%c1024_127, %c0_128] : memref<1152x128xbf16, #tpu.memory_space<vmem>>, vector<128x128xbf16>
    %cst_129 = arith.constant dense<0.000000e+00> : vector<64x128xf32>
    %96 = tpu.matmul %94, %95, %cst_129 {dimension_numbers = #tpu.dot_dimension_numbers<[1], [0], [0], [1], [0, 0, 1, 1], [], []>} : vector<64x128xbf16>, vector<128x128xbf16>, vector<64x128xf32> -> vector<64x128xf32>
    %97 = arith.addf %92, %96 : vector<64x128xf32>
    %c0_130 = arith.constant 0 : index
    %c0_131 = arith.constant 0 : index
    %98 = vector.load %arg7[%c0_130, %c0_131] : memref<1x128xf32, #tpu.memory_space<vmem>>, vector<1x128xf32>
    %99 = vector.broadcast %98 : vector<1x128xf32> to vector<64x128xf32>
    %100 = arith.addf %97, %99 : vector<64x128xf32>
    %101 = arith.addf %100, %6 : vector<64x128xf32>
    %cst_132 = arith.constant 0.000000e+00 : f32
    %102 = vector.broadcast %cst_132 : f32 to vector<64x128xf32>
    %103 = arith.maximumf %101, %102 : vector<64x128xf32>
    %104 = vector.shape_cast %103 : vector<64x128xf32> to vector<1x8x8x128xf32>
    %105 = arith.truncf %104 : vector<1x8x8x128xf32> to vector<1x8x8x128xbf16>
    %c0_133 = arith.constant 0 : index
    %c0_134 = arith.constant 0 : index
    %c0_135 = arith.constant 0 : index
    %c0_136 = arith.constant 0 : index
    %106 = vector.load %arg8[%c0_133, %c0_134, %c0_135, %c0_136] : memref<1x8x8x128xbf16, #tpu.memory_space<vmem>>, vector<1x8x8x128xbf16>
    tpu.vector_store %arg8[%c0_133, %c0_134, %c0_135, %c0_136], %105 {strides = array<i32>} : memref<1x8x8x128xbf16, #tpu.memory_space<vmem>>, vector<1x8x8x128xbf16>,
    return
  }
  func.func @transform_0(%arg0: i32) -> (i32, i32, i32, i32) {
    %c0_i32 = arith.constant 0 : i32
    %c0_i32_0 = arith.constant 0 : i32
    %c0_i32_1 = arith.constant 0 : i32
    %c0_i32_2 = arith.constant 0 : i32
    return %arg0, %c0_i32, %c0_i32_0, %c0_i32_1 : i32, i32, i32, i32
  }
  func.func @transform_1(%arg0: i32) -> (i32, i32) {
    %c0_i32 = arith.constant 0 : i32
    %c0_i32_0 = arith.constant 0 : i32
    %c0_i32_1 = arith.constant 0 : i32
    return %c0_i32, %c0_i32_0 : i32, i32
  }
  func.func @transform_2(%arg0: i32) -> (i32, i32) {
    %c0_i32 = arith.constant 0 : i32
    %c0_i32_0 = arith.constant 0 : i32
    %c0_i32_1 = arith.constant 0 : i32
    return %c0_i32, %c0_i32_0 : i32, i32
  }
  func.func @transform_3(%arg0: i32) -> (i32, i32) {
    %c0_i32 = arith.constant 0 : i32
    %c0_i32_0 = arith.constant 0 : i32
    %c0_i32_1 = arith.constant 0 : i32
    return %c0_i32, %c0_i32_0 : i32, i32
  }
  func.func @transform_4(%arg0: i32) -> (i32, i32) {
    %c0_i32 = arith.constant 0 : i32
    %c0_i32_0 = arith.constant 0 : i32
    %c0_i32_1 = arith.constant 0 : i32
    return %c0_i32, %c0_i32_0 : i32, i32
  }
  func.func @transform_5(%arg0: i32) -> (i32, i32) {
    %c0_i32 = arith.constant 0 : i32
    %c0_i32_0 = arith.constant 0 : i32
    %c0_i32_1 = arith.constant 0 : i32
    return %c0_i32, %c0_i32_0 : i32, i32
  }
  func.func @transform_6(%arg0: i32) -> (i32, i32) {
    %c0_i32 = arith.constant 0 : i32
    %c0_i32_0 = arith.constant 0 : i32
    %c0_i32_1 = arith.constant 0 : i32
    return %c0_i32, %c0_i32_0 : i32, i32
  }
  func.func @transform_7(%arg0: i32) -> (i32, i32, i32, i32) {
    %c0_i32 = arith.constant 0 : i32
    %c0_i32_0 = arith.constant 0 : i32
    %c0_i32_1 = arith.constant 0 : i32
    %c0_i32_2 = arith.constant 0 : i32
    return %arg0, %c0_i32, %c0_i32_0, %c0_i32_1 : i32, i32, i32, i32
  }
}

</mosaic_0001>

<bundles_post_ra>
// kernel: tpu_custom_call.1
= control target key start
LH: loop header
LB: loop body
LE: loop exit
PB: predicated region body
PF: predicated region fallthrough
CT: control target
= control target key end

     0   :  { %s6420_s0 = inlined_call_operand.hbm [shape: bf16[2,10,16,128], index: 0, kind: input, shape index: {}]   ;;  %s6421_s1 = inlined_call_operand.hbm [shape: bf16[1152,128], index: 1, kind: input, shape index: {}]   ;;  %s6422_s2 = inlined_call_operand.hbm [shape: bf16[1152,128], index: 2, kind: input, shape index: {}]   ;;  %s6423_s3 = inlined_call_operand.hbm [shape: bf16[128,128], index: 3, kind: input, shape index: {}]   ;;  %s6424_s4 = inlined_call_operand.vmem [shape: f32[1,128], index: 4, kind: input, shape index: {}]   ;;  %s6425_s5 = inlined_call_operand.vmem [shape: f32[1,128], index: 5, kind: input, shape index: {}]   ;;  %s6426_s6 = inlined_call_operand.vmem [shape: f32[1,128], index: 6, kind: input, shape index: {}]   ;;  %s6427_s7 = inlined_call_operand.hbm [shape: bf16[2,8,8,128], index: 7, kind: output, shape index: {}]  }
   0x1   :  { %6430 = sst [smem:[#allocation24_spill]] %s6421_s1 }
   0x2   :  { %6431 = sst [smem:[#allocation25_spill]] %s6422_s2 }
   0x3   :  { %6432 = sst [smem:[#allocation26_spill]] %s6423_s3 }
   0x4   :  { %12 = vsyncpa [#allocation4], 0 }
   0x5   :  { %14 = vsyncpa [#allocation4 + $0x1], 0 }
   0x6   :  { %15 = vsyncpa [#allocation7], 0 }
   0x7   :  { %16 = vsyncpa [#allocation10], 0 }
   0x8   :  { %17 = vsyncpa [#allocation5], 0 }
   0x9   :  { %19 = vsyncpa [#allocation5 + $0x1], 0  ;;  %s5393_s24 = smov 0   ;;  %s5395_s25 = smov 0  }
   0xa   :  { %s5397_s26 = smov 0   ;;  %s5399_s27 = smov 0  }
   0xb LB: > { %s5414_s28 = sadd.s32 4294967295, %s5343_s27   ;;  %s4012_s29 = sadd.s32 4294967294, %s5343_s27   ;;  %s5343_s27 = sphi %s5399_s27, %s6472_s27   ;;  %s5339_s26 = sphi %s5397_s26, %s6471_s26   ;;  %s5335_s25 = sphi %s5395_s25, %s6470_s25   ;;  %s5331_s24 = sphi %s5393_s24, %s6469_s24  }
   0xc   : > { %p45_p0 = scmp.ne.s32.totalorder %s5335_s25, %s5331_s24  ;;  %p46_p1 = scmp.eq.s32.totalorder %s5414_s28, 0 }
   0xd   : > { %p195_p2 = scmp.eq.s32.totalorder %s5414_s28, 1  ;;  %p201_p3 = scmp.eq.s32.totalorder %s4012_s29, 1 }
   0xe   : > { %p5423_p4 = por %p46_p1, %p45_p0  ;;  %p4013_p5 = scmp.ge.s32.totalorder %s5343_s27, 1 }
   0xf   : > { %p5428_p6 = por %p201_p3, %p45_p0  ;;  %p208_p7 = scmp.lt.s32.totalorder %s5343_s27, 3 }
  0x10   : > { %s6435_s1 = sld [smem:[#allocation24_spill]]  ;;  %s5345_s13 = smov [#allocation6]  }
  0x11   : > { %p5436_p8 = pnand %p4013_p5, %p208_p7  ;;  %s221_s14 = sshll.u32 %s5345_s13, 4  ;;  %s222_s14 = int_to_ptr.vmem [resolvable:$true] %s221_s14 }
  0x12   : > { %s6438_s2 = sld [smem:[#allocation25_spill]]  ;;  %s6428_s19 = smov 64  }
  0x13   : > { %p5080_p9 = pneg %p5436_p8  ;;  %s6429_s20 = smov 4  }
  0x14   : > { %s5348_s21 = smov [#allocation8]   ;;  %s6439_s3 = sld [smem:[#allocation26_spill]] }
  0x15   : > { %p5444_p10 = pnand %p5080_p9, %p46_p1  ;;  %s235_s22 = sshll.u32 %s5348_s21, 4  ;;  %s236_s22 = int_to_ptr.vmem [resolvable:$true] %s235_s22 }
  0x16   : > { %s219_s11 = sshll.u32 %s6435_s1, 4  ;;  %s5349_s10 = smov [#allocation9]   ;;  %s220_s11 = int_to_ptr.hbm [resolvable:$true] %s219_s11 }
  0x17   : > { %5083 = dma.hbm_to_vmem [thread:$0]  (!%p5444_p10), %s220_s11, 9216, %s222_s14, [#allocation7], %s6428_s19, %s6428_s19, %s6429_s20  }
  0x18   : > { %s233_s18 = sshll.u32 %s6438_s2, 4  ;;  %s249_s11 = sshll.u32 %s5349_s10, 4  ;;  %s234_s18 = int_to_ptr.hbm [resolvable:$true] %s233_s18  ;;  %s250_s11 = int_to_ptr.vmem [resolvable:$true] %s249_s11 }
  0x19   : > { %5086 = dma.hbm_to_vmem [thread:$0]  (!%p5444_p10), %s234_s18, 9216, %s236_s22, [#allocation7], %s6428_s19, %s6428_s19, %s6429_s20  }
  0x1a   : > { %s247_s9 = sshll.u32 %s6439_s3, 4  ;;  %s5466_s13 = sadd.s32 1, %s5343_s27   ;;  %s248_s9 = int_to_ptr.hbm [resolvable:$true] %s247_s9 }
  0x1b   : > { %5089 = dma.hbm_to_vmem [thread:$0]  (!%p5444_p10), %s248_s9, 1024, %s250_s11, [#allocation10], %s6428_s19, %s6428_s19, %s6429_s20  }
  0x1c   : > { %s29_s14 = ssub.s32 %s5343_s27, %s5466_s13  ;;  %s32_s16 = sadd.s32 1, %s5339_s26 }
  0x1d   : > { %p30_p12 = scmp.eq.s32.totalorder %s29_s14, 0  ;;  %p39_p13 = scmp.ne.s32.totalorder %s5339_s26, %s5335_s25 }
  0x1e   : > { %p40_p0 = scmp.eq.s32.totalorder %s5343_s27, 0  ;;  %p5101_p3 = scmp.lt.s32.totalorder %s5343_s27, 2 }
  0x1f   : > { %s5481_s17 = scalar_select %p30_p12, %s5339_s26, %s32_s16  }
  0x20   : > { %p41_p5 = por %p40_p0, %p39_p13  ;;  %p5485_p7 = por %p195_p2, %p39_p13 }
  0x21   : > { %s272_s15 = sand.u32 1, %s5339_s26   ;;  %s5062_s21 = smul.u32 80, %s5343_s27 }
  0x22   : > { %s5061_s22 = smul.u32 80, %s272_s15  ;;  %p5494_p9 = pnand %p5101_p3, %p41_p5 }
  0x23   : > { %s281_s9 = scalar_lea.hbm %s6420_s0, %s5062_s21  ;;  %s273_s19 = scalar_lea.sflag [#allocation4], %s272_s15 }
  0x24   : > { %s282_s11 = sshll.u32 %s281_s9, 4  ;;  %s276_s14 = scalar_lea.vmem [#allocation3], %s5061_s22  ;;  %s283_s11 = int_to_ptr.hbm [resolvable:$true] %s282_s11 }
  0x25   : > { %s284_s16 = sshll.u32 %s276_s14, 4  ;;  %s5239_s20 = sshra.s32 %s283_s11, 4  ;;  %s285_s16 = int_to_ptr.vmem [resolvable:$true] %s284_s16  ;;  %s5240_s20 = int_to_ptr.hbm [resolvable:$true] %s5239_s20 }
  0x26   : > { %s5241_s1 = scalar_lea.hbm %s5240_s20, 80  ;;  %p5243_p10 = pneg %p5494_p9 }
  0x27   : > { %p5242_p2 = scmp.ne.s32.totalorder %s5240_s20, %s5241_s1  ;;  %s5246_s29 = scalar_lea.hbm %s6420_s0, 160 }
  0x28   : > { %p5247_p0 = scmp.lt.s32.totalorder %s5240_s20, %s6420_s0  ;;  %p5248_p3 = scmp.lt.s32.totalorder %s5246_s29, %s5241_s1 }
  0x29   : > { %p5244_p12 = pnand %p5243_p10, %p5242_p2 }
  0x2a   : > { %p5249_p5 = por %p5248_p3, %p5247_p0 }
  0x2b   : > { %p5245_p13 = pneg %p5244_p12 }
  0x2d   : > { %p5250_p11 = pnand %p5249_p5, %p5245_p13 }
  0x2f   : > { %5253 = shalt.err (!%p5250_p11)
}
  0x30   : > { %s6442_s15 = smov 4   ;;  %s6443_s22 = smov 64  }
  0x31   : > { %5093 = dma.hbm_to_vmem [thread:$0]  (!%p5494_p9), %s283_s11, 1280, %s285_s16, %s273_s19, %s6443_s22, %s6443_s22, %s6442_s15  }
  0x32   : > { %296 = sbr.rel (%p5436_p8) target bundleno = 697 (0x2b9), region = 48 }
  0x37   : > { %s5514_s9 = sand.u32 1, %s5335_s25  }
  0x38   : > { %s5063_s2 = smul.u32 80, %s5514_s9  ;;  %s299_s1 = scalar_lea.sflag [#allocation4], %s5514_s9 }
  0x3a   : > { %s5518_s3 = scalar_lea.vmem [#allocation3], %s5063_s2 }
  0x3b   : > { %5314 = dma.done.wait (%p5423_p4), %s299_s1, 1280  }
  0x3c   : > { %5316 = vsyncadd (%p5423_p4), %s299_s1, 4294966016 }
  0x3d   : > { %5318 = dma.done.wait (%p46_p1), [#allocation7], 18432  }
  0x3e   : > { %5320 = vsyncadd (%p46_p1), [#allocation7], 4294948864 }
  0x3f   : > { %5322 = dma.done.wait (%p46_p1), [#allocation10], 1024  }
  0x40   : > { %5324 = vsyncadd (%p46_p1), [#allocation10], 4294966272  ;;  %v4844_v0 = vld [vmem:[#allocation9 + $0x38] sm:$0xff]  ;;  %v4843_v3 = vld [vmem:[#allocation9 + $0x30] sm:$0xff]  ;;  %vm367_vm0 = vsmask.f32 3328 }
  0x41   : > { %v4876_v1 = vld [vmem:[#allocation6 + $0xb8] sm:$0xff]  ;;  %5037 = vmatpush.bf16.msra.mxu3 %v4844_v0  ;;  %v4875_v4 = vld [vmem:[#allocation6 + $0xb0] sm:$0xff]  ;;  %566 = vmatpush.bf16.msra.mxu0 %v4844_v0  ;;  %v4842_v6 = vld [vmem:[#allocation9 + $0x28] sm:$0xff]  ;;  %vm368_vm1 = vsmask.f32 7440  ;;  %vm819_vm2 = vcmask 1042432  }
  0x42   : > { %v4884_v2 = vld [vmem:[#allocation6 + $0xf8] sm:$0xff]  ;;  %1030 = vmatpush.bf16.msra.mxu1 %v4876_v1  ;;  %v4883_v5 = vld [vmem:[#allocation6 + $0xf0] sm:$0xff]  ;;  %v4874_v7 = vld [vmem:[#allocation6 + $0xa8] sm:$0xff]  ;;  %vm820_vm3 = vcmask 1046532   ;;  %vm2070_vm6 = vcmask 1040384   ;;  %vm2097_vm8 = vcmask 1043456  }
  0x43   : > { %1059 = vmatpush.bf16.msra.mxu2 %v4884_v2  ;;  %v4882_v8 = vld [vmem:[#allocation6 + $0xe8] sm:$0xff]  ;;  %v4034_v11 = vld [vmem:[%s5518_s3 + $0x30] sm:$0xf]  ;;  %v5538_v12 = vld [vmem:[%s5518_s3 + $0x34] sm:$0x1]  ;;  %s4023_s14 = sshll.u32 %s5514_s9, 5 }
  0x44   : > { %v4032_v9 = vld [vmem:[%s5518_s3 + $0x28] sm:$0xf]  ;;  %v5534_v10 = vld [vmem:[%s5518_s3 + $0x2c] sm:$0x1]  ;;  %v441_v16 = vshrl.u32 %v4034_v11, 16  ;;  %v4841_v17 = vld [vmem:[#allocation9 + $0x20] sm:$0xff] }
  0x45   : > { %5038 = vmatpush.bf16.msra.mxu3 %v4843_v3  ;;  %567 = vmatpush.bf16.msra.mxu0 %v4843_v3  ;;  %v427_v13 = vshrl.u32 %v4032_v9, 16  ;;  %v430_v14 = vshll.u32 %v4032_v9, 16  ;;  %v436_v15 = vshll.u32 %v5534_v10, 16  ;;  %v4873_v18 = vld [vmem:[#allocation6 + $0xa0] sm:$0xff]  ;;  %v444_v19 = vshll.u32 %v4034_v11, 16  ;;  %v4840_v32 = vld [vmem:[#allocation9 + $0x18] sm:$0xff]  ;;  %vm5555_vm4 = vmor %vm367_vm0, %vm368_vm1 }
  0x46   : > { %1031 = vmatpush.bf16.msra.mxu1 %v4875_v4  ;;  %v5542_v20 = vld [vmem:[%s5518_s3 + $0x4] sm:$0x1]  ;;  %v443_v24 = vrot.slane %v441_v16, 4  ;;  %v795_v25 = vld [vmem:[%s5518_s3] sm:$0xe]  ;;  %v450_v27 = vshll.u32 %v5538_v12, 16  ;;  %vm5566_vm5 = vmor %vm819_vm2, %vm820_vm3 }
  0x47   : > { %1060 = vmatpush.bf16.msra.mxu2 %v4883_v5  ;;  %v4881_v21 = vld [vmem:[#allocation6 + $0xe0] sm:$0xff]  ;;  %v429_v22 = vrot.slane %v427_v13, 4  ;;  %v432_v23 = vrot.slane %v430_v14, 5  ;;  %v446_v26 = vrot.slane %v444_v19, 5  ;;  %v5547_v28 = vld [vmem:[%s5518_s3 + $0xc] sm:$0x1] }
  0x48   : > { %v796_v29 = vld [vmem:[%s5518_s3 + $0x8] sm:$0xe]  ;;  %v5550_v31 = vrot.slane %v436_v15, 5  ;;  %v4088_v36 = vrot.slane %v795_v25, 9  ;;  %v824_v37 = vrot.slane %v5542_v20, 5  ;;  %v828_v41 = vrot.slane %v5547_v28, 5 }
  0x49   : > { %5039 = vmatpush.bf16.msra.mxu3 %v4842_v6  ;;  %568 = vmatpush.bf16.msra.mxu0 %v4842_v6  ;;  %v433_v30 = vor.u32 %v432_v23, %v429_v22  ;;  %v4872_v33 = vld [vmem:[#allocation6 + $0x98] sm:$0xff]  ;;  %v447_v35 = vor.u32 %v446_v26, %v443_v24  ;;  %v4089_v38 = vrot.slane %v796_v29, 9  ;;  %v452_v45 = vrot.slane %v450_v27, 5  ;;  %v4026_v47 = vld [vmem:[%s5518_s3 + $0x10] sm:$0xf]  ;;  %v4878_v14 = vld [vmem:[#allocation6 + $0xc8] sm:$0xff] }
  0x4a   : > { %1032 = vmatpush.bf16.msra.mxu1 %v4874_v7  ;;  %v4880_v34 = vld [vmem:[#allocation6 + $0xd8] sm:$0xff]  ;;  %v5572_v49 = vld [vmem:[%s5518_s3 + $0x14] sm:$0x1]  ;;  %v385_v55 = vshrl.u32 %v4026_v47, 16  ;;  %v825_v59 = vsel %vm5566_vm5, %v4088_v36, %v824_v37  ;;  %v4038_v62 = vld [vmem:[%s5518_s3 + $0x40] sm:$0xf] }
  0x4b   : > { %1061 = vmatpush.bf16.msra.mxu2 %v4882_v8  ;;  %v434_v40 = vrot.slane %v433_v30, 4  ;;  %v4024_v42 = vld [vmem:[%s5518_s3 + $0x8] sm:$0xf]  ;;  %v5562_v43 = vld [vmem:[%s5518_s3 + $0xc] sm:$0x1]  ;;  %v448_v44 = vrot.slane %v447_v35, 4  ;;  %v829_v60 = vsel %vm5566_vm5, %v4089_v38, %v828_v41  ;;  %v862_v15 = vunpack.c.l.b16 %v825_v59 }
  0x4c   : > { %v371_v48 = vshrl.u32 %v4024_v42, 16  ;;  %v374_v50 = vshll.u32 %v4024_v42, 16  ;;  %v380_v51 = vshll.u32 %v5562_v43, 16  ;;  %v4839_v52 = vld [vmem:[#allocation9 + $0x10] sm:$0xff]  ;;  %v4036_v56 = vld [vmem:[%s5518_s3 + $0x38] sm:$0xf]  ;;  %v863_v16 = vunpack.c.l.b16 %v829_v60 }
  0x4d   : > { %5040 = vmatpush.bf16.msra.mxu3 %v4841_v17  ;;  %569 = vmatpush.bf16.msra.mxu0 %v4841_v17  ;;  %v4871_v53 = vld [vmem:[#allocation6 + $0x90] sm:$0xff]  ;;  %v439_v58 = vsel %vm5555_vm4, %v434_v40, %v5550_v31  ;;  %v453_v63 = vsel %vm5555_vm4, %v448_v44, %v452_v45  ;;  %v387_v0 = vrot.slane %v385_v55, 4  ;;  %v388_v1 = vshll.u32 %v4026_v47, 16  ;;  %v4838_v7 = vld [vmem:[#allocation9 + $0x8] sm:$0xff]  ;;  %v4837_v19 = vld [vmem:[#allocation9] sm:$0xff]  ;;  %s6370_s16 = scalar_lea.vmem [#allocation11], %s4023_s14 }
  0x4e   : > { %1033 = vmatpush.bf16.msra.mxu1 %v4873_v18  ;;  %v373_v54 = vrot.slane %v371_v48, 4  ;;  %v4879_v57 = vld [vmem:[#allocation6 + $0xd0] sm:$0xff]  ;;  %v376_v61 = vrot.slane %v374_v50, 5  ;;  %v394_v2 = vshll.u32 %v5572_v49, 16  ;;  %v382_v4 = vrot.slane %v380_v51, 5  ;;  %v4870_v8 = vld [vmem:[#allocation6 + $0x88] sm:$0xff] }
  0x4f   : > { %1062 = vmatpush.bf16.msra.mxu2 %v4881_v21  ;;  %v455_v5 = vshrl.u32 %v4036_v56, 16  ;;  %v458_v6 = vshll.u32 %v4036_v56, 16  ;;  %v390_v9 = vrot.slane %v388_v1, 5  ;;  %v5588_v11 = vld [vmem:[%s5518_s3 + $0x3c] sm:$0x1]  ;;  %v469_v13 = vshrl.u32 %v4038_v62, 16 }
  0x50   : > { %v377_v3 = vor.u32 %v376_v61, %v373_v54  ;;  %v472_v18 = vshll.u32 %v4038_v62, 16  ;;  %v4869_v21 = vld [vmem:[#allocation6 + $0x80] sm:$0xff]  ;;  %v506_v22 = vunpack.c.l.b16 %v439_v58  ;;  %v507_v23 = vunpack.c.l.b16 %v453_v63  ;;  %v4106_v27 = vld [vmem:[%s5518_s3 + $0x8] sm:$0xf]  ;;  %v4028_v38 = vld [vmem:[%s5518_s3 + $0x18] sm:$0xf] }
  0x51   : > { %5041 = vmatpush.bf16.msra.mxu3 %v4840_v32  ;;  %570 = vmatpush.bf16.msra.mxu0 %v4840_v32  ;;  %v391_v24 = vor.u32 %v390_v9, %v387_v0  ;;  %v396_v25 = vrot.slane %v394_v2, 5  ;;  %v4877_v26 = vld [vmem:[#allocation6 + $0xc0] sm:$0xff]  ;;  %v457_v31 = vrot.slane %v455_v5, 4  ;;  %v460_v32 = vrot.slane %v458_v6, 5  ;;  %v4856_v41 = vld [vmem:[#allocation6 + $0x38] sm:$0xff]  ;;  %v4891_v2 = vld [vmem:[#allocation6 + $0x130] sm:$0xff] }
  0x52   : > { %1034 = vmatpush.bf16.msra.mxu1 %v4872_v33  ;;  %v378_v17 = vrot.slane %v377_v3, 4  ;;  %v5594_v30 = vld [vmem:[%s5518_s3 + $0x44] sm:$0x1]  ;;  %v464_v33 = vshll.u32 %v5588_v11, 16  ;;  %v471_v36 = vrot.slane %v469_v13, 4  ;;  %v474_v37 = vrot.slane %v472_v18, 5 }
  0x53   : > { %1063 = vmatpush.bf16.msra.mxu2 %v4880_v34  ;;  %v4892_v34 = vld [vmem:[#allocation6 + $0x138] sm:$0xff]  ;;  %v392_v35 = vrot.slane %v391_v24, 4  ;;  %v4865_v40 = vld [vmem:[%s5518_s3 + $0xc] sm:$0xf0]  ;;  %v870_v45 = vpack.c.b16 %v863_v16, %v862_v15  ;;  %v478_v48 = vshll.u32 %v5594_v30, 16  ;;  %v461_v56 = vor.u32 %v460_v32, %v457_v31  ;;  %s5013_s21 = sshll.u32 %s5414_s28, 5 }
  0x54   : > { %v383_v29 = vsel %vm5555_vm4, %v378_v17, %v382_v4  ;;  %v5600_v44 = vld [vmem:[%s5518_s3 + $0x10] sm:$0xe]  ;;  %v5606_v50 = vld [vmem:[%s5518_s3 + $0x1c] sm:$0x1]  ;;  %v4030_v51 = vld [vmem:[%s5518_s3 + $0x20] sm:$0xf]  ;;  %v4107_v59 = vor.u32 %v4865_v40, %v4106_v27  ;;  %v475_v60 = vor.u32 %v474_v37, %v471_v36  ;;  %s3906_s15 = scalar_lea.hbm %s6427_s7, %s5013_s21 }
  0x55   : > { %5042 = vmatpush.bf16.msra.mxu3 %v4839_v52  ;;  %571 = vmatpush.bf16.msra.mxu0 %v4839_v52  ;;  %v502_v42 = vunpack.c.l.b16 %v383_v29  ;;  %v397_v47 = vsel %vm5555_vm4, %v392_v35, %v396_v25  ;;  %v399_v52 = vshrl.u32 %v4028_v38, 16  ;;  %v4864_v55 = vld [vmem:[#allocation6 + $0x78] sm:$0xff]  ;;  %v5614_v58 = vld [vmem:[%s5518_s3 + $0x14] sm:$0x1]  ;;  %v5618_v62 = vld [vmem:[%s5518_s3 + $0x24] sm:$0x1] }
  0x56   : > { %1035 = vmatpush.bf16.msra.mxu1 %v4871_v53  ;;  %v5609_v53 = vpack.c.b16 %v507_v23, %v506_v22  ;;  %v503_v54 = vunpack.c.l.b16 %v397_v47  ;;  %v798_v61 = vld [vmem:[%s5518_s3 + $0x18] sm:$0xe]  ;;  %v402_v0 = vshll.u32 %v4028_v38, 16  ;;  %v5623_v3 = vld [vmem:[%s5518_s3 + $0x1c] sm:$0x1]  ;;  %v4090_v4 = vrot.slane %v5600_v44, 9 }
  0x57   : > { %1064 = vmatpush.bf16.msra.mxu2 %v4879_v57  ;;  %v5611_v57 = vrot.slane %v464_v33, 5  ;;  %v401_v63 = vrot.slane %v399_v52, 4  ;;  %v408_v5 = vshll.u32 %v5606_v50, 16  ;;  %v413_v6 = vshrl.u32 %v4030_v51, 16  ;;  %v4854_v25 = vld [vmem:[#allocation6 + $0x28] sm:$0xff]  ;;  %v4900_v29 = vld [vmem:[#allocation6 + $0x178] sm:$0xff] }
  0x58   : > { %v5620_v1 = vpack.c.b16 %v503_v54, %v502_v42  ;;  %v832_v9 = vrot.slane %v5614_v58, 5  ;;  %v404_v13 = vrot.slane %v402_v0, 5  ;;  %v462_v15 = vrot.slane %v461_v56, 4  ;;  %v596_v35 = vld [vmem:[%s5518_s3 + $0x8] sm:$0xf]  ;;  %v4899_v38 = vld [vmem:[#allocation6 + $0x170] sm:$0xff] }
  0x59   : > { %5043 = vmatpush.bf16.msra.mxu3 %v4838_v7  ;;  %572 = vmatpush.bf16.msra.mxu0 %v4838_v7  ;;  %v4855_v7 = vld [vmem:[#allocation6 + $0x30] sm:$0xff]  ;;  %v4091_v16 = vrot.slane %v798_v61, 9  ;;  %v415_v17 = vrot.slane %v413_v6, 4  ;;  %v422_v18 = vshll.u32 %v5618_v62, 16  ;;  %v836_v22 = vrot.slane %v5623_v3, 5  ;;  %v4862_v40 = vld [vmem:[#allocation6 + $0x68] sm:$0xff] }
  0x5a   : > { %1036 = vmatpush.bf16.msra.mxu1 %v4870_v8  ;;  %v480_v8 = vrot.slane %v478_v48, 5  ;;  %v405_v23 = vor.u32 %v404_v13, %v401_v63  ;;  %v410_v27 = vrot.slane %v408_v5, 5  ;;  %v467_v36 = vsel %vm5555_vm4, %v462_v15, %v5611_v57  ;;  %v4889_v48 = vld [vmem:[#allocation6 + $0x120] sm:$0xff]  ;;  %v4898_v63 = vld [vmem:[#allocation6 + $0x168] sm:$0xff]  ;;  %v4852_v15 = vld [vmem:[#allocation6 + $0x18] sm:$0xff]  ;;  %s3907_s22 = sshll.u32 %s6370_s16, 4  ;;  %s3908_s22 = int_to_ptr.vmem [resolvable:$true] %s3907_s22 }
  0x5b   : > { %1065 = vmatpush.bf16.msra.mxu2 %v4878_v14  ;;  %v416_v14 = vshll.u32 %v4030_v51, 16  ;;  %v424_v33 = vrot.slane %v422_v18, 5  ;;  %v833_v37 = vsel %vm5566_vm5, %v4090_v4, %v832_v9  ;;  %v837_v42 = vsel %vm5566_vm5, %v4091_v16, %v836_v22  ;;  %v4853_v54 = vld [vmem:[#allocation6 + $0x20] sm:$0xff]  ;;  %v4110_v0 = vld [vmem:[%s5518_s3 + $0x18] sm:$0xf]  ;;  %s3909_s2 = sshll.u32 %s3906_s15, 4  ;;  %s3910_s2 = int_to_ptr.hbm [resolvable:$true] %s3909_s2 }
  0x5c   : > { %v406_v31 = vrot.slane %v405_v23, 4  ;;  %v626_v52 = vshrl.u32 %v596_v35, 16  ;;  %v629_v56 = vshll.u32 %v596_v35, 16  ;;  %v508_v57 = vunpack.c.l.b16 %v467_v36  ;;  %v4866_v6 = vld [vmem:[%s5518_s3 + $0x1c] sm:$0xf0]  ;;  %s3895_s28 = scalar_lea.sflag [#allocation5], %s5514_s9 }
  0x5d   : > { %5044 = vmatpush.bf16.msra.mxu3 %v4837_v19  ;;  %573 = vmatpush.bf16.msra.mxu0 %v4837_v19  ;;  %v476_v19 = vrot.slane %v475_v60, 4  ;;  %v418_v24 = vrot.slane %v416_v14, 5  ;;  %v864_v60 = vunpack.c.l.b16 %v833_v37  ;;  %v865_v61 = vunpack.c.l.b16 %v837_v42  ;;  %v5653_v22 = vld [vmem:[%s5518_s3 + $0x24] sm:$0x1]  ;;  %v799_v23 = vld [vmem:[%s5518_s3 + $0x20] sm:$0xe] }
  0x5e   : > { %1037 = vmatpush.bf16.msra.mxu1 %v4869_v21  ;;  %v4863_v21 = vld [vmem:[#allocation6 + $0x70] sm:$0xff]  ;;  %v411_v47 = vsel %vm5555_vm4, %v406_v31, %v410_v27  ;;  %v628_v13 = vrot.slane %v626_v52, 4  ;;  %v631_v14 = vrot.slane %v629_v56, 5  ;;  %v621_v18 = vshll.u32 %v5542_v20, 16  ;;  %v800_v27 = vld [vmem:[%s5518_s3 + $0x28] sm:$0xe] }
  0x5f   : > { %1066 = vmatpush.bf16.msra.mxu2 %v4877_v26  ;;  %v4890_v26 = vld [vmem:[#allocation6 + $0x128] sm:$0xff]  ;;  %v419_v32 = vor.u32 %v418_v24, %v415_v17  ;;  %v504_v4 = vunpack.c.l.b16 %v411_v47  ;;  %v871_v17 = vpack.c.b16 %v865_v61, %v864_v60  ;;  %v635_v24 = vshll.u32 %v5547_v28, 16  ;;  %v4851_v20 = vld [vmem:[#allocation6 + $0x10] sm:$0xff]  ;;  %s5283_s1 = sshra.s32 %s3910_s2, 4  ;;  %s5289_s19 = scalar_lea.hbm %s6427_s7, 64  ;;  %s5284_s1 = int_to_ptr.hbm [resolvable:$true] %s5283_s1 }
  0x60   : > { %584 = vmatmul.bf16.vlgmr.msra.gmra.mxu3 %v5609_v53  ;;  %574 = vmatmul.bf16.vlgmr.msra.gmra.mxu0 %v5620_v1  ;;  %v632_v31 = vor.u32 %v631_v14, %v628_v13  ;;  %v4092_v35 = vrot.slane %v799_v23, 9  ;;  %v840_v28 = vrot.slane %v5653_v22, 5  ;;  %v4093_v36 = vrot.slane %v800_v27, 9  ;;  %v598_v47 = vld [vmem:[%s5518_s3 + $0x18] sm:$0xf]  ;;  %v4857_v14 = vld [vmem:[#allocation6 + $0x40] sm:$0xff]  ;;  %p5290_p11 = scmp.lt.s32.totalorder %s5284_s1, %s6427_s7 }
  0x61   : > { %1184 = vmatpush.bf16.msrb.mxu3 %v4856_v41  ;;  %1038 = vmatmul.bf16.vlgmr.msra.gmra.mxu1 %v870_v45  ;;  %v481_v41 = vsel %vm5555_vm4, %v476_v19, %v480_v8  ;;  %v420_v44 = vrot.slane %v419_v32, 4  ;;  %v4888_v8 = vld [vmem:[#allocation6 + $0x118] sm:$0xff]  ;;  %v4887_v32 = vld [vmem:[#allocation6 + $0x110] sm:$0xff]  ;;  %v657_v60 = vshll.u32 %v598_v47, 16  ;;  %vm2071_vm7 = vsmask.f32 256 }
  0x62   : > { %1442 = vmatpush.bf16.msrb.mxu1 %v4892_v34  ;;  %1067 = vmatmul.bf16.vlgmr.msra.gmra.mxu2 %v4107_v59  ;;  %v595_v34 = vld [vmem:[%s5518_s3] sm:$0xf]  ;;  %v509_v59 = vunpack.c.l.b16 %v481_v41  ;;  %v4860_v19 = vld [vmem:[#allocation6 + $0x58] sm:$0xff]  ;;  %v633_v42 = vrot.slane %v632_v31, 4  ;;  %v841_v56 = vsel %vm5566_vm5, %v4092_v35, %v840_v28  ;;  %v4894_v35 = vld [vmem:[#allocation6 + $0x148] sm:$0xff] }
  0x63   : > { %1213 = vmatpush.bf16.msrb.mxu0 %v4864_v55  ;;  %1471 = vmatpush.bf16.msrb.mxu2 %v4900_v29  ;;  %v612_v45 = vshrl.u32 %v595_v34, 16  ;;  %v615_v51 = vshll.u32 %v595_v34, 16  ;;  %v425_v55 = vsel %vm5555_vm4, %v420_v44, %v424_v33  ;;  %v4897_v33 = vld [vmem:[#allocation6 + $0x160] sm:$0xff]  ;;  %v4859_v34 = vld [vmem:[#allocation6 + $0x50] sm:$0xff]  ;;  %v637_v44 = vrot.slane %v635_v24, 5  ;;  %v4920_v31 = vld [vmem:[#allocation6 + $0x1f8] sm:$0xff] }
  0x64   : > { %v5649_v16 = vpack.c.b16 %v509_v59, %v508_v57  ;;  %v654_v59 = vshrl.u32 %v598_v47, 16  ;;  %v4845_v13 = vld [vmem:[%s5518_s3 + $0x4] sm:$0xf0]  ;;  %v659_v24 = vrot.slane %v657_v60, 5  ;;  %vm5957_vm9 = vmand %vm2070_vm6, %vm2071_vm7  ;;  %vm2098_vm10 = vsmask.f32 7938 }
  0x65   : > { %1185 = vmatpush.bf16.msrb.mxu3 %v4855_v7  ;;  %v614_v5 = vrot.slane %v612_v45, 4  ;;  %v505_v7 = vunpack.c.l.b16 %v425_v55  ;;  %v617_v9 = vrot.slane %v615_v51, 5  ;;  %v4886_v45 = vld [vmem:[#allocation6 + $0x108] sm:$0xff]  ;;  %v4896_v51 = vld [vmem:[#allocation6 + $0x158] sm:$0xff]  ;;  %vm5967_vm11 = vmand %vm2097_vm8, %vm2098_vm10 }
  0x66   : > { %1443 = vmatpush.bf16.msrb.mxu1 %v4891_v2  ;;  %v4861_v2 = vld [vmem:[#allocation6 + $0x60] sm:$0xff]  ;;  %v4858_v55 = vld [vmem:[#allocation6 + $0x48] sm:$0xff]  ;;  %v656_v23 = vrot.slane %v654_v59, 4 }
  0x67   : > { %1214 = vmatpush.bf16.msrb.mxu0 %v4863_v21  ;;  %1472 = vmatpush.bf16.msrb.mxu2 %v4899_v38  ;;  %v4111_v21 = vor.u32 %v4866_v6, %v4110_v0  ;;  %v618_v29 = vor.u32 %v617_v9, %v614_v5  ;;  %v623_v38 = vrot.slane %v621_v18, 5  ;;  %v4885_v0 = vld [vmem:[#allocation6 + $0x100] sm:$0xff]  ;;  %v4895_v5 = vld [vmem:[#allocation6 + $0x150] sm:$0xff]  ;;  %v866_v6 = vunpack.c.l.b16 %v841_v56  ;;  %v4912_v18 = vld [vmem:[#allocation6 + $0x1b8] sm:$0xff] }
  0x68   : > { %v4867_v9 = vld [vmem:[%s5518_s3 + $0x2c] sm:$0xf0]  ;;  %v4248_v27 = vld [vmem:[%s5518_s3 + $0x8] sm:$0xe] }
  0x69   : > { %1186 = vmatpush.bf16.msrb.mxu3 %v4854_v25  ;;  %v5657_v25 = vpack.c.b16 %v505_v7, %v504_v4  ;;  %v619_v41 = vrot.slane %v618_v29, 4  ;;  %v4074_v4 = vld [vmem:[%s5518_s3] sm:$0xf]  ;;  %v4249_v29 = vld [vmem:[%s5518_s3 + $0x10] sm:$0xe] }
  0x6a   : > { %1444 = vmatpush.bf16.msrb.mxu1 %v4890_v26  ;;  %v5660_v26 = vld [vmem:[%s5518_s3 + $0x2c] sm:$0x1]  ;;  %v4893_v56 = vld [vmem:[#allocation6 + $0x140] sm:$0xff] }
  0x6b   : > { %1215 = vmatpush.bf16.msrb.mxu0 %v4862_v40  ;;  %1473 = vmatpush.bf16.msrb.mxu2 %v4898_v63  ;;  %v844_v37 = vrot.slane %v5660_v26, 5  ;;  %v597_v40 = vld [vmem:[%s5518_s3 + $0x10] sm:$0xf]  ;;  %v624_v61 = vsel %vm5555_vm4, %v619_v41, %v623_v38  ;;  %v638_v63 = vsel %vm5555_vm4, %v633_v42, %v637_v44  ;;  %v5689_v38 = vld [vmem:[%s5518_s3 + $0x3c] sm:$0x1] }
  0x6c   : > { %v640_v52 = vshrl.u32 %v597_v40, 16  ;;  %v801_v42 = vld [vmem:[%s5518_s3 + $0x30] sm:$0xe] }
  0x6d   : > { %1187 = vmatpush.bf16.msrb.mxu3 %v4853_v54  ;;  %v643_v54 = vshll.u32 %v597_v40, 16  ;;  %v845_v57 = vsel %vm5566_vm5, %v4093_v36, %v844_v37  ;;  %v4075_v36 = vor.u32 %v4845_v13, %v4074_v4  ;;  %v5686_v37 = vld [vmem:[%s5518_s3 + $0x34] sm:$0x1]  ;;  %v4094_v59 = vrot.slane %v801_v42, 9  ;;  %v4250_v42 = vld [vmem:[%s5518_s3 + $0x18] sm:$0xe] }
  0x6e   : > { %1445 = vmatpush.bf16.msrb.mxu1 %v4889_v48  ;;  %v4850_v48 = vld [vmem:[#allocation6 + $0x8] sm:$0xff]  ;;  %v867_v7 = vunpack.c.l.b16 %v845_v57  ;;  %v848_v60 = vrot.slane %v5686_v37, 5 }
  0x6f   : > { %1216 = vmatpush.bf16.msrb.mxu0 %v4861_v2  ;;  %1474 = vmatpush.bf16.msrb.mxu2 %v4897_v33  ;;  %v4849_v2 = vld [vmem:[#allocation6] sm:$0xff]  ;;  %v4257_v33 = vrot.slane %v4249_v29, 9 }
  0x70   : > { %589 = vmatmul.bf16.gmra.mxu3 %v5649_v16  ;;  %579 = vmatmul.bf16.gmra.mxu0 %v5657_v25  ;;  %v872_v28 = vpack.c.b16 %v867_v7, %v866_v6  ;;  %v600_v7 = vld [vmem:[%s5518_s3 + $0x28] sm:$0xf]  ;;  %v849_v13 = vsel %vm5566_vm5, %v4094_v59, %v848_v60 }
  0x71   : > { %1188 = vmatpush.bf16.msrb.mxu3 %v4852_v15  ;;  %1043 = vmatmul.bf16.gmra.mxu1 %v871_v17  ;;  %v642_v15 = vrot.slane %v640_v52, 4  ;;  %v645_v17 = vrot.slane %v643_v54, 5  ;;  %v649_v52 = vshll.u32 %v5614_v58, 16  ;;  %v660_v54 = vor.u32 %v659_v24, %v656_v23  ;;  %v4909_v23 = vld [vmem:[#allocation6 + $0x1a0] sm:$0xff] }
  0x72   : > { %1446 = vmatpush.bf16.msrb.mxu1 %v4888_v8  ;;  %1072 = vmatmul.bf16.gmra.mxu2 %v4111_v21  ;;  %v4114_v8 = vld [vmem:[%s5518_s3 + $0x28] sm:$0xf]  ;;  %v747_v21 = vunpack.c.l.b16 %v624_v61  ;;  %v868_v29 = vunpack.c.l.b16 %v849_v13 }
  0x73   : > { %1217 = vmatpush.bf16.msrb.mxu0 %v4860_v19  ;;  %1475 = vmatpush.bf16.msrb.mxu2 %v4896_v51  ;;  %v748_v19 = vunpack.c.l.b16 %v638_v63  ;;  %v4115_v41 = vor.u32 %v4867_v9, %v4114_v8  ;;  %v646_v44 = vor.u32 %v645_v17, %v642_v15  ;;  %v852_v63 = vrot.slane %v5689_v38, 5  ;;  %v4910_v8 = vld [vmem:[#allocation6 + $0x1a8] sm:$0xff]  ;;  %v4927_v9 = vld [vmem:[#allocation6 + $0x230] sm:$0xff]  ;;  %v4916_v13 = vld [vmem:[#allocation6 + $0x1d8] sm:$0xff] }
  0x74   : > { %v651_v4 = vrot.slane %v649_v52, 5 }
  0x75   : > { %1189 = vmatpush.bf16.msrb.mxu3 %v4851_v20  ;;  %v1268_v20 = vrot.slane %v5562_v43, 5  ;;  %v755_v51 = vpack.c.b16 %v748_v19, %v747_v21  ;;  %v647_v58 = vrot.slane %v646_v44, 4  ;;  %v682_v21 = vshrl.u32 %v600_v7, 16 }
  0x76   : > { %1447 = vmatpush.bf16.msrb.mxu1 %v4887_v32  ;;  %v4256_v32 = vrot.slane %v4248_v27, 9  ;;  %v685_v19 = vshll.u32 %v600_v7, 16  ;;  %v4258_v44 = vrot.slane %v4250_v42, 9  ;;  %v4907_v7 = vld [vmem:[#allocation6 + $0x190] sm:$0xff] }
  0x77   : > { %1218 = vmatpush.bf16.msrb.mxu0 %v4859_v34  ;;  %v1272_v34 = vrot.slane %v5572_v49, 5  ;;  %1476 = vmatpush.bf16.msrb.mxu2 %v4895_v5  ;;  %v802_v49 = vld [vmem:[%s5518_s3 + $0x38] sm:$0xe]  ;;  %v661_v5 = vrot.slane %v660_v54, 4  ;;  %v652_v24 = vsel %vm5555_vm4, %v647_v58, %v651_v4 }
  0x78   : > { %v1269_v40 = vsel %vm5566_vm5, %v4256_v32, %v1268_v20  ;;  %v4095_v61 = vrot.slane %v802_v49, 9  ;;  %v4118_v32 = vld [vmem:[%s5518_s3 + $0x38] sm:$0xf]  ;;  %v4868_v20 = vld [vmem:[%s5518_s3 + $0x3c] sm:$0xf0] }
  0x79   : > { %1190 = vmatpush.bf16.msrb.mxu3 %v4850_v48  ;;  %v1273_v43 = vsel %vm5566_vm5, %v4257_v33, %v1272_v34  ;;  %v1298_v47 = vunpack.c.l.b16 %v1269_v40  ;;  %v4078_v33 = vld [vmem:[%s5518_s3 + $0x10] sm:$0xf]  ;;  %v4846_v34 = vld [vmem:[%s5518_s3 + $0x14] sm:$0xf0]  ;;  %v4251_v49 = vld [vmem:[%s5518_s3 + $0x20] sm:$0xe]  ;;  %v4119_v52 = vor.u32 %v4868_v20, %v4118_v32 }
  0x7a   : > { %1448 = vmatpush.bf16.msrb.mxu1 %v4886_v45  ;;  %v4911_v45 = vld [vmem:[#allocation6 + $0x1b0] sm:$0xff]  ;;  %v1299_v48 = vunpack.c.l.b16 %v1273_v43  ;;  %v684_v43 = vrot.slane %v682_v21, 4  ;;  %v4079_v54 = vor.u32 %v4846_v34, %v4078_v33 }
  0x7b   : > { %1219 = vmatpush.bf16.msrb.mxu0 %v4858_v55  ;;  %v663_v55 = vshll.u32 %v5623_v3, 16  ;;  %1477 = vmatpush.bf16.msrb.mxu2 %v4894_v35  ;;  %v4919_v3 = vld [vmem:[#allocation6 + $0x1f0] sm:$0xff] }
  0x7c   : > { %v5699_v57 = vpack.c.b16 %v1299_v48, %v1298_v47  ;;  %v4259_v47 = vrot.slane %v4251_v49, 9  ;;  %v1280_v48 = vrot.slane %v5618_v62, 5  ;;  %v705_v49 = vshll.u32 %v5686_v37, 16 }
  0x7d   : > { %1191 = vmatpush.bf16.msrb.mxu3 %v4849_v2  ;;  %v599_v2 = vld [vmem:[%s5518_s3 + $0x20] sm:$0xf]  ;;  %v665_v6 = vrot.slane %v663_v55, 5  ;;  %v677_v55 = vshll.u32 %v5653_v22, 16  ;;  %v4908_v22 = vld [vmem:[#allocation6 + $0x198] sm:$0xff] }
  0x7e   : > { %1449 = vmatpush.bf16.msrb.mxu1 %v4885_v0  ;;  %v4928_v0 = vld [vmem:[#allocation6 + $0x238] sm:$0xff]  ;;  %v668_v15 = vshrl.u32 %v599_v2, 16  ;;  %v671_v17 = vshll.u32 %v599_v2, 16  ;;  %v1281_v60 = vsel %vm5566_vm5, %v4259_v47, %v1280_v48  ;;  %v4913_v48 = vld [vmem:[#allocation6 + $0x1c0] sm:$0xff] }
  0x7f   : > { %1220 = vmatpush.bf16.msrb.mxu0 %v4857_v14  ;;  %1478 = vmatpush.bf16.msrb.mxu2 %v4893_v56  ;;  %v853_v14 = vsel %vm5566_vm5, %v4095_v61, %v852_v63  ;;  %v666_v27 = vsel %vm5555_vm4, %v661_v5, %v665_v6  ;;  %v691_v56 = vshll.u32 %v5660_v26, 16  ;;  %v4926_v5 = vld [vmem:[#allocation6 + $0x228] sm:$0xff]  ;;  %v4917_v6 = vld [vmem:[#allocation6 + $0x1e0] sm:$0xff]  ;;  %v4924_v47 = vld [vmem:[#allocation6 + $0x218] sm:$0xff] }
  0x80   : > { %1192 = vmatmul.bf16.vlgmr.msrb.gmra.mxu3 %v4075_v36  ;;  %v670_v35 = vrot.slane %v668_v15, 4  ;;  %v749_v36 = vunpack.c.l.b16 %v652_v24  ;;  %v750_v40 = vunpack.c.l.b16 %v666_v27  ;;  %v4906_v24 = vld [vmem:[#allocation6 + $0x188] sm:$0xff]  ;;  %v4915_v27 = vld [vmem:[#allocation6 + $0x1d0] sm:$0xff] }
  0x81   : > { %1805 = vmatpush.bf16.msra.mxu3 %v4912_v18  ;;  %1048 = vmatmul.bf16.gmra.mxu1 %v872_v28  ;;  %v4918_v18 = vld [vmem:[#allocation6 + $0x1e8] sm:$0xff]  ;;  %v673_v28 = vrot.slane %v671_v17, 5  ;;  %v693_v4 = vrot.slane %v691_v56, 5 }
  0x82   : > { %1077 = vmatmul.bf16.gmra.mxu2 %v4115_v41  ;;  %1221 = vmatmul.bf16.vlgmr.msrb.gmra.mxu0 %v755_v51  ;;  %v687_v41 = vrot.slane %v685_v19, 5  ;;  %v4329_v56 = vld [vmem:[%s5518_s3 + $0x18] sm:$0xf] }
  0x83   : > { %1834 = vmatpush.bf16.msra.mxu0 %v4920_v31  ;;  %2007 = vmatpush.bf16.msra.mxu1 %v4928_v0  ;;  %v869_v31 = vunpack.c.l.b16 %v853_v14  ;;  %v674_v61 = vor.u32 %v673_v28, %v670_v35  ;;  %v756_v0 = vpack.c.b16 %v750_v40, %v749_v36  ;;  %v4925_v14 = vld [vmem:[#allocation6 + $0x220] sm:$0xff]  ;;  %v4914_v40 = vld [vmem:[#allocation6 + $0x1c8] sm:$0xff] }
  0x84   : > { %v688_v63 = vor.u32 %v687_v41, %v684_v43  ;;  %v4905_v36 = vld [vmem:[#allocation6 + $0x180] sm:$0xff] }
  0x85   : > { %1806 = vmatpush.bf16.msra.mxu3 %v4911_v45  ;;  %v1276_v45 = vrot.slane %v5606_v50, 5  ;;  %v873_v51 = vpack.c.b16 %v869_v31, %v868_v29  ;;  %v1301_v50 = vunpack.c.l.b16 %v1281_v60  ;;  %v675_v26 = vrot.slane %v674_v61, 4  ;;  %v4082_v29 = vld [vmem:[%s5518_s3 + $0x20] sm:$0xf]  ;;  %v4847_v31 = vld [vmem:[%s5518_s3 + $0x24] sm:$0xf0] }
  0x86   : > { %v689_v2 = vrot.slane %v688_v63, 4  ;;  %v4083_v43 = vor.u32 %v4847_v31, %v4082_v29  ;;  %v1540_v61 = vshrl.u32 %v4329_v56, 16  ;;  %v1543_v63 = vshll.u32 %v4329_v56, 16  ;;  %v4330_v29 = vld [vmem:[%s5518_s3 + $0x20] sm:$0xf] }
  0x87   : > { %1835 = vmatpush.bf16.msra.mxu0 %v4919_v3  ;;  %2008 = vmatpush.bf16.msra.mxu1 %v4927_v9  ;;  %v1277_v59 = vsel %vm5566_vm5, %v4258_v44, %v1276_v45  ;;  %v679_v3 = vrot.slane %v677_v55, 5  ;;  %v602_v9 = vld [vmem:[%s5518_s3 + $0x38] sm:$0xf]  ;;  %v719_v45 = vshll.u32 %v5689_v38, 16  ;;  %v4923_v38 = vld [vmem:[#allocation6 + $0x210] sm:$0xff] }
  0x88   : > { %v1300_v58 = vunpack.c.l.b16 %v1277_v59  ;;  %v694_v17 = vsel %vm5555_vm4, %v689_v2, %v693_v4  ;;  %v710_v19 = vshrl.u32 %v602_v9, 16  ;;  %v4328_v55 = vld [vmem:[%s5518_s3 + $0x10] sm:$0xf]  ;;  %v1542_v2 = vrot.slane %v1540_v61, 4  ;;  %v4331_v31 = vld [vmem:[%s5518_s3 + $0x28] sm:$0xf] }
  0x89   : > { %1807 = vmatpush.bf16.msra.mxu3 %v4910_v8  ;;  %v601_v8 = vld [vmem:[%s5518_s3 + $0x30] sm:$0xf]  ;;  %v680_v15 = vsel %vm5555_vm4, %v675_v26, %v679_v3  ;;  %v752_v20 = vunpack.c.l.b16 %v694_v17  ;;  %v1529_v60 = vshll.u32 %v4328_v55, 16  ;;  %v1545_v4 = vrot.slane %v1543_v63, 5 }
  0x8a   : > { %v5727_v62 = vpack.c.b16 %v1301_v50, %v1300_v58  ;;  %v699_v21 = vshll.u32 %v601_v8, 16  ;;  %v751_v32 = vunpack.c.l.b16 %v680_v15  ;;  %v712_v35 = vrot.slane %v710_v19, 4  ;;  %v4086_v58 = vld [vmem:[%s5518_s3 + $0x30] sm:$0xf]  ;;  %v4848_v50 = vld [vmem:[%s5518_s3 + $0x34] sm:$0xf0] }
  0x8b   : > { %1836 = vmatpush.bf16.msra.mxu0 %v4918_v18  ;;  %2009 = vmatpush.bf16.msra.mxu1 %v4926_v5  ;;  %v696_v18 = vshrl.u32 %v601_v8, 16  ;;  %v1531_v3 = vrot.slane %v1529_v60, 5  ;;  %v4087_v5 = vor.u32 %v4848_v50, %v4086_v58  ;;  %v4252_v8 = vld [vmem:[%s5518_s3 + $0x28] sm:$0xe]  ;;  %v1546_v17 = vor.u32 %v1545_v4, %v1542_v2 }
  0x8c   : > { %v701_v34 = vrot.slane %v699_v21, 5  ;;  %v757_v41 = vpack.c.b16 %v752_v20, %v751_v32  ;;  %v4260_v21 = vrot.slane %v4252_v8, 9  ;;  %v1284_v19 = vrot.slane %v5534_v10, 5  ;;  %v4332_v8 = vld [vmem:[%s5518_s3 + $0x30] sm:$0xf] }
  0x8d   : > { %1808 = vmatpush.bf16.msra.mxu3 %v4909_v23  ;;  %v713_v23 = vshll.u32 %v602_v9, 16  ;;  %v698_v33 = vrot.slane %v696_v18, 4  ;;  %v4253_v9 = vld [vmem:[%s5518_s3 + $0x30] sm:$0xe] }
  0x8e   : > { %v1285_v10 = vsel %vm5566_vm5, %v4260_v21, %v1284_v19 }
  0x8f   : > { %1837 = vmatpush.bf16.msra.mxu0 %v4917_v6  ;;  %2010 = vmatpush.bf16.msra.mxu1 %v4925_v14  ;;  %v715_v28 = vrot.slane %v713_v23, 5  ;;  %v702_v42 = vor.u32 %v701_v34, %v698_v33  ;;  %v5750_v6 = vld [vmem:[%s5518_s3 + $0x14] sm:$0x1]  ;;  %v4261_v23 = vrot.slane %v4253_v9, 9  ;;  %v1547_v33 = vrot.slane %v1546_v17, 4 }
  0x90   : > { %1197 = vmatmul.bf16.gmra.mxu3 %v4079_v54  ;;  %v721_v54 = vrot.slane %v719_v45, 5  ;;  %v1535_v15 = vshll.u32 %v5750_v6, 16  ;;  %v4333_v9 = vld [vmem:[%s5518_s3 + $0x38] sm:$0xf] }
  0x91   : > { %1053 = vmatmul.bf16.gmra.mxu1 %v873_v51  ;;  %1809 = vmatpush.bf16.msra.mxu3 %v4908_v22  ;;  %v716_v44 = vor.u32 %v715_v28, %v712_v35  ;;  %v703_v51 = vrot.slane %v702_v42, 4  ;;  %v1554_v35 = vshrl.u32 %v4330_v29, 16  ;;  %v1568_v28 = vshrl.u32 %v4331_v31, 16 }
  0x92   : > { %1082 = vmatmul.bf16.gmra.mxu2 %v4119_v52  ;;  %1226 = vmatmul.bf16.gmra.mxu0 %v756_v0  ;;  %v707_v52 = vrot.slane %v705_v49, 5  ;;  %v1537_v20 = vrot.slane %v1535_v15, 5  ;;  %v4346_v49 = vld [vmem:[%s5518_s3 + $0x10] sm:$0xf]  ;;  %v1585_v15 = vshll.u32 %v4332_v8, 16  ;;  %v1596_v17 = vshrl.u32 %v4333_v9, 16 }
  0x93   : > { %1838 = vmatpush.bf16.msra.mxu0 %v4916_v13  ;;  %v717_v37 = vrot.slane %v716_v44, 4  ;;  %2011 = vmatpush.bf16.msra.mxu1 %v4924_v47  ;;  %v4901_v44 = vld [vmem:[%s5518_s3 + $0x14] sm:$0xf0]  ;;  %v1556_v45 = vrot.slane %v1554_v35, 4 }
  0x94   : > { %v708_v59 = vsel %vm5555_vm4, %v703_v51, %v707_v52  ;;  %v4347_v56 = vor.u32 %v4901_v44, %v4346_v49  ;;  %v1897_v49 = vrot.slane %v5750_v6, 5 }
  0x95   : > { %1810 = vmatpush.bf16.msra.mxu3 %v4907_v7  ;;  %v753_v0 = vunpack.c.l.b16 %v708_v59  ;;  %v5753_v7 = vld [vmem:[%s5518_s3 + $0x1c] sm:$0x1]  ;;  %v4254_v59 = vld [vmem:[%s5518_s3 + $0x38] sm:$0xe] }
  0x96   : > { %v1549_v18 = vshll.u32 %v5753_v7, 16  ;;  %v4262_v50 = vrot.slane %v4254_v59, 9 }
  0x97   : > { %1839 = vmatpush.bf16.msra.mxu0 %v4915_v27  ;;  %2012 = vmatpush.bf16.msra.mxu1 %v4923_v38  ;;  %v4922_v27 = vld [vmem:[#allocation6 + $0x208] sm:$0xff] }
  0x98   : > { %v1551_v34 = vrot.slane %v1549_v18, 5  ;;  %v5779_v38 = vld [vmem:[%s5518_s3 + $0x2c] sm:$0x1]  ;;  %v1599_v18 = vshll.u32 %v4333_v9, 16  ;;  %v5826_v9 = vld [vmem:[%s5518_s3 + $0x44] sm:$0x1] }
  0x99   : > { %1811 = vmatpush.bf16.msra.mxu3 %v4906_v24  ;;  %v1288_v24 = vrot.slane %v5538_v12, 5  ;;  %v1577_v63 = vshll.u32 %v5779_v38, 16 }
  0x9b   : > { %1840 = vmatpush.bf16.msra.mxu0 %v4914_v40  ;;  %2013 = vmatpush.bf16.msra.mxu1 %v4922_v27  ;;  %v1289_v12 = vsel %vm5566_vm5, %v4261_v23, %v1288_v24  ;;  %v4350_v23 = vld [vmem:[%s5518_s3 + $0x20] sm:$0xf]  ;;  %v4902_v24 = vld [vmem:[%s5518_s3 + $0x24] sm:$0xf0] }
  0x9c   : > { %v1303_v42 = vunpack.c.l.b16 %v1289_v12 }
  0x9d   : > { %1812 = vmatpush.bf16.msra.mxu3 %v4905_v36  ;;  %v1571_v36 = vshll.u32 %v4331_v31, 16 }
  0x9f   : > { %1841 = vmatpush.bf16.msra.mxu0 %v4913_v48  ;;  %v1570_v48 = vrot.slane %v1568_v28, 4  ;;  %v1573_v51 = vrot.slane %v1571_v36, 5  ;;  %v4425_v28 = vld [vmem:[%s5518_s3 + $0x18] sm:$0xe] }
  0xa0   : > { %1202 = vmatmul.bf16.gmra.mxu3 %v4083_v43  ;;  %v1552_v43 = vsel %vm5555_vm4, %v1547_v33, %v1551_v34  ;;  %v1601_v33 = vrot.slane %v1599_v18, 5  ;;  %v5801_v34 = vld [vmem:[%s5518_s3 + $0x34] sm:$0x1]  ;;  %v4433_v44 = vrot.slane %v4425_v28, 9  ;;  %v1619_v18 = vshll.u32 %v5826_v9, 16 }
  0xa1   : > { %1450 = vmatmul.bf16.vlgmr.msrb.gmra.mxu1 %v5620_v1  ;;  %v722_v1 = vsel %vm5555_vm4, %v717_v37, %v721_v54  ;;  %v1662_v37 = vunpack.c.l.b16 %v1552_v43  ;;  %v5776_v54 = vld [vmem:[%s5518_s3 + $0x24] sm:$0x1]  ;;  %v1574_v61 = vor.u32 %v1573_v51, %v1570_v48 }
  0xa2   : > { %1479 = vmatmul.bf16.vlgmr.msrb.gmra.mxu2 %v5699_v57  ;;  %1231 = vmatmul.bf16.gmra.mxu0 %v757_v41  ;;  %v1526_v57 = vshrl.u32 %v4328_v55, 16  ;;  %v754_v22 = vunpack.c.l.b16 %v722_v1  ;;  %v1302_v41 = vunpack.c.l.b16 %v1285_v10  ;;  %v4255_v1 = vld [vmem:[%s5518_s3 + $0x40] sm:$0xe]  ;;  %v1563_v60 = vshll.u32 %v5776_v54, 16 }
  0xa3   : > { %v1575_v4 = vrot.slane %v1574_v61, 4  ;;  %v4351_v10 = vor.u32 %v4902_v24, %v4350_v23  ;;  %v1905_v24 = vrot.slane %v5776_v54, 5 }
  0xa4   : > { %v1528_v26 = vrot.slane %v1526_v57, 4  ;;  %v758_v13 = vpack.c.b16 %v754_v22, %v753_v0  ;;  %v1308_v55 = vpack.c.b16 %v1303_v42, %v1302_v41  ;;  %v1292_v0 = vrot.slane %v5588_v11, 5 }
  0xa5   : > { %v4263_v22 = vrot.slane %v4255_v1, 9  ;;  %v1565_v2 = vrot.slane %v1563_v60, 5 }
  0xa6   : > { %v1532_v14 = vor.u32 %v1531_v3, %v1528_v26  ;;  %v1296_v26 = vrot.slane %v5594_v30, 5 }
  0xa8   : > { %v1533_v32 = vrot.slane %v1532_v14, 4  ;;  %v1582_v14 = vshrl.u32 %v4332_v8, 16 }
  0xaa   : > { %v1538_v40 = vsel %vm5555_vm4, %v1533_v32, %v1537_v20  ;;  %v1584_v31 = vrot.slane %v1582_v14, 4  ;;  %v1587_v32 = vrot.slane %v1585_v15, 5  ;;  %v1598_v20 = vrot.slane %v1596_v17, 4  ;;  %v4427_v14 = vld [vmem:[%s5518_s3 + $0x28] sm:$0xe] }
  0xab   : > { %v1661_v52 = vunpack.c.l.b16 %v1538_v40  ;;  %v1591_v40 = vshll.u32 %v5801_v34, 16 }
  0xac   : > { %v1588_v36 = vor.u32 %v1587_v32, %v1584_v31  ;;  %v1602_v43 = vor.u32 %v1601_v33, %v1598_v20  ;;  %v1621_v20 = vrot.slane %v1619_v18, 5 }
  0xad   : > { %v1669_v58 = vpack.c.b16 %v1662_v37, %v1661_v52  ;;  %v1593_v48 = vrot.slane %v1591_v40, 5  ;;  %v4334_v37 = vld [vmem:[%s5518_s3 + $0x40] sm:$0xf] }
  0xae   : > { %v1603_v51 = vrot.slane %v1602_v43, 4  ;;  %v1610_v59 = vshrl.u32 %v4334_v37, 16  ;;  %v1613_v1 = vshll.u32 %v4334_v37, 16  ;;  %v4428_v37 = vld [vmem:[%s5518_s3 + $0x30] sm:$0xe] }
  0xb0   : > { %1207 = vmatmul.bf16.gmra.mxu3 %v4087_v5  ;;  %v1579_v5 = vrot.slane %v1577_v63, 5 }
  0xb1   : > { %1455 = vmatmul.bf16.gmra.mxu1 %v5657_v25  ;;  %v4921_v25 = vld [vmem:[#allocation6 + $0x200] sm:$0xff] }
  0xb2   : > { %1484 = vmatmul.bf16.gmra.mxu2 %v5727_v62  ;;  %1236 = vmatmul.bf16.gmra.mxu0 %v758_v13  ;;  %v1557_v62 = vshll.u32 %v4330_v29, 16  ;;  %v1297_v13 = vsel %vm5566_vm5, %v4263_v22, %v1296_v26  ;;  %v1580_v30 = vsel %vm5555_vm4, %v1575_v4, %v1579_v5  ;;  %v1612_v26 = vrot.slane %v1610_v59, 4 }
  0xb3   : > { %2014 = vmatpush.bf16.msra.mxu1 %v4921_v25  ;;  %v1305_v19 = vunpack.c.l.b16 %v1297_v13  ;;  %v1664_v29 = vunpack.c.l.b16 %v1580_v30  ;;  %v5804_v25 = vld [vmem:[%s5518_s3 + $0x3c] sm:$0x1]  ;;  %v4426_v30 = vld [vmem:[%s5518_s3 + $0x20] sm:$0xe] }
  0xb4   : > { %v1559_v47 = vrot.slane %v1557_v62, 5  ;;  %v4424_v62 = vld [vmem:[%s5518_s3 + $0x10] sm:$0xe]  ;;  %v1605_v41 = vshll.u32 %v5804_v25, 16  ;;  %v4434_v23 = vrot.slane %v4426_v30, 9 }
  0xb5   : > { %v4432_v42 = vrot.slane %v4424_v62, 9 }
  0xb6   : > { %v1560_v57 = vor.u32 %v1559_v47, %v1556_v45  ;;  %v1901_v45 = vrot.slane %v5753_v7, 5  ;;  %v1589_v47 = vrot.slane %v1588_v36, 4  ;;  %v1607_v52 = vrot.slane %v1605_v41, 5  ;;  %v4358_v41 = vld [vmem:[%s5518_s3 + $0x40] sm:$0xf] }
  0xb8   : > { %v1561_v3 = vrot.slane %v1560_v57, 4  ;;  %v1594_v6 = vsel %vm5555_vm4, %v1589_v47, %v1593_v48  ;;  %v1608_v7 = vsel %vm5555_vm4, %v1603_v51, %v1607_v52 }
  0xb9   : > { %v1666_v22 = vunpack.c.l.b16 %v1608_v7  ;;  %v1913_v7 = vrot.slane %v5801_v34, 5 }
  0xba   : > { %v1566_v11 = vsel %vm5555_vm4, %v1561_v3, %v1565_v2  ;;  %v1615_v3 = vrot.slane %v1613_v1, 5  ;;  %v1917_v1 = vrot.slane %v5804_v25, 5 }
  0xbb   : > { %v1663_v27 = vunpack.c.l.b16 %v1566_v11 }
  0xbc   : > { %v1616_v17 = vor.u32 %v1615_v3, %v1612_v26  ;;  %v4430_v3 = vld [vmem:[%s5518_s3 + $0x40] sm:$0xe] }
  0xbd   : > { %v1670_v35 = vpack.c.b16 %v1664_v29, %v1663_v27  ;;  %v4435_v27 = vrot.slane %v4427_v14, 9  ;;  %v1909_v29 = vrot.slane %v5779_v38, 5 }
  0xbe   : > { %v1617_v32 = vrot.slane %v1616_v17, 4 }
  0xbf   : > { %v1910_v54 = vsel %vm5566_vm5, %v4435_v27, %v1909_v29 }
  0xc0   : > { %1813 = vmatmul.bf16.vlgmr.msra.gmra.mxu3 %v4347_v56  ;;  %v1902_v56 = vsel %vm5566_vm5, %v4433_v44, %v1901_v45  ;;  %v1622_v28 = vsel %vm5555_vm4, %v1617_v32, %v1621_v20  ;;  %v1946_v43 = vunpack.c.l.b16 %v1910_v54 }
  0xc1   : > { %1460 = vmatmul.bf16.gmra.mxu1 %v5609_v53  ;;  %v1293_v53 = vsel %vm5566_vm5, %v4262_v50, %v1292_v0  ;;  %v1944_v63 = vunpack.c.l.b16 %v1902_v56  ;;  %v4903_v50 = vld [vmem:[%s5518_s3 + $0x34] sm:$0xf0]  ;;  %v1665_v0 = vunpack.c.l.b16 %v1594_v6  ;;  %v4436_v6 = vrot.slane %v4428_v37, 9 }
  0xc2   : > { %1489 = vmatmul.bf16.gmra.mxu2 %v1308_v55  ;;  %1842 = vmatmul.bf16.vlgmr.msra.gmra.mxu0 %v1669_v58  ;;  %v1304_v21 = vunpack.c.l.b16 %v1293_v53  ;;  %v4335_v55 = vld [vmem:[%s5518_s3 + $0x48] sm:$0xf]  ;;  %v4354_v58 = vld [vmem:[%s5518_s3 + $0x30] sm:$0xf]  ;;  %v5829_v53 = vld [vmem:[%s5518_s3 + $0x4c] sm:$0x1] }
  0xc3   : > { %v1624_v57 = vshrl.u32 %v4335_v55, 16  ;;  %v1627_v60 = vshll.u32 %v4335_v55, 16  ;;  %v4355_v5 = vor.u32 %v4903_v50, %v4354_v58  ;;  %v1671_v11 = vpack.c.b16 %v1666_v22, %v1665_v0  ;;  %v4429_v55 = vld [vmem:[%s5518_s3 + $0x38] sm:$0xe] }
  0xc4   : > { %v1309_v12 = vpack.c.b16 %v1305_v19, %v1304_v21  ;;  %v1633_v19 = vshll.u32 %v5829_v53, 16  ;;  %v4437_v59 = vrot.slane %v4429_v55, 9  ;;  %v1925_v30 = vrot.slane %v5829_v53, 5  ;;  %v4958_v55 = vld [vmem:[#allocation8 + $0xa8] sm:$0xff] }
  0xc5   : > { %v1626_v2 = vrot.slane %v1624_v57, 4  ;;  %v1629_v4 = vrot.slane %v1627_v60, 5 }
  0xc7   : > { %v1630_v21 = vor.u32 %v1629_v4, %v1626_v2  ;;  %v4431_v2 = vld [vmem:[%s5518_s3 + $0x48] sm:$0xe] }
  0xc9   : > { %v1631_v33 = vrot.slane %v1630_v21, 4 }
  0xd0   : > { %1818 = vmatmul.bf16.gmra.mxu3 %v4351_v10  ;;  %v1635_v10 = vrot.slane %v1633_v19, 5 }
  0xd1   : > { %1465 = vmatmul.bf16.gmra.mxu1 %v5649_v16  ;;  %v1898_v16 = vsel %vm5566_vm5, %v4432_v42, %v1897_v49  ;;  %v4904_v42 = vld [vmem:[%s5518_s3 + $0x44] sm:$0xf0]  ;;  %v1667_v49 = vunpack.c.l.b16 %v1622_v28  ;;  %s5285_s3 = scalar_lea.hbm %s5284_s1, 32 }
  0xd2   : > { %1494 = vmatmul.bf16.gmra.mxu2 %v1309_v12  ;;  %1847 = vmatmul.bf16.gmra.mxu0 %v1670_v35  ;;  %v1943_v61 = vunpack.c.l.b16 %v1898_v16  ;;  %v1906_v35 = vsel %vm5566_vm5, %v4434_v23, %v1905_v24  ;;  %v1636_v36 = vsel %vm5555_vm4, %v1631_v33, %v1635_v10  ;;  %v4359_v47 = vor.u32 %v4904_v42, %v4358_v41  ;;  %p5286_p1 = scmp.ne.s32.totalorder %s5284_s1, %s5285_s3  ;;  %p5291_p9 = scmp.lt.s32.totalorder %s5289_s19, %s5285_s3 }
  0xd3   : > { %v1945_v40 = vunpack.c.l.b16 %v1906_v35  ;;  %v1668_v44 = vunpack.c.l.b16 %v1636_v36 }
  0xd4   : > { %v1951_v8 = vpack.c.b16 %v1944_v63, %v1943_v61  ;;  %v1914_v61 = vsel %vm5566_vm5, %v4436_v6, %v1913_v7  ;;  %v1918_v63 = vsel %vm5566_vm5, %v4437_v59, %v1917_v1  ;;  %p5287_p4 = pnand %p5286_p1, %p5485_p7  ;;  %p5292_p2 = por %p5291_p9, %p5290_p11 }
  0xd5   : > { %v1952_v48 = vpack.c.b16 %v1946_v43, %v1945_v40  ;;  %v1672_v52 = vpack.c.b16 %v1668_v44, %v1667_v49  ;;  %v1947_v50 = vunpack.c.l.b16 %v1914_v61  ;;  %v1948_v0 = vunpack.c.l.b16 %v1918_v63  ;;  %v4960_v43 = vld [vmem:[#allocation8 + $0xb8] sm:$0xff]  ;;  %v4957_v61 = vld [vmem:[#allocation8 + $0xa0] sm:$0xff] }
  0xd6   : > { %2692 = vmatpush.bf16.msra.mxu2 %v4960_v43  ;;  %v4940_v63 = vld [vmem:[#allocation8 + $0x38] sm:$0xff]  ;;  %p5288_p8 = pneg %p5287_p4 }
  0xd7   : > { %v1953_v25 = vpack.c.b16 %v1948_v0, %v1947_v50  ;;  %2846 = vmatpush.bf16.msrb.mxu0 %v4940_v63 }
  0xd8   : > { %p5293_p10 = pnand %p5292_p2, %p5288_p8 }
  0xdd   : > { %v5835_v15 = vpop.f32.mrf.mxu0 }
  0xde   : > { %v5831_v13 = vpop.f32.mrf.mxu1  ;;  %6448 = vst [vmem:[#allocation16_spill] sm:$0xff] %v5835_v15 }
  0xe0   : > { %1823 = vmatmul.bf16.gmra.mxu3 %v4355_v5  ;;  %v4438_v5 = vrot.slane %v4430_v3, 9 }
  0xe1   : > { %2015 = vmatmul.bf16.vlgmr.msra.gmra.mxu1 %v1951_v8  ;;  %v1921_v8 = vrot.slane %v5826_v9, 5 }
  0xe2   : > { %1852 = vmatmul.bf16.gmra.mxu0 %v1671_v11  ;;  %v4439_v11 = vrot.slane %v4431_v2, 9  ;;  %v4956_v2 = vld [vmem:[#allocation8 + $0x98] sm:$0xff] }
  0xe3   : > { %v5841_v31 = vpop.f32.mrf.mxu3  ;;  %v1922_v21 = vsel %vm5566_vm5, %v4438_v5, %v1921_v8  ;;  %v4968_v5 = vld [vmem:[#allocation8 + $0xf8] sm:$0xff]  ;;  %v4938_v8 = vld [vmem:[#allocation8 + $0x28] sm:$0xff] }
  0xe4   : > { %6449 = vst [vmem:[#allocation17_spill] sm:$0xff] %v5841_v31  ;;  %v1926_v19 = vsel %vm5566_vm5, %v4439_v11, %v1925_v30  ;;  %v1949_v24 = vunpack.c.l.b16 %v1922_v21  ;;  %2721 = vmatpush.bf16.msrb.mxu3 %v4968_v5  ;;  %v2073_v30 = vld [vmem:[#allocation2 + $0x8] sm:$0x1]  ;;  %v4966_v5 = vld [vmem:[#allocation8 + $0xe8] sm:$0xff]  ;;  %v2076_v31 = vld [vmem:[#allocation2 + $0x10] sm:$0x1] }
  0xe5   : > { %v5849_v62 = vpop.f32.mrf.mxu2  ;;  %v5851_v38 = vpop.f32.mrf.mxu0  ;;  %v1950_v27 = vunpack.c.l.b16 %v1926_v19  ;;  %v2100_v19 = vld [vmem:[#allocation2 + $0xc] sm:$0xf]  ;;  %v2074_v43 = vsel %vm5957_vm9, 0, %v2073_v30  ;;  %v4946_v30 = vld [vmem:[#allocation8 + $0x68] sm:$0xff] }
  0xe6   : > { %v5843_v12 = vpop.f32.mrf.mxu1  ;;  %6450 = vst [vmem:[#allocation18_spill] sm:$0xff] %v5851_v38  ;;  %v4954_v38 = vld [vmem:[#allocation8 + $0x88] sm:$0xff] }
  0xe7   : > { %v1954_v29 = vpack.c.b16 %v1950_v27, %v1949_v24  ;;  %v4948_v24 = vld [vmem:[#allocation8 + $0x78] sm:$0xff]  ;;  %2075 = vst [vmem:[#allocation2 + $0x8] sm:$0x1] %v2074_v43  ;;  %v2077_v43 = vsel %vm5957_vm9, 0, %v2076_v31  ;;  %v5350_v31 = vmov 0  }
  0xe8   : > { %2875 = vmatpush.bf16.msrb.mxu1 %v4948_v24  ;;  %v4935_v24 = vld [vmem:[#allocation8 + $0x10] sm:$0xff]  ;;  %2078 = vst [vmem:[#allocation2 + $0x10] sm:$0x1] %v2077_v43  ;;  %v2079_v43 = vld [vmem:[#allocation2 + $0x18] sm:$0x1] }
  0xe9   : > { %2064 = vst [vmem:[#allocation2] sm:$0xf] %v5350_v31 }
  0xea   : > { %2065 = vst [vmem:[#allocation2 + $0x4] sm:$0xf] %v5350_v31 }
  0xeb   : > { %v5859_v45 = vpop.f32.mrf.mxu3  ;;  %2067 = vst [vmem:[#allocation2 + $0x48] sm:$0xf] %v5350_v31 }
  0xec   : > { %6451 = vst [vmem:[#allocation19_spill] sm:$0xff] %v5859_v45 }
  0xed   : > { %v5865_v16 = vpop.f32.mrf.mxu0  ;;  %v5867_v56 = vpop.f32.mrf.mxu2  ;;  %2068 = vst [vmem:[#allocation2 + $0x4c] sm:$0xf] %v5350_v31 }
  0xee   : > { %v5861_v51 = vpop.f32.mrf.mxu1  ;;  %6452 = vst [vmem:[#allocation20_spill] sm:$0xff] %v5865_v16  ;;  %v4965_v16 = vld [vmem:[#allocation8 + $0xe0] sm:$0xff] }
  0xf0   : > { %1828 = vmatmul.bf16.gmra.mxu3 %v4359_v47  ;;  %v4959_v47 = vld [vmem:[#allocation8 + $0xb0] sm:$0xff] }
  0xf1   : > { %2020 = vmatmul.bf16.gmra.mxu1 %v1952_v48  ;;  %2693 = vmatpush.bf16.msra.mxu2 %v4959_v47 }
  0xf2   : > { %1857 = vmatmul.bf16.gmra.mxu0 %v1672_v52 }
  0xf3   : > { %v5871_v57 = vpop.f32.mrf.mxu3 }
  0xf4   : > { %6453 = vst [vmem:[#allocation21_spill] sm:$0xff] %v5871_v57  ;;  %v2080_v57 = vsel %vm5957_vm9, 0, %v2079_v43 }
  0xf5   : > { %v5879_v58 = vpop.f32.mrf.mxu0  ;;  %v5881_v34 = vpop.f32.mrf.mxu2  ;;  %2694 = vmatpush.bf16.msra.mxu2 %v4958_v55  ;;  %v4967_v55 = vld [vmem:[#allocation8 + $0xf0] sm:$0xff]  ;;  %2081 = vst [vmem:[#allocation2 + $0x18] sm:$0x1] %v2080_v57  ;;  %v1071_v57 = vadd.f32 %v5867_v56, %v5843_v12 }
  0xf6   : > { %v5873_v60 = vpop.f32.mrf.mxu1  ;;  %6454 = vst [vmem:[#allocation22_spill] sm:$0xff] %v5879_v58  ;;  %2722 = vmatpush.bf16.msrb.mxu3 %v4967_v55  ;;  %v2103_v58 = vld [vmem:[#allocation2 + $0x14] sm:$0xf] }
  0xf9   : > { %2695 = vmatpush.bf16.msra.mxu2 %v4957_v61  ;;  %v4937_v61 = vld [vmem:[#allocation8 + $0x20] sm:$0xff] }
  0xfa   : > { %2723 = vmatpush.bf16.msrb.mxu3 %v4966_v5  ;;  %v4945_v5 = vld [vmem:[#allocation8 + $0x60] sm:$0xff] }
  0xfb   : > { %v5883_v22 = vpop.f32.mrf.mxu3 }
  0xfc   : > { %6455 = vst [vmem:[#allocation23_spill] sm:$0xff] %v5883_v22  ;;  %v4934_v22 = vld [vmem:[#allocation8 + $0x8] sm:$0xff] }
  0xfd   : > { %v5895_v17 = vpop.f32.mrf.mxu2  ;;  %2696 = vmatpush.bf16.msra.mxu2 %v4956_v2  ;;  %v4947_v2 = vld [vmem:[#allocation8 + $0x70] sm:$0xff] }
  0xfe   : > { %v5885_v26 = vpop.f32.mrf.mxu1  ;;  %2876 = vmatpush.bf16.msrb.mxu1 %v4947_v2  ;;  %v4955_v2 = vld [vmem:[#allocation8 + $0x90] sm:$0xff]  ;;  %2724 = vmatpush.bf16.msrb.mxu3 %v4965_v16 }
  0xff   : > { %v5889_v4 = vpop.f32.mrf.mxu0  ;;  %v4963_v16 = vld [vmem:[#allocation8 + $0xd0] sm:$0xff] }
 0x101   : > { %2025 = vmatmul.bf16.gmra.mxu1 %v1953_v25  ;;  %v4939_v25 = vld [vmem:[#allocation8 + $0x30] sm:$0xff]  ;;  %2697 = vmatpush.bf16.msra.mxu2 %v4955_v2 }
 0x102   : > { %2847 = vmatpush.bf16.msrb.mxu0 %v4939_v25  ;;  %v2101_v25 = vsel %vm5967_vm11, 0, %v2100_v19  ;;  %v2104_v19 = vsel %vm5967_vm11, 0, %v2103_v58  ;;  %2877 = vmatpush.bf16.msrb.mxu1 %v4946_v30  ;;  %v1069_v58 = vadd.f32 %v5849_v62, %v5831_v13  ;;  %v4944_v30 = vld [vmem:[#allocation8 + $0x58] sm:$0xff] }
 0x103   : > { %v5893_v14 = vpop.f32.mrf.mxu3  ;;  %2102 = vst [vmem:[#allocation2 + $0xc] sm:$0xf] %v2101_v25 }
 0x104   : > { %2105 = vst [vmem:[#allocation2 + $0x14] sm:$0xf] %v2104_v19  ;;  %v2106_v19 = vld [vmem:[#allocation2 + $0x1c] sm:$0xf] }
 0x105   : > { %v5909_v32 = vpop.f32.mrf.mxu2  ;;  %v2107_v2 = vsel %vm5967_vm11, 0, %v2106_v19  ;;  %2698 = vmatpush.bf16.msra.mxu2 %v4954_v38  ;;  %v4953_v19 = vld [vmem:[#allocation8 + $0x80] sm:$0xff]  ;;  %v4942_v38 = vld [vmem:[#allocation8 + $0x48] sm:$0xff] }
 0x106   : > { %v5897_v18 = vpop.f32.mrf.mxu1  ;;  %2848 = vmatpush.bf16.msrb.mxu0 %v4938_v8  ;;  %v4936_v8 = vld [vmem:[#allocation8 + $0x18] sm:$0xff]  ;;  %2878 = vmatpush.bf16.msrb.mxu1 %v4945_v5  ;;  %v4933_v5 = vld [vmem:[#allocation8] sm:$0xff]  ;;  %2108 = vst [vmem:[#allocation2 + $0x1c] sm:$0xf] %v2107_v2 }
 0x107   : > { %v5903_v23 = vpop.f32.mrf.mxu0 }
 0x109   : > { %2699 = vmatpush.bf16.msra.mxu2 %v4953_v19 }
 0x10a   : > { %2849 = vmatpush.bf16.msrb.mxu0 %v4937_v61  ;;  %2879 = vmatpush.bf16.msrb.mxu1 %v4944_v30 }
 0x10b   : > { %v5905_v9 = vpop.f32.mrf.mxu3 }
 0x10d   : > { %v5919_v54 = vpop.f32.mrf.mxu2 }
 0x10e   : > { %v5907_v53 = vpop.f32.mrf.mxu1  ;;  %2850 = vmatpush.bf16.msrb.mxu0 %v4936_v8  ;;  %v4964_v8 = vld [vmem:[#allocation8 + $0xd8] sm:$0xff] }
 0x10f   : > { %v5911_v20 = vpop.f32.mrf.mxu0  ;;  %2725 = vmatpush.bf16.msrb.mxu3 %v4964_v8 }
 0x111   : > { %2030 = vmatmul.bf16.gmra.mxu1 %v1954_v29 }
 0x112   : > { %2851 = vmatpush.bf16.msrb.mxu0 %v4935_v24  ;;  %v1194_v24 = vadd.f32 %v5893_v14, %v1069_v58  ;;  %v4962_v14 = vld [vmem:[#allocation8 + $0xc8] sm:$0xff] }
 0x113   : > { %v5913_v33 = vpop.f32.mrf.mxu3  ;;  %2726 = vmatpush.bf16.msrb.mxu3 %v4963_v16  ;;  %v1196_v16 = vadd.f32 %v5905_v9, %v1071_v57 }
 0x114   : > { %v1223_v8 = vadd.f32 %v5889_v4, %v1194_v24  ;;  %v6009_v4 = vld [vmem:[%s6425_s5] ss:$0 sm:$0xff] }
 0x115   : > { %v5927_v41 = vpop.f32.mrf.mxu2 }
 0x116   : > { %v5915_v10 = vpop.f32.mrf.mxu1  ;;  %2852 = vmatpush.bf16.msrb.mxu0 %v4934_v22  ;;  %v4943_v22 = vld [vmem:[#allocation8 + $0x50] sm:$0xff] }
 0x117   : > { %v5917_v35 = vpop.f32.mrf.mxu0  ;;  %2880 = vmatpush.bf16.msrb.mxu1 %v4943_v22  ;;  %2727 = vmatpush.bf16.msrb.mxu3 %v4962_v14 }
 0x11a   : > { %2853 = vmatpush.bf16.msrb.mxu0 %v4933_v5 }
 0x11b   : > { %v5921_v28 = vpop.f32.mrf.mxu3  ;;  %2881 = vmatpush.bf16.msrb.mxu1 %v4942_v38 }
 0x11d   : > { %v5937_v52 = vpop.f32.mrf.mxu2 }
 0x11e   : > { %v5923_v36 = vpop.f32.mrf.mxu1 }
 0x11f   : > { %v5925_v40 = vpop.f32.mrf.mxu0 }
 0x123   : > { %v5929_v42 = vpop.f32.mrf.mxu3 }
 0x125   : > { %v5947_v1 = vpop.f32.mrf.mxu2 }
 0x126   : > { %v5931_v49 = vpop.f32.mrf.mxu1  ;;  %v1481_v62 = vadd.f32 %v5947_v1, %v5923_v36  ;;  %v2082_v36 = vld [vmem:[#allocation2 + $0x20] sm:$0x1]  ;;  %v2109_v1 = vld [vmem:[#allocation2 + $0x24] sm:$0xf] }
 0x127   : > { %v5933_v44 = vpop.f32.mrf.mxu0  ;;  %v2110_v12 = vsel %vm5967_vm11, 0, %v2109_v1  ;;  %v2085_v1 = vld [vmem:[#allocation2 + $0x28] sm:$0x1] }
 0x128   : > { %v1500_v30 = vadd.f32 %v1481_v62, %v1223_v8  ;;  %2111 = vst [vmem:[#allocation2 + $0x24] sm:$0xf] %v2110_v12  ;;  %v1225_v62 = vadd.f32 %v5903_v23, %v1196_v16  ;;  %v4941_v8 = vld [vmem:[#allocation8 + $0x40] sm:$0xff]  ;;  %v1076_v23 = vadd.f32 %v5895_v17, %v5873_v60  ;;  %v2112_v16 = vld [vmem:[#allocation2 + $0x2c] sm:$0xf] }
 0x129   : > { %2882 = vmatpush.bf16.msrb.mxu1 %v4941_v8  ;;  %v2260_v60 = vld [vmem:[#allocation2] sm:$0xf] }
 0x12a   : > { %v1201_v12 = vadd.f32 %v5921_v28, %v1076_v23  ;;  %v1084_v28 = vadd.f32 %v5927_v41, %v5907_v53  ;;  %v2280_v53 = vshll.u32 %v2260_v60, 16 }
 0x12b   : > { %v5935_v48 = vpop.f32.mrf.mxu3 }
 0x12d   : > { %v5955_v11 = vpop.f32.mrf.mxu2 }
 0x12e   : > { %v5939_v37 = vpop.f32.mrf.mxu1  ;;  %v1483_v24 = vadd.f32 %v5955_v11, %v5931_v49 }
 0x12f   : > { %v5941_v6 = vpop.f32.mrf.mxu0 }
 0x130   : > { %v1501_v19 = vadd.f32 %v1483_v24, %v1225_v62  ;;  %v1079_v24 = vadd.f32 %v5909_v32, %v5885_v26  ;;  %v1086_v26 = vadd.f32 %v5937_v52, %v5915_v10  ;;  %v1230_v32 = vadd.f32 %v5917_v35, %v1201_v12 }
 0x131   : > { %v2282_v12 = vrot.slane %v2280_v53, 5 }
 0x133   : > { %v5943_v7 = vpop.f32.mrf.mxu3 }
 0x134   : > { %v1209_v35 = vadd.f32 %v5943_v7, %v1084_v28  ;;  %v2088_v7 = vld [vmem:[#allocation2 + $0x30] sm:$0x1] }
 0x135   : > { %v5975_v45 = vpop.f32.mrf.mxu2 }
 0x136   : > { %v5945_v59 = vpop.f32.mrf.mxu1 }
 0x137   : > { %v5949_v50 = vpop.f32.mrf.mxu0 }
 0x13b   : > { %v5951_v0 = vpop.f32.mrf.mxu3 }
 0x13d   : > { %v5994_v15 = vpop.f32.mrf.mxu2 }
 0x13e   : > { %v5953_v3 = vpop.f32.mrf.mxu1 }
 0x13f   : > { %v5963_v29 = vpop.f32.mrf.mxu0 }
 0x143   : > { %v5961_v27 = vpop.f32.mrf.mxu3 }
 0x144   : > { %v1844_v31 = vadd.f32 %v5963_v29, %v5961_v27  ;;  %v2083_v27 = vsel %vm5957_vm9, 0, %v2082_v36  ;;  %v4961_v29 = vld [vmem:[#allocation8 + $0xc0] sm:$0xff] }
 0x145   : > { %2084 = vst [vmem:[#allocation2 + $0x20] sm:$0x1] %v2083_v27  ;;  %v6017_v5 = vpop.f32.mrf.mxu2  ;;  %2728 = vmatpush.bf16.msrb.mxu3 %v4961_v29 }
 0x146   : > { %v5971_v63 = vpop.f32.mrf.mxu1  ;;  %v1863_v2 = vadd.f32 %v1844_v31, %v1500_v30  ;;  %v1074_v31 = vadd.f32 %v5881_v34, %v5861_v51 }
 0x147   : > { %v5985_v25 = vpop.f32.mrf.mxu0 }
 0x148   : > { %v1199_v30 = vadd.f32 %v5913_v33, %v1074_v31  ;;  %v2086_v33 = vsel %vm5957_vm9, 0, %v2085_v1  ;;  %v2460_v31 = vld [vmem:[#allocation2] sm:$0xe] }
 0x149   : > { %2087 = vst [vmem:[#allocation2 + $0x28] sm:$0x1] %v2086_v33  ;;  %v2115_v33 = vld [vmem:[#allocation2 + $0x34] sm:$0xf] }
 0x14a   : > { %v1228_v27 = vadd.f32 %v5911_v20, %v1199_v30  ;;  %v1081_v20 = vadd.f32 %v5919_v54, %v5897_v18  ;;  %v1204_v18 = vadd.f32 %v5929_v42, %v1079_v24  ;;  %v6051_v54 = vld [vmem:[#allocation2 + $0x4] sm:$0x1]  ;;  %v1488_v42 = vadd.f32 %v5994_v15, %v5945_v59  ;;  %v2218_v15 = vld [vmem:[#allocation2 + $0x10] sm:$0xf] }
 0x14b   : > { %v5983_v61 = vpop.f32.mrf.mxu3 }
 0x14c   : > { %v1846_v22 = vadd.f32 %v5985_v25, %v5983_v61  ;;  %v1486_v61 = vadd.f32 %v5975_v45, %v5939_v37  ;;  %v1206_v10 = vadd.f32 %v5935_v48, %v1081_v20 }
 0x14d   : > { %v6045_v62 = vpop.f32.mrf.mxu2 }
 0x14e   : > { %v5981_v55 = vpop.f32.mrf.mxu1  ;;  %v1864_v36 = vadd.f32 %v1846_v22, %v1501_v19  ;;  %v2212_v22 = vld [vmem:[#allocation2 + $0x8] sm:$0xf]  ;;  %v2277_v19 = vshrl.u32 %v2260_v60, 16  ;;  %v2089_v60 = vsel %vm5957_vm9, 0, %v2088_v7 }
 0x14f   : > { %v1848_v43 = vpop.f32.mrf.mxu0  ;;  %2090 = vst [vmem:[#allocation2 + $0x30] sm:$0x1] %v2089_v60 }
 0x153   : > { %v1819_v58 = vpop.f32.mrf.mxu3 }
 0x154   : > { %v1849_v17 = vadd.f32 %v1848_v43, %v1819_v58  ;;  %v2215_v58 = vld [vmem:[#allocation2 + $0xc] sm:$0x1] }
 0x156   : > { %v5996_v13 = vpop.f32.mrf.mxu1 }
 0x157   : > { %v1850_v49 = vpop.f32.mrf.mxu0 }
 0x15b   : > { %v6025_v57 = vpop.f32.mrf.mxu3 }
 0x15e   : > { %v2016_v56 = vpop.f32.mrf.mxu1 }
 0x15f   : > { %v2036_v9 = vadd.f32 %v2016_v56, %v1863_v2  ;;  %v4976_v2 = vld [vmem:[#allocation8 + $0x138] sm:$0xff]  ;;  %v2113_v56 = vsel %vm5967_vm11, 0, %v2112_v16  ;;  %v2486_v16 = vrot.slane %v6051_v54, 5 }
 0x160   : > { %3248 = vmatpush.bf16.msrb.mxu2 %v4976_v2  ;;  %2114 = vst [vmem:[#allocation2 + $0x2c] sm:$0xf] %v2113_v56  ;;  %v1211_v2 = vadd.f32 %v5951_v0, %v1086_v26  ;;  %v6075_v0 = vadd.f32 %v5933_v44, %v1206_v10  ;;  %v1495_v44 = vpop.f32.mrf.mxu2 }
 0x161   : > { %v2048_v14 = vadd.f32 %v6009_v4, %v2036_v9  ;;  %v1502_v9 = vadd.f32 %v1486_v61, %v1228_v27  ;;  %v4488_v61 = vrot.slane %v2460_v31, 9  ;;  %v1851_v27 = vadd.f32 %v1850_v49, %v6025_v57 }
 0x162   : > { %v1503_v57 = vadd.f32 %v1488_v42, %v1230_v32  ;;  %v1491_v49 = vadd.f32 %v6017_v5, %v5953_v3  ;;  %v1496_v53 = vadd.f32 %v1495_v44, %v5981_v55  ;;  %v2227_v55 = vld [vmem:[#allocation2 + $0x1c] sm:$0x1] }
 0x163   : > { %v2056_v11 = vmax.f32 %v2048_v14, 0.0  ;;  %v6057_v30 = vpop.f32.mrf.mxu3  ;;  %v1865_v23 = vadd.f32 %v1849_v17, %v1502_v9  ;;  %v2116_v17 = vsel %vm5967_vm11, 0, %v2115_v33  ;;  %v2286_v9 = vshll.u32 %v6051_v54, 16 }
 0x164   : > { %2117 = vst [vmem:[#allocation2 + $0x34] sm:$0xf] %v2116_v17 }
 0x165   : > { %v2124_v38 = vpack.c.bf16 %v2056_v11, %v2056_v11  ;;  %v2288_v10 = vrot.slane %v2286_v9, 5 }
 0x166   : > { %v2018_v25 = vpop.f32.mrf.mxu1 }
 0x167   : > { %v2133_v51 = vshrl.u32 %v2124_v38, 16  ;;  %v2037_v34 = vadd.f32 %v2018_v25, %v1864_v36  ;;  %v2136_v45 = vshll.u32 %v2124_v38, 16  ;;  %v6059_v38 = vpop.f32.mrf.mxu0 }
 0x168   : > { %v1854_v42 = vadd.f32 %v6059_v38, %v6057_v30  ;;  %v2118_v38 = vld [vmem:[#allocation2 + $0x3c] sm:$0xf] }
 0x169   : > { %v2135_v29 = vrot.slane %v2133_v51, 7  ;;  %v2049_v37 = vadd.f32 %v6009_v4, %v2037_v34  ;;  %v2279_v51 = vrot.slane %v2277_v19, 4  ;;  %v4975_v34 = vld [vmem:[#allocation8 + $0x130] sm:$0xff] }
 0x16a   : > { %3249 = vmatpush.bf16.msrb.mxu2 %v4975_v34 }
 0x16b   : > { %v2138_v43 = vor.u32 %v2136_v45, %v2135_v29  ;;  %v2139_v14 = vrot.slane %v2135_v29, 4  ;;  %v2057_v8 = vmax.f32 %v2049_v37, 0.0  ;;  %v1233_v29 = vadd.f32 %v5925_v40, %v1204_v18  ;;  %v2221_v45 = vld [vmem:[#allocation2 + $0x14] sm:$0x1]  ;;  %v4474_v37 = vld [vmem:[#allocation2] sm:$0xf] }
 0x16c   : > { %v6084_v40 = vadd.f32 %v5949_v50, %v1211_v2  ;;  %v2283_v3 = vor.u32 %v2282_v12, %v2279_v51  ;;  %v1493_v50 = vadd.f32 %v6045_v62, %v5971_v63 }
 0x16d   : > { %v2213_v41 = vsel %vm5967_vm11, %v2138_v43, %v2212_v22  ;;  %v2216_v11 = vsel %vm5957_vm9, %v2139_v14, %v2215_v58  ;;  %v2125_v36 = vpack.c.bf16 %v2057_v8, %v2057_v8  ;;  %v6081_v22 = vadd.f32 %v5941_v6, %v1209_v35  ;;  %v4974_v35 = vld [vmem:[#allocation8 + $0x128] sm:$0xff] }
 0x16e   : > { %2214 = vst [vmem:[#allocation2 + $0x8] sm:$0xf] %v2213_v41  ;;  %v2021_v52 = vpop.f32.mrf.mxu1  ;;  %v2487_v58 = vsel %vm5566_vm5, %v4488_v61, %v2486_v16  ;;  %v1866_v8 = vadd.f32 %v1851_v27, %v1503_v57  ;;  %v1504_v6 = vadd.f32 %v1491_v49, %v1233_v29  ;;  %v1826_v41 = vpop.f32.mrf.mxu3  ;;  %3250 = vmatpush.bf16.msrb.mxu2 %v4974_v35  ;;  %v4996_v57 = vld [vmem:[#allocation8 + $0x1b8] sm:$0xff] }
 0x16f   : > { %2217 = vst [vmem:[#allocation2 + $0xc] sm:$0x1] %v2216_v11  ;;  %v2141_v25 = vshrl.u32 %v2125_v36, 16  ;;  %v2038_v1 = vadd.f32 %v2021_v52, %v1865_v23  ;;  %v2144_v48 = vshll.u32 %v2125_v36, 16  ;;  %v1855_v11 = vpop.f32.mrf.mxu0  ;;  %v2224_v52 = vld [vmem:[#allocation2 + $0x18] sm:$0xf]  ;;  %v2524_v62 = vunpack.c.l.b16 %v2487_v58  ;;  %3611 = vmatpush.bf16.msra.mxu0 %v4996_v57 }
 0x171   : > { %v2143_v56 = vrot.slane %v2141_v25, 7  ;;  %v2050_v59 = vadd.f32 %v6009_v4, %v2038_v1  ;;  %v2284_v25 = vrot.slane %v2283_v3, 4  ;;  %v2091_v1 = vld [vmem:[#allocation2 + $0x38] sm:$0x1] }
 0x172   : > { %v2092_v30 = vsel %vm5957_vm9, 0, %v2091_v1 }
 0x173   : > { %v2146_v24 = vor.u32 %v2144_v48, %v2143_v56  ;;  %v2147_v20 = vrot.slane %v2143_v56, 4  ;;  %v2058_v28 = vmax.f32 %v2050_v59, 0.0  ;;  %2093 = vst [vmem:[#allocation2 + $0x38] sm:$0x1] %v2092_v30  ;;  %v1867_v59 = vadd.f32 %v1854_v42, %v1504_v6  ;;  %v4984_v30 = vld [vmem:[#allocation8 + $0x178] sm:$0xff] }
 0x174   : > { %v2289_v60 = vsel %vm5555_vm4, %v2284_v25, %v2288_v10  ;;  %3277 = vmatpush.bf16.msra.mxu3 %v4984_v30 }
 0x175   : > { %v2219_v5 = vsel %vm5967_vm11, %v2146_v24, %v2218_v15  ;;  %v2222_v43 = vsel %vm5957_vm9, %v2147_v20, %v2221_v45  ;;  %v2126_v14 = vpack.c.bf16 %v2058_v28, %v2058_v28  ;;  %v4929_v31 = vld [vmem:[#allocation2 + $0x4] sm:$0xf0]  ;;  %v2119_v28 = vsel %vm5967_vm11, 0, %v2118_v38  ;;  %v4994_v38 = vld [vmem:[#allocation8 + $0x1a8] sm:$0xff] }
 0x176   : > { %v2461_v19 = vld [vmem:[#allocation2 + $0x8] sm:$0xe]  ;;  %2220 = vst [vmem:[#allocation2 + $0x10] sm:$0xf] %v2219_v5  ;;  %v2023_v26 = vpop.f32.mrf.mxu1  ;;  %v4475_v32 = vor.u32 %v4929_v31, %v4474_v37  ;;  %v2269_v18 = vld [vmem:[#allocation2 + $0xc] sm:$0x1]  ;;  %v1829_v35 = vpop.f32.mrf.mxu3 }
 0x177   : > { %v4489_v54 = vrot.slane %v2461_v19, 9  ;;  %2223 = vst [vmem:[#allocation2 + $0x14] sm:$0x1] %v2222_v43  ;;  %v2149_v36 = vshrl.u32 %v2126_v14, 16  ;;  %v2039_v23 = vadd.f32 %v2023_v26, %v1866_v8  ;;  %v2490_v63 = vrot.slane %v2269_v18, 5  ;;  %v4973_v26 = vld [vmem:[#allocation8 + $0x120] sm:$0xff] }
 0x178   : > { %2854 = vmatmul.bf16.vlgmr.msrb.gmra.mxu0 %v4475_v32  ;;  %v2261_v61 = vld [vmem:[#allocation2 + $0x8] sm:$0xf]  ;;  %v2152_v51 = vshll.u32 %v2126_v14, 16  ;;  %v2300_v27 = vshll.u32 %v2269_v18, 16  ;;  %v1505_v14 = vadd.f32 %v1493_v50, %v6075_v0  ;;  %v6114_v8 = vadd.f32 %v1496_v53, %v6081_v22  ;;  %2120 = vst [vmem:[#allocation2 + $0x3c] sm:$0xf] %v2119_v28  ;;  %v1858_v0 = vpop.f32.mrf.mxu0  ;;  %3251 = vmatpush.bf16.msrb.mxu2 %v4973_v26 }
 0x179   : > { %v2151_v16 = vrot.slane %v2149_v36, 7  ;;  %v2051_v34 = vadd.f32 %v6009_v4, %v2039_v23  ;;  %v2291_v2 = vshrl.u32 %v2261_v61, 16  ;;  %v2491_v48 = vsel %vm5566_vm5, %v4489_v54, %v2490_v63  ;;  %v4498_v24 = vld [vmem:[#allocation2 + $0x8] sm:$0xf]  ;;  %v2230_v54 = vld [vmem:[#allocation2 + $0x20] sm:$0xf] }
 0x17a   : > { %v2294_v12 = vshll.u32 %v2261_v61, 16  ;;  %v2525_v15 = vunpack.c.l.b16 %v2491_v48  ;;  %v2302_v9 = vrot.slane %v2300_v27, 5  ;;  %v1856_v32 = vadd.f32 %v1855_v11, %v1826_v41  ;;  %v4995_v63 = vld [vmem:[#allocation8 + $0x1b0] sm:$0xff] }
 0x17b   : > { %v2154_v7 = vor.u32 %v2152_v51, %v2151_v16  ;;  %v2155_v33 = vrot.slane %v2151_v16, 4  ;;  %v2059_v56 = vmax.f32 %v2051_v34, 0.0  ;;  %v2293_v17 = vrot.slane %v2291_v2, 4  ;;  %v2121_v34 = vld [vmem:[#allocation2 + $0x44] sm:$0xf]  ;;  %3612 = vmatpush.bf16.msra.mxu0 %v4995_v63  ;;  %v4993_v63 = vld [vmem:[#allocation8 + $0x1a0] sm:$0xff] }
 0x17c   : > { %v2296_v29 = vrot.slane %v2294_v12, 5  ;;  %v2532_v44 = vpack.c.b16 %v2525_v15, %v2524_v62  ;;  %v2412_v23 = vunpack.c.l.b16 %v2289_v60  ;;  %v2233_v62 = vld [vmem:[#allocation2 + $0x24] sm:$0x1]  ;;  %v1859_v2 = vadd.f32 %v1858_v0, %v1829_v35 }
 0x17d   : > { %v2225_v49 = vsel %vm5967_vm11, %v2154_v7, %v2224_v52  ;;  %v2228_v45 = vsel %vm5957_vm9, %v2155_v33, %v2227_v55  ;;  %v2127_v37 = vpack.c.bf16 %v2059_v56, %v2059_v56  ;;  %v4949_v20 = vld [vmem:[#allocation2 + $0xc] sm:$0xf0]  ;;  %v2094_v52 = vld [vmem:[#allocation2 + $0x40] sm:$0x1]  ;;  %v1868_v27 = vadd.f32 %v1856_v32, %v1505_v14  ;;  %v1497_v7 = vpop.f32.mrf.mxu2 }
 0x17e   : > { %2226 = vst [vmem:[#allocation2 + $0x18] sm:$0xf] %v2225_v49  ;;  %v2026_v58 = vpop.f32.mrf.mxu1  ;;  %v4499_v3 = vor.u32 %v4949_v20, %v4498_v24  ;;  %v2297_v5 = vor.u32 %v2296_v29, %v2293_v17  ;;  %v6110_v43 = vld [vmem:[#allocation2 + $0x10] sm:$0xe]  ;;  %v6116_v6 = vld [vmem:[#allocation2 + $0x14] sm:$0x1]  ;;  %2700 = vmatmul.bf16.vlgmr.msra.gmra.mxu2 %v2532_v44  ;;  %v1869_v35 = vadd.f32 %v1859_v2, %v6114_v8 }
 0x17f   : > { %2229 = vst [vmem:[#allocation2 + $0x1c] sm:$0x1] %v2228_v45  ;;  %v2157_v31 = vshrl.u32 %v2127_v37, 16  ;;  %v2040_v19 = vadd.f32 %v2026_v58, %v1867_v59  ;;  %v2160_v18 = vshll.u32 %v2127_v37, 16  ;;  %v2262_v10 = vld [vmem:[#allocation2 + $0x10] sm:$0xf]  ;;  %3613 = vmatpush.bf16.msra.mxu0 %v4994_v38 }
 0x180   : > { %2729 = vmatmul.bf16.vlgmr.msrb.gmra.mxu3 %v4499_v3  ;;  %v2298_v36 = vrot.slane %v2297_v5, 4  ;;  %v2305_v53 = vshrl.u32 %v2262_v10, 16  ;;  %v2308_v42 = vshll.u32 %v2262_v10, 16  ;;  %v4490_v11 = vrot.slane %v6110_v43, 9  ;;  %v4478_v60 = vld [vmem:[#allocation2 + $0x10] sm:$0xf]  ;;  %v1860_v8 = vpop.f32.mrf.mxu0 }
 0x181   : > { %v2159_v50 = vrot.slane %v2157_v31, 7  ;;  %v2052_v22 = vadd.f32 %v6009_v4, %v2040_v19  ;;  %v2494_v61 = vrot.slane %v6116_v6, 5  ;;  %v2095_v25 = vsel %vm5957_vm9, 0, %v2094_v52  ;;  %v4972_v58 = vld [vmem:[#allocation8 + $0x118] sm:$0xff]  ;;  %v4971_v0 = vld [vmem:[#allocation8 + $0x110] sm:$0xff] }
 0x182   : > { %v2303_v41 = vsel %vm5555_vm4, %v2298_v36, %v2302_v9  ;;  %2096 = vst [vmem:[#allocation2 + $0x40] sm:$0x1] %v2095_v25  ;;  %v2307_v48 = vrot.slane %v2305_v53, 4  ;;  %v2310_v12 = vrot.slane %v2308_v42, 5  ;;  %v2122_v20 = vsel %vm5967_vm11, 0, %v2121_v34  ;;  %3252 = vmatpush.bf16.msrb.mxu2 %v4972_v58  ;;  %v6139_v36 = vld [vmem:[#allocation8 + $0x1f8] sm:$0xff] }
 0x183   : > { %v2162_v1 = vor.u32 %v2160_v18, %v2159_v50  ;;  %v2163_v16 = vrot.slane %v2159_v50, 4  ;;  %v2060_v51 = vmax.f32 %v2052_v22, 0.0  ;;  %v2413_v55 = vunpack.c.l.b16 %v2303_v41  ;;  %v2236_v43 = vld [vmem:[#allocation2 + $0x28] sm:$0xf]  ;;  %2123 = vst [vmem:[#allocation2 + $0x44] sm:$0xf] %v2122_v20  ;;  %5045 = vmatpush.bf16.msra.mxu1 %v6139_v36  ;;  %3614 = vmatpush.bf16.msra.mxu0 %v4993_v63 }
 0x184   : > { %v2311_v24 = vor.u32 %v2310_v12, %v2307_v48  ;;  %v2495_v44 = vsel %vm5566_vm5, %v4490_v11, %v2494_v61  ;;  %v1498_v3 = vadd.f32 %v1497_v7, %v5996_v13  ;;  %v2314_v14 = vshll.u32 %v6116_v6, 16  ;;  %v4983_v50 = vld [vmem:[#allocation8 + $0x170] sm:$0xff]  ;;  %v4982_v48 = vld [vmem:[#allocation8 + $0x168] sm:$0xff] }
 0x185   : > { %v2231_v33 = vsel %vm5967_vm11, %v2162_v1, %v2230_v54  ;;  %v2234_v56 = vsel %vm5957_vm9, %v2163_v16, %v2233_v62  ;;  %v2128_v15 = vpack.c.bf16 %v2060_v51, %v2060_v51  ;;  %v2420_v59 = vpack.c.b16 %v2413_v55, %v2412_v23  ;;  %v4930_v17 = vld [vmem:[#allocation2 + $0x14] sm:$0xf0]  ;;  %v2239_v23 = vld [vmem:[#allocation2 + $0x2c] sm:$0x1]  ;;  %v6145_v62 = vld [vmem:[#allocation8 + $0x1f0] sm:$0xff]  ;;  %3278 = vmatpush.bf16.msra.mxu3 %v4983_v50  ;;  %v1831_v1 = vpop.f32.mrf.mxu3 }
 0x186   : > { %v2463_v29 = vld [vmem:[#allocation2 + $0x18] sm:$0xe]  ;;  %2232 = vst [vmem:[#allocation2 + $0x20] sm:$0xf] %v2231_v33  ;;  %v2028_v57 = vpop.f32.mrf.mxu1  ;;  %v4479_v49 = vor.u32 %v4930_v17, %v4478_v60  ;;  %v6129_v45 = vld [vmem:[#allocation2 + $0x1c] sm:$0x1]  ;;  %v2526_v10 = vunpack.c.l.b16 %v2495_v44  ;;  %3253 = vmatpush.bf16.msrb.mxu2 %v4971_v0 }
 0x187   : > { %v4491_v37 = vrot.slane %v2463_v29, 9  ;;  %2235 = vst [vmem:[#allocation2 + $0x24] sm:$0x1] %v2234_v56  ;;  %v2165_v28 = vshrl.u32 %v2128_v15, 16  ;;  %2883 = vmatmul.bf16.vlgmr.msrb.gmra.mxu1 %v2420_v59  ;;  %v2041_v9 = vadd.f32 %v2028_v57, %v1868_v27  ;;  %v2168_v5 = vshll.u32 %v2128_v15, 16  ;;  %v4992_v33 = vld [vmem:[#allocation8 + $0x198] sm:$0xff] }
 0x188   : > { %2859 = vmatmul.bf16.gmra.mxu0 %v4479_v49  ;;  %v2498_v31 = vrot.slane %v6129_v45, 5  ;;  %v2263_v19 = vld [vmem:[#allocation2 + $0x18] sm:$0xf]  ;;  %v2312_v6 = vrot.slane %v2311_v24, 4  ;;  %v2328_v41 = vshll.u32 %v6129_v45, 16  ;;  %v2316_v11 = vrot.slane %v2314_v14, 5  ;;  %5046 = vmatpush.bf16.msra.mxu1 %v6145_v62 }
 0x189   : > { %v2167_v26 = vrot.slane %v2165_v28, 7  ;;  %v2053_v32 = vadd.f32 %v6009_v4, %v2041_v9  ;;  %v2319_v18 = vshrl.u32 %v2263_v19, 16  ;;  %v2322_v54 = vshll.u32 %v2263_v19, 16  ;;  %v4502_v2 = vld [vmem:[#allocation2 + $0x18] sm:$0xf]  ;;  %3279 = vmatpush.bf16.msra.mxu3 %v4982_v48  ;;  %3615 = vmatpush.bf16.msra.mxu0 %v4992_v33  ;;  %v6168_v0 = vld [vmem:[#allocation8 + $0x1e0] sm:$0xff] }
 0x18a   : > { %v2499_v13 = vsel %vm5566_vm5, %v4491_v37, %v2498_v31  ;;  %v1507_v56 = vadd.f32 %v1498_v3, %v6084_v40  ;;  %v2317_v60 = vsel %vm5555_vm4, %v2312_v6, %v2316_v11  ;;  %v6160_v29 = vld [vmem:[#allocation8 + $0x1e8] sm:$0xff]  ;;  %v1861_v57 = vadd.f32 %v1860_v8, %v1831_v1  ;;  %v2242_v45 = vld [vmem:[#allocation2 + $0x30] sm:$0xf] }
 0x18b   : > { %v2170_v22 = vor.u32 %v2168_v5, %v2167_v26  ;;  %v2171_v53 = vrot.slane %v2167_v26, 4  ;;  %v2061_v42 = vmax.f32 %v2053_v32, 0.0  ;;  %v2527_v52 = vunpack.c.l.b16 %v2499_v13  ;;  %v4970_v58 = vld [vmem:[#allocation8 + $0x108] sm:$0xff]  ;;  %v4981_v3 = vld [vmem:[#allocation8 + $0x160] sm:$0xff]  ;;  %v4991_v26 = vld [vmem:[#allocation8 + $0x190] sm:$0xff] }
 0x18c   : > { %v2321_v61 = vrot.slane %v2319_v18, 4  ;;  %v2324_v25 = vrot.slane %v2322_v54, 5  ;;  %v2330_v24 = vrot.slane %v2328_v41, 5  ;;  %v2245_v5 = vld [vmem:[#allocation2 + $0x34] sm:$0x1]  ;;  %v2414_v14 = vunpack.c.l.b16 %v2317_v60  ;;  %5047 = vmatpush.bf16.msra.mxu1 %v6160_v29  ;;  %3254 = vmatpush.bf16.msrb.mxu2 %v4970_v58  ;;  %v4980_v41 = vld [vmem:[#allocation8 + $0x158] sm:$0xff] }
 0x18d   : > { %v2237_v16 = vsel %vm5967_vm11, %v2170_v22, %v2236_v43  ;;  %v2240_v51 = vsel %vm5957_vm9, %v2171_v53, %v2239_v23  ;;  %v2129_v55 = vpack.c.bf16 %v2061_v42, %v2061_v42  ;;  %v2533_v34 = vpack.c.b16 %v2527_v52, %v2526_v10  ;;  %v4950_v27 = vld [vmem:[#allocation2 + $0x1c] sm:$0xf0]  ;;  %3280 = vmatpush.bf16.msra.mxu3 %v4981_v3  ;;  %v2248_v60 = vld [vmem:[#allocation2 + $0x38] sm:$0xf] }
 0x18e   : > { %2238 = vst [vmem:[#allocation2 + $0x28] sm:$0xf] %v2237_v16  ;;  %v2031_v12 = vpop.f32.mrf.mxu1  ;;  %v4503_v30 = vor.u32 %v4950_v27, %v4502_v2  ;;  %v2325_v38 = vor.u32 %v2324_v25, %v2321_v61  ;;  %v6152_v7 = vld [vmem:[#allocation2 + $0x20] sm:$0xe]  ;;  %v6157_v17 = vld [vmem:[#allocation2 + $0x24] sm:$0x1]  ;;  %v1870_v13 = vadd.f32 %v1861_v57, %v1507_v56  ;;  %3616 = vmatpush.bf16.msra.mxu0 %v4991_v26 }
 0x18f   : > { %2241 = vst [vmem:[#allocation2 + $0x2c] sm:$0x1] %v2240_v51  ;;  %v2173_v15 = vshrl.u32 %v2129_v55, 16  ;;  %v2042_v59 = vadd.f32 %v2031_v12, %v1869_v35  ;;  %v2176_v49 = vshll.u32 %v2129_v55, 16  ;;  %2705 = vmatmul.bf16.gmra.mxu2 %v2533_v34  ;;  %v2264_v40 = vld [vmem:[#allocation2 + $0x20] sm:$0xf] }
 0x190   : > { %2734 = vmatmul.bf16.gmra.mxu3 %v4503_v30  ;;  %v2326_v37 = vrot.slane %v2325_v38, 4  ;;  %v2333_v9 = vshrl.u32 %v2264_v40, 16  ;;  %v2336_v44 = vshll.u32 %v2264_v40, 16  ;;  %v4492_v31 = vrot.slane %v6152_v7, 9  ;;  %v4482_v10 = vld [vmem:[#allocation2 + $0x20] sm:$0xf]  ;;  %5048 = vmatpush.bf16.msra.mxu1 %v6168_v0 }
 0x191   : > { %v2175_v20 = vrot.slane %v2173_v15, 7  ;;  %v2054_v28 = vadd.f32 %v6009_v4, %v2042_v59  ;;  %v2502_v19 = vrot.slane %v6157_v17, 5  ;;  %v4990_v16 = vld [vmem:[#allocation8 + $0x188] sm:$0xff]  ;;  %v2342_v34 = vshll.u32 %v6157_v17, 16  ;;  %v6181_v30 = vld [vmem:[#allocation8 + $0x1d8] sm:$0xff]  ;;  %v4969_v38 = vld [vmem:[#allocation8 + $0x100] sm:$0xff]  ;;  %3281 = vmatpush.bf16.msra.mxu3 %v4980_v41 }
 0x192   : > { %v2331_v43 = vsel %vm5555_vm4, %v2326_v37, %v2330_v24  ;;  %v2335_v35 = vrot.slane %v2333_v9, 4  ;;  %v2338_v6 = vrot.slane %v2336_v44, 5  ;;  %v4979_v59 = vld [vmem:[#allocation8 + $0x150] sm:$0xff]  ;;  %v2251_v17 = vld [vmem:[#allocation2 + $0x3c] sm:$0x1]  ;;  %3617 = vmatpush.bf16.msra.mxu0 %v4990_v16  ;;  %3255 = vmatpush.bf16.msrb.mxu2 %v4969_v38  ;;  %v4989_v37 = vld [vmem:[#allocation8 + $0x180] sm:$0xff] }
 0x193   : > { %v2178_v32 = vor.u32 %v2176_v49, %v2175_v20  ;;  %v2179_v18 = vrot.slane %v2175_v20, 4  ;;  %v2062_v54 = vmax.f32 %v2054_v28, 0.0  ;;  %v2415_v23 = vunpack.c.l.b16 %v2331_v43  ;;  %v6192_v26 = vld [vmem:[#allocation8 + $0x1d0] sm:$0xff] }
 0x194   : > { %v2339_v8 = vor.u32 %v2338_v6, %v2335_v35  ;;  %v2503_v2 = vsel %vm5566_vm5, %v4492_v31, %v2502_v19  ;;  %v2344_v44 = vrot.slane %v2342_v34, 5  ;;  %5049 = vmatpush.bf16.msra.mxu1 %v6181_v30  ;;  %v2906_v6 = vld [vmem:[#allocation2 + $0x10] sm:$0xf] }
 0x195   : > { %v2243_v50 = vsel %vm5967_vm11, %v2178_v32, %v2242_v45  ;;  %v2246_v22 = vsel %vm5957_vm9, %v2179_v18, %v2245_v5  ;;  %v2130_v53 = vpack.c.bf16 %v2062_v54, %v2062_v54  ;;  %v2421_v42 = vpack.c.b16 %v2415_v23, %v2414_v14  ;;  %v4931_v52 = vld [vmem:[#allocation2 + $0x24] sm:$0xf0]  ;;  %3282 = vmatpush.bf16.msra.mxu3 %v4979_v59  ;;  %v4978_v32 = vld [vmem:[#allocation8 + $0x148] sm:$0xff] }
 0x196   : > { %v2465_v63 = vld [vmem:[#allocation2 + $0x28] sm:$0xe]  ;;  %2244 = vst [vmem:[#allocation2 + $0x30] sm:$0xf] %v2243_v50  ;;  %v2033_v11 = vpop.f32.mrf.mxu1  ;;  %v4483_v61 = vor.u32 %v4931_v52, %v4482_v10  ;;  %v6174_v25 = vld [vmem:[#allocation2 + $0x2c] sm:$0x1]  ;;  %v2528_v49 = vunpack.c.l.b16 %v2503_v2  ;;  %3618 = vmatpush.bf16.msra.mxu0 %v4989_v37 }
 0x197   : > { %v4493_v1 = vrot.slane %v2465_v63, 9  ;;  %2247 = vst [vmem:[#allocation2 + $0x34] sm:$0x1] %v2246_v22  ;;  %v2181_v51 = vshrl.u32 %v2130_v53, 16  ;;  %2888 = vmatmul.bf16.gmra.mxu1 %v2421_v42  ;;  %v2043_v55 = vadd.f32 %v2033_v11, %v1870_v13  ;;  %v2184_v27 = vshll.u32 %v2130_v53, 16  ;;  %v6199_v42 = vld [vmem:[#allocation8 + $0x1c8] sm:$0xff] }
 0x198   : > { %2864 = vmatmul.bf16.gmra.mxu0 %v4483_v61  ;;  %v2506_v48 = vrot.slane %v6174_v25, 5  ;;  %v2265_v12 = vld [vmem:[#allocation2 + $0x28] sm:$0xf]  ;;  %v2340_v45 = vrot.slane %v2339_v8, 4  ;;  %5050 = vmatpush.bf16.msra.mxu1 %v6192_v26  ;;  %v2254_v8 = vld [vmem:[#allocation2 + $0x40] sm:$0xf] }
 0x199   : > { %v2183_v7 = vrot.slane %v2181_v51, 7  ;;  %v2055_v33 = vadd.f32 %v6009_v4, %v2043_v55  ;;  %v2347_v56 = vshrl.u32 %v2265_v12, 16  ;;  %v2350_v15 = vshll.u32 %v2265_v12, 16  ;;  %v4506_v9 = vld [vmem:[#allocation2 + $0x28] sm:$0xf]  ;;  %3283 = vmatpush.bf16.msra.mxu3 %v4978_v32 }
 0x19a   : > { %v2507_v57 = vsel %vm5566_vm5, %v4493_v1, %v2506_v48  ;;  %v2356_v4 = vshll.u32 %v6174_v25, 16  ;;  %v2345_v10 = vsel %vm5555_vm4, %v2340_v45, %v2344_v44  ;;  %3640 = vmatpush.bf16.msrb.mxu0 %v6139_v36  ;;  %v6201_v52 = vld [vmem:[#allocation2 + $0x8] sm:$0xf]  ;;  %v4977_v25 = vld [vmem:[#allocation8 + $0x140] sm:$0xff]  ;;  %v2257_v36 = vld [vmem:[#allocation2 + $0x44] sm:$0x1] }
 0x19b   : > { %v2186_v24 = vor.u32 %v2184_v27, %v2183_v7  ;;  %v2187_v40 = vrot.slane %v2183_v7, 4  ;;  %v2063_v20 = vmax.f32 %v2055_v33, 0.0  ;;  %v2529_v28 = vunpack.c.l.b16 %v2507_v57  ;;  %v5012_v1 = vld [vmem:[#allocation8 + $0x238] sm:$0xff]  ;;  %v6214_v45 = vld [vmem:[#allocation8 + $0x1c0] sm:$0xff] }
 0x19c   : > { %v2349_v58 = vrot.slane %v2347_v56, 4  ;;  %v2352_v3 = vrot.slane %v2350_v15, 5  ;;  %v2358_v22 = vrot.slane %v2356_v4, 5  ;;  %v2416_v51 = vunpack.c.l.b16 %v2345_v10  ;;  %3813 = vmatpush.bf16.msra.mxu2 %v5012_v1  ;;  %5051 = vmatpush.bf16.msra.mxu1 %v6199_v42  ;;  %v3317_v10 = vld [vmem:[#allocation2 + $0x20] sm:$0xf] }
 0x19d   : > { %v2249_v5 = vsel %vm5967_vm11, %v2186_v24, %v2248_v60  ;;  %v2252_v43 = vsel %vm5957_vm9, %v2187_v40, %v2251_v17  ;;  %v2131_v14 = vpack.c.bf16 %v2063_v20, %v2063_v20  ;;  %v2534_v31 = vpack.c.b16 %v2529_v28, %v2528_v49  ;;  %v4951_v19 = vld [vmem:[#allocation2 + $0x2c] sm:$0xf0]  ;;  %3284 = vmatpush.bf16.msra.mxu3 %v4977_v25 }
 0x19e   : > { %2250 = vst [vmem:[#allocation2 + $0x38] sm:$0xf] %v2249_v5  ;;  %v4507_v18 = vor.u32 %v4951_v19, %v4506_v9  ;;  %v2353_v54 = vor.u32 %v2352_v3, %v2349_v58  ;;  %v2466_v23 = vld [vmem:[#allocation2 + $0x30] sm:$0xe]  ;;  %v6196_v35 = vld [vmem:[#allocation2 + $0x34] sm:$0x1]  ;;  %3641 = vmatpush.bf16.msrb.mxu0 %v6145_v62 }
 0x19f   : > { %2253 = vst [vmem:[#allocation2 + $0x3c] sm:$0x1] %v2252_v43  ;;  %v2189_v13 = vshrl.u32 %v2131_v14, 16  ;;  %2710 = vmatmul.bf16.gmra.mxu2 %v2534_v31  ;;  %v2266_v53 = vld [vmem:[#allocation2 + $0x30] sm:$0xf]  ;;  %v2192_v41 = vshll.u32 %v2131_v14, 16 }
 0x1a0   : > { %2739 = vmatmul.bf16.gmra.mxu3 %v4507_v18  ;;  %v2354_v50 = vrot.slane %v2353_v54, 4  ;;  %v2361_v11 = vshrl.u32 %v2266_v53, 16  ;;  %v2364_v61 = vshll.u32 %v2266_v53, 16  ;;  %v4494_v55 = vrot.slane %v2466_v23, 9  ;;  %v4486_v38 = vld [vmem:[#allocation2 + $0x30] sm:$0xf]  ;;  %5052 = vmatpush.bf16.msra.mxu1 %v6214_v45 }
 0x1a1   : > { %v2191_v63 = vrot.slane %v2189_v13, 7  ;;  %v2510_v34 = vrot.slane %v6196_v35, 5  ;;  %v2935_v33 = vshrl.u32 %v2906_v6, 16  ;;  %v2938_v56 = vshll.u32 %v2906_v6, 16  ;;  %5053 = vmatpush.bf16.msrb.mxu3 %v5012_v1  ;;  %v5011_v5 = vld [vmem:[#allocation8 + $0x230] sm:$0xff] }
 0x1a2   : > { %v2359_v16 = vsel %vm5555_vm4, %v2354_v50, %v2358_v22  ;;  %v2363_v12 = vrot.slane %v2361_v11, 4  ;;  %v2366_v7 = vrot.slane %v2364_v61, 5  ;;  %v2921_v49 = vshrl.u32 %v6201_v52, 16  ;;  %3642 = vmatpush.bf16.msrb.mxu0 %v6160_v29  ;;  %3814 = vmatpush.bf16.msra.mxu2 %v5011_v5  ;;  %v6225_v50 = vld [vmem:[#allocation2 + $0xc] sm:$0x1] }
 0x1a3   : > { %v2194_v2 = vor.u32 %v2192_v41, %v2191_v63  ;;  %v2195_v27 = vrot.slane %v2191_v63, 4  ;;  %v2417_v48 = vunpack.c.l.b16 %v2359_v16  ;;  %v2924_v47 = vshll.u32 %v6201_v52, 16  ;;  %v2907_v22 = vld [vmem:[#allocation2 + $0x14] sm:$0x1]  ;;  %v3318_v52 = vld [vmem:[#allocation2 + $0x28] sm:$0xf] }
 0x1a4   : > { %v2367_v40 = vor.u32 %v2366_v7, %v2363_v12  ;;  %v2370_v21 = vshll.u32 %v6196_v35, 16  ;;  %v2511_v20 = vsel %vm5566_vm5, %v4494_v55, %v2510_v34  ;;  %v2937_v58 = vrot.slane %v2935_v33, 4  ;;  %v5010_v12 = vld [vmem:[#allocation8 + $0x228] sm:$0xff] }
 0x1a5   : > { %v2255_v15 = vsel %vm5967_vm11, %v2194_v2, %v2254_v8  ;;  %v2258_v59 = vsel %vm5957_vm9, %v2195_v27, %v2257_v36  ;;  %v2422_v60 = vpack.c.b16 %v2417_v48, %v2416_v51  ;;  %v4932_v17 = vld [vmem:[#allocation2 + $0x34] sm:$0xf0]  ;;  %v2940_v3 = vrot.slane %v2938_v56, 5  ;;  %5054 = vmatpush.bf16.msrb.mxu3 %v5011_v5  ;;  %v3033_v8 = vld [vmem:[#allocation2 + $0x10] sm:$0xe] }
 0x1a6   : > { %v2467_v57 = vld [vmem:[#allocation2 + $0x38] sm:$0xe]  ;;  %2256 = vst [vmem:[#allocation2 + $0x40] sm:$0xf] %v2255_v15  ;;  %v4487_v62 = vor.u32 %v4932_v17, %v4486_v38  ;;  %v2275_v37 = vld [vmem:[#allocation2 + $0x3c] sm:$0x1]  ;;  %v2530_v19 = vunpack.c.l.b16 %v2511_v20  ;;  %3643 = vmatpush.bf16.msrb.mxu0 %v6168_v0  ;;  %3815 = vmatpush.bf16.msra.mxu2 %v5010_v12 }
 0x1a7   : > { %v4495_v24 = vrot.slane %v2467_v57, 9  ;;  %2259 = vst [vmem:[#allocation2 + $0x44] sm:$0x1] %v2258_v59  ;;  %2893 = vmatmul.bf16.gmra.mxu1 %v2422_v60  ;;  %v2514_v28 = vrot.slane %v2275_v37, 5  ;;  %v2267_v4 = vld [vmem:[#allocation2 + $0x38] sm:$0xf]  ;;  %v2941_v53 = vor.u32 %v2940_v3, %v2937_v58 }
 0x1a8   : > { %2869 = vmatmul.bf16.gmra.mxu0 %v4487_v62  ;;  %v2375_v9 = vshrl.u32 %v2267_v4, 16  ;;  %v2378_v44 = vshll.u32 %v2267_v4, 16  ;;  %v2384_v43 = vshll.u32 %v2275_v37, 16  ;;  %v2368_v31 = vrot.slane %v2367_v40, 4  ;;  %v4510_v63 = vld [vmem:[#allocation2 + $0x38] sm:$0xf] }
 0x1a9   : > { %v2515_v14 = vsel %vm5566_vm5, %v4495_v24, %v2514_v28  ;;  %v2372_v29 = vrot.slane %v2370_v21, 5  ;;  %v2923_v23 = vrot.slane %v2921_v49, 4  ;;  %v2926_v13 = vrot.slane %v2924_v47, 5  ;;  %v4985_v33 = vld [vmem:[#allocation2 + $0x14] sm:$0xf0]  ;;  %5055 = vmatpush.bf16.msrb.mxu3 %v5010_v12 }
 0x1aa   : > { %v2531_v32 = vunpack.c.l.b16 %v2515_v14  ;;  %v2377_v18 = vrot.slane %v2375_v9, 4  ;;  %v2380_v54 = vrot.slane %v2378_v44, 5  ;;  %v2386_v61 = vrot.slane %v2384_v43, 5  ;;  %3644 = vmatpush.bf16.msrb.mxu0 %v6181_v30  ;;  %v3032_v59 = vld [vmem:[#allocation2 + $0x8] sm:$0xe] }
 0x1ab   : > { %v2373_v11 = vsel %vm5555_vm4, %v2368_v31, %v2372_v29  ;;  %v3360_v36 = vshrl.u32 %v3317_v10, 16  ;;  %v3363_v16 = vshll.u32 %v3317_v10, 16  ;;  %v2927_v51 = vor.u32 %v2926_v13, %v2923_v23  ;;  %v4714_v62 = vld [vmem:[#allocation2 + $0x10] sm:$0xf]  ;;  %v2908_v24 = vld [vmem:[#allocation2 + $0x18] sm:$0xf] }
 0x1ac   : > { %v2535_v35 = vpack.c.b16 %v2531_v32, %v2530_v19  ;;  %v2381_v6 = vor.u32 %v2380_v54, %v2377_v18  ;;  %v2930_v0 = vshll.u32 %v6225_v50, 16  ;;  %v2944_v55 = vshll.u32 %v2907_v22, 16  ;;  %v2910_v20 = vld [vmem:[#allocation2 + $0x20] sm:$0xf]  ;;  %v6239_v58 = vld [vmem:[#allocation2 + $0x24] sm:$0x1] }
 0x1ad   : > { %v4952_v41 = vld [vmem:[#allocation2 + $0x3c] sm:$0xf0]  ;;  %v2942_v2 = vrot.slane %v2941_v53, 4  ;;  %v3374_v27 = vshrl.u32 %v3318_v52, 16  ;;  %v3377_v48 = vshll.u32 %v3318_v52, 16  ;;  %v2418_v38 = vunpack.c.l.b16 %v2373_v11  ;;  %v5009_v32 = vld [vmem:[#allocation8 + $0x220] sm:$0xff] }
 0x1ae   : > { %v4511_v25 = vor.u32 %v4952_v41, %v4510_v63  ;;  %v2382_v1 = vrot.slane %v2381_v6, 4  ;;  %v4641_v56 = vrot.slane %v3033_v8, 9  ;;  %v3062_v15 = vrot.slane %v2907_v22, 5  ;;  %3645 = vmatpush.bf16.msrb.mxu0 %v6192_v26  ;;  %v6241_v3 = vld [vmem:[#allocation2 + $0x2c] sm:$0x1]  ;;  %3816 = vmatpush.bf16.msra.mxu2 %v5009_v32 }
 0x1af   : > { %2715 = vmatmul.bf16.gmra.mxu2 %v2535_v35  ;;  %v3362_v60 = vrot.slane %v3360_v36, 4  ;;  %v3365_v17 = vrot.slane %v3363_v16, 5  ;;  %v3376_v57 = vrot.slane %v3374_v27, 4  ;;  %v3379_v49 = vrot.slane %v3377_v48, 5  ;;  %5056 = vmatpush.bf16.msrb.mxu3 %v5009_v32  ;;  %v2909_v8 = vld [vmem:[#allocation2 + $0x1c] sm:$0x1] }
 0x1b0   : > { %2744 = vmatmul.bf16.gmra.mxu3 %v4511_v25  ;;  %v2387_v34 = vsel %vm5555_vm4, %v2382_v1, %v2386_v61  ;;  %v2946_v37 = vrot.slane %v2944_v55, 5  ;;  %v4715_v40 = vor.u32 %v4985_v33, %v4714_v62  ;;  %v2928_v47 = vrot.slane %v2927_v51, 4  ;;  %v3319_v25 = vld [vmem:[#allocation2 + $0x30] sm:$0xf]  ;;  %v3034_v27 = vld [vmem:[#allocation2 + $0x18] sm:$0xe] }
 0x1b1   : > { %v2419_v7 = vunpack.c.l.b16 %v2387_v34  ;;  %v2932_v21 = vrot.slane %v2930_v0, 5  ;;  %v4640_v4 = vrot.slane %v3032_v59, 9  ;;  %v3058_v9 = vrot.slane %v6225_v50, 5  ;;  %v2911_v34 = vld [vmem:[#allocation2 + $0x24] sm:$0x1]  ;;  %v5008_v59 = vld [vmem:[#allocation8 + $0x218] sm:$0xff] }
 0x1b2   : > { %v2947_v28 = vsel %vm5555_vm4, %v2942_v2, %v2946_v37  ;;  %v3063_v44 = vsel %vm5566_vm5, %v4641_v56, %v3062_v15  ;;  %v3366_v5 = vor.u32 %v3365_v17, %v3362_v60  ;;  %v3380_v43 = vor.u32 %v3379_v49, %v3376_v57  ;;  %3646 = vmatpush.bf16.msrb.mxu0 %v6199_v42  ;;  %v3320_v42 = vld [vmem:[#allocation2 + $0x38] sm:$0xf]  ;;  %v2912_v15 = vld [vmem:[#allocation2 + $0x28] sm:$0xf]  ;;  %v2914_v62 = vld [vmem:[#allocation2 + $0x30] sm:$0xf] }
 0x1b3   : > { %v2423_v30 = vpack.c.b16 %v2419_v7, %v2418_v38  ;;  %v2949_v26 = vshrl.u32 %v2908_v24, 16  ;;  %v2952_v14 = vshll.u32 %v2908_v24, 16  ;;  %v2963_v31 = vshrl.u32 %v2910_v20, 16  ;;  %v4986_v57 = vld [vmem:[#allocation2 + $0x24] sm:$0xf0]  ;;  %3817 = vmatpush.bf16.msra.mxu2 %v5008_v59  ;;  %5057 = vmatpush.bf16.msrb.mxu3 %v5008_v59 }
 0x1b4   : > { %v2966_v19 = vshll.u32 %v2910_v20, 16  ;;  %v2933_v18 = vsel %vm5555_vm4, %v2928_v47, %v2932_v21  ;;  %v3369_v54 = vshll.u32 %v6239_v58, 16  ;;  %v3383_v29 = vshll.u32 %v6241_v3, 16  ;;  %v6255_v21 = vld [vmem:[#allocation2 + $0x34] sm:$0x1] }
 0x1b5   : > { %v3089_v23 = vunpack.c.l.b16 %v2947_v28  ;;  %v3059_v13 = vsel %vm5566_vm5, %v4640_v4, %v3058_v9  ;;  %v3105_v10 = vunpack.c.l.b16 %v3063_v44  ;;  %v3367_v35 = vrot.slane %v3366_v5, 4  ;;  %v6257_v28 = vld [vmem:[#allocation2 + $0x3c] sm:$0x1]  ;;  %v4718_v5 = vld [vmem:[#allocation2 + $0x20] sm:$0xf] }
 0x1b6   : > { %v3381_v6 = vrot.slane %v3380_v43, 4  ;;  %v2951_v50 = vrot.slane %v2949_v26, 4  ;;  %v2954_v22 = vrot.slane %v2952_v14, 5  ;;  %v3088_v53 = vunpack.c.l.b16 %v2933_v18  ;;  %3647 = vmatpush.bf16.msrb.mxu0 %v6214_v45  ;;  %v3035_v45 = vld [vmem:[#allocation2 + $0x20] sm:$0xe] }
 0x1b7   : > { %2898 = vmatmul.bf16.gmra.mxu1 %v2423_v30  ;;  %v2965_v52 = vrot.slane %v2963_v31, 4  ;;  %v2968_v63 = vrot.slane %v2966_v19, 5  ;;  %v3104_v41 = vunpack.c.l.b16 %v3059_v13  ;;  %v3371_v11 = vrot.slane %v3369_v54, 5 }
 0x1b8   : > { %3619 = vmatmul.bf16.vlgmr.msra.gmra.mxu0 %v4715_v40  ;;  %v3385_v61 = vrot.slane %v3383_v29, 5  ;;  %v3096_v1 = vpack.c.b16 %v3089_v23, %v3088_v53  ;;  %v3402_v36 = vshrl.u32 %v3320_v42, 16  ;;  %v3405_v16 = vshll.u32 %v3320_v42, 16  ;;  %v5007_v53 = vld [vmem:[#allocation8 + $0x210] sm:$0xff] }
 0x1b9   : > { %v3112_v51 = vpack.c.b16 %v3105_v10, %v3104_v41  ;;  %v3372_v0 = vsel %vm5555_vm4, %v3367_v35, %v3371_v11  ;;  %v2955_v2 = vor.u32 %v2954_v22, %v2951_v50  ;;  %v2969_v48 = vor.u32 %v2968_v63, %v2965_v52  ;;  %v3321_v35 = vld [vmem:[#allocation2 + $0x40] sm:$0xf]  ;;  %3818 = vmatpush.bf16.msra.mxu2 %v5007_v53 }
 0x1ba   : > { %v3386_v55 = vsel %vm5555_vm4, %v3381_v6, %v3385_v61  ;;  %v3388_v12 = vshrl.u32 %v3319_v25, 16  ;;  %v3391_v38 = vshll.u32 %v3319_v25, 16  ;;  %v2958_v7 = vshll.u32 %v2909_v8, 16  ;;  %5058 = vmatpush.bf16.msrb.mxu3 %v5007_v53 }
 0x1bb   : > { %v3404_v33 = vrot.slane %v3402_v36, 4  ;;  %v3407_v56 = vrot.slane %v3405_v16, 5  ;;  %v3469_v60 = vunpack.c.l.b16 %v3372_v0  ;;  %v3470_v17 = vunpack.c.l.b16 %v3386_v55  ;;  %v3322_v16 = vld [vmem:[#allocation2 + $0x48] sm:$0xf] }
 0x1bc   : > { %v2972_v49 = vshll.u32 %v2911_v34, 16  ;;  %v4642_v30 = vrot.slane %v3034_v27, 9  ;;  %v2956_v37 = vrot.slane %v2955_v2, 4  ;;  %v3066_v24 = vrot.slane %v2909_v8, 5 }
 0x1bd   : > { %v4643_v40 = vrot.slane %v3035_v45, 9  ;;  %v3070_v47 = vrot.slane %v2911_v34, 5  ;;  %v2970_v20 = vrot.slane %v2969_v48, 4  ;;  %v3390_v4 = vrot.slane %v3388_v12, 4  ;;  %v2913_v34 = vld [vmem:[#allocation2 + $0x2c] sm:$0x1] }
 0x1be   : > { %v3393_v9 = vrot.slane %v3391_v38, 5  ;;  %v2977_v44 = vshrl.u32 %v2912_v15, 16  ;;  %v3408_v43 = vor.u32 %v3407_v56, %v3404_v33  ;;  %v2980_v26 = vshll.u32 %v2912_v15, 16  ;;  %v2915_v48 = vld [vmem:[#allocation2 + $0x34] sm:$0x1] }
 0x1bf   : > { %3256 = vmatmul.bf16.vlgmr.msrb.gmra.mxu2 %v3096_v1  ;;  %v2991_v14 = vshrl.u32 %v2914_v62, 16  ;;  %v2994_v31 = vshll.u32 %v2914_v62, 16  ;;  %v3476_v19 = vpack.c.b16 %v3470_v17, %v3469_v60  ;;  %v4719_v32 = vor.u32 %v4986_v57, %v4718_v5  ;;  %v3036_v38 = vld [vmem:[#allocation2 + $0x28] sm:$0xe] }
 0x1c0   : > { %3285 = vmatmul.bf16.vlgmr.msra.gmra.mxu3 %v3112_v51  ;;  %v2960_v18 = vrot.slane %v2958_v7, 5  ;;  %v2974_v54 = vrot.slane %v2972_v49, 5  ;;  %v3067_v29 = vsel %vm5566_vm5, %v4642_v30, %v3066_v24  ;;  %v3071_v23 = vsel %vm5566_vm5, %v4643_v40, %v3070_v47  ;;  %v3037_v7 = vld [vmem:[#allocation2 + $0x30] sm:$0xe]  ;;  %v4987_v30 = vld [vmem:[#allocation2 + $0x34] sm:$0xf0] }
 0x1c1   : > { %v3397_v13 = vshll.u32 %v6255_v21, 16  ;;  %v3411_v10 = vshll.u32 %v6257_v28, 16  ;;  %v3394_v22 = vor.u32 %v3393_v9, %v3390_v4  ;;  %v2979_v42 = vrot.slane %v2977_v44, 4  ;;  %v6273_v9 = vld [vmem:[#allocation2 + $0x44] sm:$0x1]  ;;  %v5006_v44 = vld [vmem:[#allocation8 + $0x208] sm:$0xff] }
 0x1c2   : > { %v2961_v6 = vsel %vm5555_vm4, %v2956_v37, %v2960_v18  ;;  %v2975_v50 = vsel %vm5555_vm4, %v2970_v20, %v2974_v54  ;;  %v3409_v52 = vrot.slane %v3408_v43, 4  ;;  %v2982_v63 = vrot.slane %v2980_v26, 5  ;;  %3819 = vmatpush.bf16.msra.mxu2 %v5006_v44  ;;  %5059 = vmatpush.bf16.msrb.mxu3 %v5006_v44 }
 0x1c3   : > { %v2993_v41 = vrot.slane %v2991_v14, 4  ;;  %v2996_v11 = vrot.slane %v2994_v31, 5  ;;  %v3416_v61 = vshrl.u32 %v3321_v35, 16  ;;  %v3419_v25 = vshll.u32 %v3321_v35, 16 }
 0x1c4   : > { %v3091_v1 = vunpack.c.l.b16 %v2975_v50  ;;  %v3107_v8 = vunpack.c.l.b16 %v3071_v23  ;;  %v3413_v36 = vrot.slane %v3411_v10, 5  ;;  %v3090_v51 = vunpack.c.l.b16 %v2961_v6  ;;  %v2916_v23 = vld [vmem:[#allocation2 + $0x38] sm:$0xf] }
 0x1c5   : > { %v3106_v0 = vunpack.c.l.b16 %v3067_v29  ;;  %v3395_v55 = vrot.slane %v3394_v22, 4  ;;  %v3399_v2 = vrot.slane %v3397_v13, 5  ;;  %v2983_v45 = vor.u32 %v2982_v63, %v2979_v42  ;;  %v2918_v13 = vld [vmem:[#allocation2 + $0x40] sm:$0xf]  ;;  %v6282_v22 = vld [vmem:[#allocation2 + $0x4c] sm:$0x1] }
 0x1c6   : > { %v3414_v27 = vsel %vm5555_vm4, %v3409_v52, %v3413_v36  ;;  %v2997_v12 = vor.u32 %v2996_v11, %v2993_v41  ;;  %v3418_v33 = vrot.slane %v3416_v61, 4  ;;  %v3421_v56 = vrot.slane %v3419_v25, 5  ;;  %v5005_v41 = vld [vmem:[#allocation8 + $0x200] sm:$0xff]  ;;  %v6287_v11 = vld [vmem:[#allocation2 + $0x44] sm:$0x1] }
 0x1c7   : > { %3653 = vmatmul.bf16.vlgmr.msra.gmra.mxu1 %v3476_v19  ;;  %v3430_v15 = vshrl.u32 %v3322_v16, 16  ;;  %v3433_v59 = vshll.u32 %v3322_v16, 16  ;;  %v3097_v60 = vpack.c.b16 %v3091_v1, %v3090_v51  ;;  %v3113_v17 = vpack.c.b16 %v3107_v8, %v3106_v0  ;;  %v4722_v19 = vld [vmem:[#allocation2 + $0x30] sm:$0xf]  ;;  %3820 = vmatpush.bf16.msra.mxu2 %v5005_v41 }
 0x1c8   : > { %3624 = vmatmul.bf16.gmra.mxu0 %v4719_v32  ;;  %v2986_v57 = vshll.u32 %v2913_v34, 16  ;;  %v3400_v49 = vsel %vm5555_vm4, %v3395_v55, %v3399_v2  ;;  %v3000_v62 = vshll.u32 %v2915_v48, 16  ;;  %v4644_v37 = vrot.slane %v3036_v38, 9  ;;  %5060 = vmatpush.bf16.msrb.mxu3 %v5005_v41 }
 0x1c9   : > { %v3074_v24 = vrot.slane %v2913_v34, 5  ;;  %v3472_v40 = vunpack.c.l.b16 %v3414_v27  ;;  %v2984_v47 = vrot.slane %v2983_v45, 4  ;;  %v4645_v20 = vrot.slane %v3037_v7, 9  ;;  %v3679_v34 = vld [vmem:[#allocation2 + $0x20] sm:$0xe] }
 0x1ca   : > { %v3078_v4 = vrot.slane %v2915_v48, 5  ;;  %v2998_v5 = vrot.slane %v2997_v12, 4  ;;  %v3422_v43 = vor.u32 %v3421_v56, %v3418_v33  ;;  %v3432_v26 = vrot.slane %v3430_v15, 4  ;;  %v6291_v45 = vld [vmem:[#allocation2 + $0x3c] sm:$0x1] }
 0x1cb   : > { %v3435_v14 = vrot.slane %v3433_v59, 5  ;;  %v3471_v31 = vunpack.c.l.b16 %v3400_v49  ;;  %v2988_v32 = vrot.slane %v2986_v57, 5  ;;  %v4723_v18 = vor.u32 %v4987_v30, %v4722_v19  ;;  %v3680_v15 = vld [vmem:[#allocation2 + $0x28] sm:$0xe]  ;;  %v3316_v49 = vld [vmem:[#allocation2 + $0x18] sm:$0xf] }
 0x1cc   : > { %v3002_v54 = vrot.slane %v3000_v62, 5  ;;  %v3425_v29 = vshll.u32 %v6273_v9, 16  ;;  %v3075_v6 = vsel %vm5566_vm5, %v4644_v37, %v3074_v24  ;;  %v3079_v50 = vsel %vm5566_vm5, %v4645_v20, %v3078_v4  ;;  %v3681_v62 = vld [vmem:[#allocation2 + $0x30] sm:$0xe]  ;;  %v3039_v20 = vld [vmem:[#allocation2 + $0x40] sm:$0xe] }
 0x1cd   : > { %v3477_v10 = vpack.c.b16 %v3472_v40, %v3471_v31  ;;  %v2989_v35 = vsel %vm5555_vm4, %v2984_v47, %v2988_v32  ;;  %v3423_v53 = vrot.slane %v3422_v43, 4  ;;  %v3436_v52 = vor.u32 %v3435_v14, %v3432_v26  ;;  %v3038_v47 = vld [vmem:[#allocation2 + $0x38] sm:$0xe]  ;;  %v3315_v43 = vld [vmem:[#allocation2 + $0x10] sm:$0xf] }
 0x1ce   : > { %v3003_v42 = vsel %vm5555_vm4, %v2998_v5, %v3002_v54  ;;  %v3439_v63 = vshll.u32 %v6282_v22, 16  ;;  %v3005_v61 = vshrl.u32 %v2916_v23, 16  ;;  %v3008_v25 = vshll.u32 %v2916_v23, 16 }
 0x1cf   : > { %3261 = vmatmul.bf16.gmra.mxu2 %v3097_v60  ;;  %v3019_v1 = vshrl.u32 %v2918_v13, 16  ;;  %v3022_v8 = vshll.u32 %v2918_v13, 16  ;;  %v3427_v36 = vrot.slane %v3425_v29, 5  ;;  %v3092_v16 = vunpack.c.l.b16 %v2989_v35 }
 0x1d0   : > { %3290 = vmatmul.bf16.gmra.mxu3 %v3113_v17  ;;  %v3093_v51 = vunpack.c.l.b16 %v3003_v42  ;;  %v3108_v0 = vunpack.c.l.b16 %v3075_v6  ;;  %v3109_v55 = vunpack.c.l.b16 %v3079_v50  ;;  %v3437_v27 = vrot.slane %v3436_v52, 4  ;;  %v3682_v50 = vld [vmem:[#allocation2 + $0x38] sm:$0xe]  ;;  %v4726_v42 = vld [vmem:[#allocation2 + $0x40] sm:$0xf] }
 0x1d1   : > { %v3428_v2 = vsel %vm5555_vm4, %v3423_v53, %v3427_v36  ;;  %v3441_v48 = vrot.slane %v3439_v63, 5  ;;  %v3028_v12 = vshll.u32 %v6287_v11, 16  ;;  %v3007_v38 = vrot.slane %v3005_v61, 4  ;;  %v4988_v63 = vld [vmem:[#allocation2 + $0x44] sm:$0xf0] }
 0x1d2   : > { %v3010_v7 = vrot.slane %v3008_v25, 5  ;;  %v3021_v33 = vrot.slane %v3019_v1, 4  ;;  %v3024_v56 = vrot.slane %v3022_v8, 5  ;;  %v4794_v59 = vrot.slane %v3679_v34, 9 }
 0x1d3   : > { %v3098_v60 = vpack.c.b16 %v3093_v51, %v3092_v16  ;;  %v3114_v17 = vpack.c.b16 %v3109_v55, %v3108_v0  ;;  %v3014_v57 = vshll.u32 %v6291_v45, 16  ;;  %v3711_v30 = vrot.slane %v6239_v58, 5 }
 0x1d4   : > { %v3442_v37 = vsel %vm5555_vm4, %v3437_v27, %v3441_v48  ;;  %v3473_v24 = vunpack.c.l.b16 %v3428_v2  ;;  %v3030_v40 = vrot.slane %v3028_v12, 5  ;;  %v4795_v4 = vrot.slane %v3680_v15, 9 }
 0x1d5   : > { %v3011_v44 = vor.u32 %v3010_v7, %v3007_v38  ;;  %v3025_v5 = vor.u32 %v3024_v56, %v3021_v33  ;;  %v3712_v26 = vsel %vm5566_vm5, %v4794_v59, %v3711_v30  ;;  %v3715_v14 = vrot.slane %v6241_v3, 5 }
 0x1d6   : > { %v3346_v31 = vshrl.u32 %v3316_v49, 16  ;;  %v3349_v19 = vshll.u32 %v3316_v49, 16  ;;  %v4796_v58 = vrot.slane %v3681_v62, 9  ;;  %v3719_v32 = vrot.slane %v6255_v21, 5 }
 0x1d7   : > { %3658 = vmatmul.bf16.gmra.mxu1 %v3477_v10  ;;  %v4646_v54 = vrot.slane %v3038_v47, 9  ;;  %v4647_v29 = vrot.slane %v3039_v20, 9  ;;  %v3716_v23 = vsel %vm5566_vm5, %v4795_v4, %v3715_v14  ;;  %v3332_v13 = vshrl.u32 %v3315_v43, 16 }
 0x1d8   : > { %3629 = vmatmul.bf16.gmra.mxu0 %v4723_v18  ;;  %v3474_v18 = vunpack.c.l.b16 %v3442_v37  ;;  %v3335_v10 = vshll.u32 %v3315_v43, 16  ;;  %v3751_v35 = vunpack.c.l.b16 %v3712_v26  ;;  %v3752_v6 = vunpack.c.l.b16 %v3716_v23  ;;  %v3684_v43 = vld [vmem:[#allocation2 + $0x48] sm:$0xe] }
 0x1d9   : > { %v3086_v3 = vrot.slane %v6287_v11, 5  ;;  %v3720_v53 = vsel %vm5566_vm5, %v4796_v58, %v3719_v32  ;;  %v4797_v21 = vrot.slane %v3682_v50, 9  ;;  %v3723_v52 = vrot.slane %v6257_v28, 5  ;;  %v3324_v28 = vld [vmem:[#allocation2 + $0x1c] sm:$0x1] }
 0x1da   : > { %v3026_v41 = vrot.slane %v3025_v5, 4  ;;  %v3348_v61 = vrot.slane %v3346_v31, 4  ;;  %v3351_v25 = vrot.slane %v3349_v19, 5  ;;  %v6308_v1 = vpack.c.b16 %v3752_v6, %v3751_v35  ;;  %v3683_v5 = vld [vmem:[#allocation2 + $0x40] sm:$0xe] }
 0x1db   : > { %v3478_v8 = vpack.c.b16 %v3474_v18, %v3473_v24  ;;  %v3012_v36 = vrot.slane %v3011_v44, 4  ;;  %v3082_v16 = vrot.slane %v6291_v45, 5  ;;  %v3724_v51 = vsel %vm5566_vm5, %v4797_v21, %v3723_v52  ;;  %v3323_v45 = vld [vmem:[#allocation2 + $0x14] sm:$0x1]  ;;  %v3678_v44 = vld [vmem:[#allocation2 + $0x18] sm:$0xe] }
 0x1dc   : > { %v3334_v11 = vrot.slane %v3332_v13, 4  ;;  %v3337_v0 = vrot.slane %v3335_v10, 5  ;;  %v3753_v55 = vunpack.c.l.b16 %v3720_v53  ;;  %v3754_v34 = vunpack.c.l.b16 %v3724_v51  ;;  %v3677_v58 = vld [vmem:[#allocation2 + $0x10] sm:$0xe] }
 0x1dd   : > { %v4727_v2 = vor.u32 %v4988_v63, %v4726_v42  ;;  %v3016_v27 = vrot.slane %v3014_v57, 5  ;;  %v3031_v48 = vsel %vm5555_vm4, %v3026_v41, %v3030_v40  ;;  %v3087_v12 = vsel %vm5566_vm5, %v4647_v29, %v3086_v3 }
 0x1de   : > { %v3352_v38 = vor.u32 %v3351_v25, %v3348_v61  ;;  %v6317_v7 = vpack.c.b16 %v3754_v34, %v3753_v55  ;;  %v3083_v56 = vsel %vm5566_vm5, %v4646_v54, %v3082_v16  ;;  %v3338_v15 = vor.u32 %v3337_v0, %v3334_v11 }
 0x1df   : > { %3266 = vmatmul.bf16.gmra.mxu2 %v3098_v60  ;;  %v3017_v33 = vsel %vm5555_vm4, %v3012_v36, %v3016_v27  ;;  %v3355_v59 = vshll.u32 %v3324_v28, 16  ;;  %v3095_v60 = vunpack.c.l.b16 %v3031_v48  ;;  %v3341_v57 = vshll.u32 %v3323_v45, 16 }
 0x1e0   : > { %3295 = vmatmul.bf16.gmra.mxu3 %v3114_v17  ;;  %v3111_v17 = vunpack.c.l.b16 %v3087_v12  ;;  %v3353_v49 = vrot.slane %v3352_v38, 4  ;;  %v3094_v30 = vunpack.c.l.b16 %v3017_v33  ;;  %v3110_v62 = vunpack.c.l.b16 %v3083_v56 }
 0x1e1   : > { %v3339_v37 = vrot.slane %v3338_v15, 4  ;;  %v3357_v24 = vrot.slane %v3355_v59, 5  ;;  %v3343_v20 = vrot.slane %v3341_v57, 5  ;;  %v3727_v14 = vrot.slane %v6273_v9, 5 }
 0x1e2   : > { %v3099_v40 = vpack.c.b16 %v3095_v60, %v3094_v30  ;;  %v3115_v47 = vpack.c.b16 %v3111_v17, %v3110_v62  ;;  %v3731_v31 = vrot.slane %v6282_v22, 5  ;;  %v4793_v32 = vrot.slane %v3678_v44, 9 }
 0x1e3   : > { %v3358_v4 = vsel %vm5555_vm4, %v3353_v49, %v3357_v24  ;;  %v3344_v26 = vsel %vm5555_vm4, %v3339_v37, %v3343_v20  ;;  %v3707_v18 = vrot.slane %v3324_v28, 5  ;;  %v4798_v54 = vrot.slane %v3683_v5, 9 }
 0x1e4   : > { %v3468_v19 = vunpack.c.l.b16 %v3358_v4  ;;  %v4799_v29 = vrot.slane %v3684_v43, 9  ;;  %v3467_v23 = vunpack.c.l.b16 %v3344_v26  ;;  %v4792_v10 = vrot.slane %v3677_v58, 9 }
 0x1e5   : > { %v3703_v35 = vrot.slane %v3323_v45, 5  ;;  %v3708_v50 = vsel %vm5566_vm5, %v4793_v32, %v3707_v18  ;;  %v3728_v39 = vsel %vm5566_vm5, %v4798_v54, %v3727_v14 }
 0x1e6   : > { %v3475_v6 = vpack.c.b16 %v3468_v19, %v3467_v23  ;;  %v3732_v9 = vsel %vm5566_vm5, %v4799_v29, %v3731_v31  ;;  %v3750_v42 = vunpack.c.l.b16 %v3708_v50  ;;  %v3755_v3 = vunpack.c.l.b16 %v3728_v39 }
 0x1e7   : > { %3663 = vmatmul.bf16.gmra.mxu1 %v3478_v8  ;;  %v3704_v22 = vsel %vm5566_vm5, %v4792_v10, %v3703_v35  ;;  %v3756_v53 = vunpack.c.l.b16 %v3732_v9 }
 0x1e8   : > { %3634 = vmatmul.bf16.gmra.mxu0 %v4727_v2  ;;  %v3749_v21 = vunpack.c.l.b16 %v3704_v22 }
 0x1e9   : > { %v3760_v41 = vpack.c.b16 %v3756_v53, %v3755_v3 }
 0x1ea   : > { %v3757_v63 = vpack.c.b16 %v3750_v42, %v3749_v21 }
 0x1ef   : > { %3271 = vmatmul.bf16.gmra.mxu2 %v3099_v40 }
 0x1f0   : > { %3300 = vmatmul.bf16.gmra.mxu3 %v3115_v47 }
 0x1f5   : > { %v2855_v13 = vpop.f32.mrf.mxu0 }
 0x1f8   : > { %3648 = vmatmul.bf16.vlgmr.msrb.gmra.mxu0 %v3475_v6 }
 0x1fd   : > { %v2857_v52 = vpop.f32.mrf.mxu0 }
 0x1ff   : > { %3821 = vmatmul.bf16.vlgmr.msra.gmra.mxu2 %v3757_v63 }
 0x200   : > { %3836 = vmatmul.bf16.vlgmr.msrb.gmra.mxu3 %v3760_v41 }
 0x201   : > { %v2701_v61 = vpop.f32.mrf.mxu2 }
 0x203   : > { %v2730_v25 = vpop.f32.mrf.mxu3 }
 0x204   : > { %v2884_v8 = vpop.f32.mrf.mxu1  ;;  %v2731_v36 = vadd.f32 %v2730_v25, %v2701_v61 }
 0x205   : > { %v2860_v16 = vpop.f32.mrf.mxu0 }
 0x206   : > { %v2856_v51 = vadd.f32 %v2855_v13, %v2731_v36 }
 0x208   : > { %v2885_v62 = vadd.f32 %v2884_v8, %v2856_v51 }
 0x209   : > { %v2703_v11 = vpop.f32.mrf.mxu2 }
 0x20b   : > { %v2732_v0 = vpop.f32.mrf.mxu3 }
 0x20c   : > { %v2733_v55 = vadd.f32 %v2732_v0, %v2703_v11  ;;  %v2886_v34 = vpop.f32.mrf.mxu1 }
 0x20d   : > { %v2862_v46 = vpop.f32.mrf.mxu0 }
 0x20e   : > { %v2858_v2 = vadd.f32 %v2857_v52, %v2733_v55 }
 0x20f   : > { %3826 = vmatmul.bf16.gmra.mxu2 %v6308_v1 }
 0x210   : > { %v6339_v4 = vadd.f32 %v2886_v34, %v2858_v2 }
 0x212   : > { %v2706_v27 = vpop.f32.mrf.mxu2 }
 0x213   : > { %v2735_v28 = vpop.f32.mrf.mxu3 }
 0x214   : > { %v2736_v48 = vadd.f32 %v2735_v28, %v2706_v27  ;;  %v2889_v45 = vpop.f32.mrf.mxu1 }
 0x215   : > { %v2865_v12 = vpop.f32.mrf.mxu0 }
 0x216   : > { %v2861_v38 = vadd.f32 %v2860_v16, %v2736_v48 }
 0x218   : > { %v2890_v31 = vadd.f32 %v2889_v45, %v2861_v38 }
 0x21a   : > { %v2708_v33 = vpop.f32.mrf.mxu2 }
 0x21b   : > { %v2737_v56 = vpop.f32.mrf.mxu3 }
 0x21c   : > { %v2738_v15 = vadd.f32 %v2737_v56, %v2708_v33  ;;  %v2891_v17 = vpop.f32.mrf.mxu1 }
 0x21d   : > { %v2867_v59 = vpop.f32.mrf.mxu0 }
 0x21e   : > { %v2863_v60 = vadd.f32 %v2862_v46, %v2738_v15 }
 0x21f   : > { %3831 = vmatmul.bf16.gmra.mxu2 %v6317_v7 }
 0x220   : > { %v2892_v29 = vadd.f32 %v2891_v17, %v2863_v60 }
 0x222   : > { %v2711_v57 = vpop.f32.mrf.mxu2 }
 0x223   : > { %v2740_v49 = vpop.f32.mrf.mxu3 }
 0x224   : > { %v2741_v30 = vadd.f32 %v2740_v49, %v2711_v57  ;;  %v2894_v47 = vpop.f32.mrf.mxu1 }
 0x225   : > { %v2870_v37 = vpop.f32.mrf.mxu0 }
 0x226   : > { %v2866_v1 = vadd.f32 %v2865_v12, %v2741_v30 }
 0x228   : > { %v2895_v39 = vadd.f32 %v2894_v47, %v2866_v1 }
 0x22a   : > { %v2713_v24 = vpop.f32.mrf.mxu2 }
 0x22b   : > { %v2742_v40 = vpop.f32.mrf.mxu3 }
 0x22c   : > { %v2743_v20 = vadd.f32 %v2742_v40, %v2713_v24  ;;  %v2896_v19 = vpop.f32.mrf.mxu1 }
 0x22d   : > { %v2872_v44 = vpop.f32.mrf.mxu0 }
 0x22e   : > { %v2868_v5 = vadd.f32 %v2867_v59, %v2743_v20 }
 0x230   : > { %v2897_v21 = vadd.f32 %v2896_v19, %v2868_v5 }
 0x232   : > { %v2716_v43 = vpop.f32.mrf.mxu2 }
 0x233   : > { %v2745_v26 = vpop.f32.mrf.mxu3 }
 0x234   : > { %v2746_v14 = vadd.f32 %v2745_v26, %v2716_v43  ;;  %v2899_v10 = vpop.f32.mrf.mxu1 }
 0x235   : > { %v3620_v7 = vpop.f32.mrf.mxu0 }
 0x236   : > { %v2871_v58 = vadd.f32 %v2870_v37, %v2746_v14 }
 0x238   : > { %v2900_v20 = vadd.f32 %v2899_v10, %v2871_v58 }
 0x23a   : > { %v2718_v32 = vpop.f32.mrf.mxu2 }
 0x23b   : > { %v2747_v18 = vpop.f32.mrf.mxu3 }
 0x23c   : > { %v2748_v54 = vadd.f32 %v2747_v18, %v2718_v32  ;;  %v2901_v42 = vpop.f32.mrf.mxu1 }
 0x23d   : > { %v3622_v23 = vpop.f32.mrf.mxu0 }
 0x23e   : > { %v6341_v13 = vadd.f32 %v2872_v44, %v2748_v54  ;;  %v6352_v54 = vld [vmem:[%s6426_s6] ss:$0 sm:$0xff] }
 0x242   : > { %v3257_v35 = vpop.f32.mrf.mxu2 }
 0x243   : > { %v3286_v6 = vpop.f32.mrf.mxu3 }
 0x244   : > { %v3287_v50 = vadd.f32 %v3286_v6, %v3257_v35  ;;  %v3654_v61 = vpop.f32.mrf.mxu1 }
 0x245   : > { %v3625_v9 = vpop.f32.mrf.mxu0 }
 0x246   : > { %v3306_v22 = vadd.f32 %v3287_v50, %v2885_v62  ;;  %v3655_v59 = vadd.f32 %v3654_v61, %v3625_v9  ;;  %v6460_v50 = vld [vmem:[#allocation16_spill] sm:$0xff]  ;;  %v6461_v9 = vld [vmem:[#allocation21_spill] sm:$0xff] }
 0x24a   : > { %v3259_v3 = vpop.f32.mrf.mxu2 }
 0x24b   : > { %v3288_v53 = vpop.f32.mrf.mxu3 }
 0x24c   : > { %v3656_v0 = vpop.f32.mrf.mxu1  ;;  %v3289_v37 = vadd.f32 %v3288_v53, %v3259_v3 }
 0x24d   : > { %v3627_v52 = vpop.f32.mrf.mxu0 }
 0x24e   : > { %v3657_v30 = vadd.f32 %v3656_v0, %v3627_v52  ;;  %v3307_v43 = vadd.f32 %v3289_v37, %v6339_v4 }
 0x252   : > { %v3262_v63 = vpop.f32.mrf.mxu2 }
 0x253   : > { %v3291_v41 = vpop.f32.mrf.mxu3 }
 0x254   : > { %v3292_v25 = vadd.f32 %v3291_v41, %v3262_v63  ;;  %v3659_v28 = vpop.f32.mrf.mxu1 }
 0x255   : > { %v3630_v8 = vpop.f32.mrf.mxu0 }
 0x256   : > { %v3308_v36 = vadd.f32 %v3292_v25, %v2890_v31  ;;  %v3660_v4 = vadd.f32 %v3659_v28, %v3630_v8 }
 0x258   : > { %v3671_v49 = vadd.f32 %v3655_v59, %v3308_v36 }
 0x25a   : > { %v3264_v16 = vpop.f32.mrf.mxu2 }
 0x25b   : > { %v3293_v51 = vpop.f32.mrf.mxu3 }
 0x25c   : > { %v3661_v45 = vpop.f32.mrf.mxu1  ;;  %v3294_v33 = vadd.f32 %v3293_v51, %v3264_v16 }
 0x25d   : > { %v3632_v11 = vpop.f32.mrf.mxu0 }
 0x25e   : > { %v3309_v17 = vadd.f32 %v3294_v33, %v2892_v29  ;;  %v3662_v25 = vadd.f32 %v3661_v45, %v3632_v11 }
 0x260   : > { %v3672_v24 = vadd.f32 %v3657_v30, %v3309_v17 }
 0x262   : > { %v3267_v55 = vpop.f32.mrf.mxu2 }
 0x263   : > { %v3296_v46 = vpop.f32.mrf.mxu3 }
 0x264   : > { %v3297_v34 = vadd.f32 %v3296_v46, %v3267_v55  ;;  %v3664_v44 = vpop.f32.mrf.mxu1 }
 0x265   : > { %v3635_v2 = vpop.f32.mrf.mxu0 }
 0x266   : > { %v3310_v27 = vadd.f32 %v3297_v34, %v2895_v39  ;;  %v3665_v31 = vadd.f32 %v3664_v44, %v3635_v2  ;;  %v6462_v34 = vld [vmem:[#allocation18_spill] sm:$0xff]  ;;  %v6463_v2 = vld [vmem:[#allocation23_spill] sm:$0xff] }
 0x268   : > { %v3673_v41 = vadd.f32 %v3660_v4, %v3310_v27 }
 0x26a   : > { %v3269_v48 = vpop.f32.mrf.mxu2 }
 0x26b   : > { %v3298_v12 = vpop.f32.mrf.mxu3 }
 0x26c   : > { %v3299_v32 = vadd.f32 %v3298_v12, %v3269_v48  ;;  %v3666_v61 = vpop.f32.mrf.mxu1 }
 0x26d   : > { %v3637_v38 = vpop.f32.mrf.mxu0 }
 0x26e   : > { %v3311_v3 = vadd.f32 %v3299_v32, %v2897_v21  ;;  %v3667_v8 = vadd.f32 %v3666_v61, %v3637_v38 }
 0x270   : > { %v3674_v16 = vadd.f32 %v3662_v25, %v3311_v3 }
 0x272   : > { %v3272_v56 = vpop.f32.mrf.mxu2 }
 0x273   : > { %v3301_v15 = vpop.f32.mrf.mxu3 }
 0x274   : > { %v3302_v1 = vadd.f32 %v3301_v15, %v3272_v56 }
 0x275   : > { %v3649_v60 = vpop.f32.mrf.mxu0 }
 0x276   : > { %v3650_v57 = vadd.f32 %v3649_v60, %v3620_v7  ;;  %v3312_v26 = vadd.f32 %v3302_v1, %v2900_v20  ;;  %v6347_v7 = vld [vmem:[%s6424_s4] ss:$0 sm:$0xff] }
 0x277   : > { %v576_v39 = vadd.f32 %v6347_v7, %v6460_v50  ;;  %v578_v21 = vadd.f32 %v6347_v7, %v6462_v34  ;;  %v593_v28 = vadd.f32 %v6347_v7, %v6463_v2 }
 0x278   : > { %v3669_v62 = vadd.f32 %v3650_v57, %v3306_v22  ;;  %v3675_v58 = vadd.f32 %v3665_v31, %v3312_v26  ;;  %v591_v22 = vadd.f32 %v6347_v7, %v6461_v9  ;;  %v6464_v57 = vld [vmem:[#allocation20_spill] sm:$0xff] }
 0x279   : > { %v581_v30 = vadd.f32 %v6347_v7, %v6464_v57 }
 0x27a   : > { %v3274_v40 = vpop.f32.mrf.mxu2 }
 0x27b   : > { %v3303_v47 = vpop.f32.mrf.mxu3 }
 0x27c   : > { %v3304_v18 = vadd.f32 %v3303_v47, %v3274_v40  ;;  %v6465_v47 = vld [vmem:[#allocation22_spill] sm:$0xff] }
 0x27d   : > { %v3651_v5 = vpop.f32.mrf.mxu0  ;;  %v583_v20 = vadd.f32 %v6347_v7, %v6465_v47 }
 0x27e   : > { %v3652_v14 = vadd.f32 %v3651_v5, %v3622_v23  ;;  %v2902_v23 = vadd.f32 %v2901_v42, %v6341_v13 }
 0x280   : > { %v3670_v19 = vadd.f32 %v3652_v14, %v3307_v43  ;;  %v3313_v53 = vadd.f32 %v3304_v18, %v2902_v23 }
 0x282   : > { %v3822_v29 = vpop.f32.mrf.mxu2  ;;  %v3676_v36 = vadd.f32 %v3667_v8, %v3313_v53 }
 0x283   : > { %v3837_v10 = vpop.f32.mrf.mxu3  ;;  %v3842_v35 = vadd.f32 %v3822_v29, %v3669_v62 }
 0x284   : > { %v3848_v6 = vadd.f32 %v3837_v10, %v3675_v58  ;;  %v6467_v10 = vld [vmem:[#allocation19_spill] sm:$0xff] }
 0x285   : > { %v3854_v52 = vadd.f32 %v6352_v54, %v3842_v35  ;;  %v588_v4 = vadd.f32 %v6347_v7, %v6467_v10 }
 0x286   : > { %v3860_v63 = vadd.f32 %v6352_v54, %v3848_v6 }
 0x287   : > { %v3862_v13 = vadd.f32 %v3854_v52, %v576_v39 }
 0x288   : > { %v3868_v42 = vadd.f32 %v3860_v63, %v591_v22 }
 0x289   : > { %v3870_v38 = vmax.f32 %v3862_v13, 0.0 }
 0x28a   : > { %v3824_v51 = vpop.f32.mrf.mxu2  ;;  %v3876_v45 = vmax.f32 %v3868_v42, 0.0 }
 0x28b   : > { %v3839_v0 = vpop.f32.mrf.mxu3  ;;  %v3843_v55 = vadd.f32 %v3824_v51, %v3670_v19  ;;  %v6466_v19 = vld [vmem:[#allocation17_spill] sm:$0xff] }
 0x28c   : > { %v3849_v46 = vadd.f32 %v3839_v0, %v3676_v36  ;;  %v586_v32 = vadd.f32 %v6347_v7, %v6466_v19 }
 0x28d   : > { %v3855_v27 = vadd.f32 %v6352_v54, %v3843_v55 }
 0x28e   : > { %v3861_v48 = vadd.f32 %v6352_v54, %v3849_v46 }
 0x28f   : > { %v3863_v11 = vadd.f32 %v3855_v27, %v578_v21 }
 0x290   : > { %v3869_v12 = vadd.f32 %v3861_v48, %v593_v28 }
 0x291   : > { %v3871_v33 = vmax.f32 %v3863_v11, 0.0 }
 0x292   : > { %v3877_v56 = vmax.f32 %v3869_v12, 0.0  ;;  %v3827_v15 = vpop.f32.mrf.mxu2 }
 0x293   : > { %v5017_v59 = vpack.c.bf16 %v3871_v33, %v3870_v38  ;;  %v3844_v17 = vadd.f32 %v3827_v15, %v3671_v49 }
 0x294   : > { %v5032_v60 = vpack.c.bf16 %v3877_v56, %v3876_v45 }
 0x295   : > { %5018 = vst [vmem:[%s6370_s16] sm:$0xff] %v5017_v59   ;;  %v3856_v62 = vadd.f32 %v6352_v54, %v3844_v17 }
 0x296   : > { %5036 = vst [vmem:[%s6370_s16 + $0x18] sm:$0xff] %v5032_v60  }
 0x297   : > { %v3864_v37 = vadd.f32 %v3856_v62, %v581_v30 }
 0x299   : > { %v3872_v5 = vmax.f32 %v3864_v37, 0.0 }
 0x29a   : > { %v3829_v1 = vpop.f32.mrf.mxu2 }
 0x29b   : > { %v3845_v40 = vadd.f32 %v3829_v1, %v3672_v24 }
 0x29d   : > { %v3857_v49 = vadd.f32 %v6352_v54, %v3845_v40 }
 0x29f   : > { %v3865_v44 = vadd.f32 %v3857_v49, %v583_v20 }
 0x2a1   : > { %v3873_v43 = vmax.f32 %v3865_v44, 0.0 }
 0x2a2   : > { %v3832_v26 = vpop.f32.mrf.mxu2 }
 0x2a3   : > { %v5022_v14 = vpack.c.bf16 %v3873_v43, %v3872_v5  ;;  %v3846_v31 = vadd.f32 %v3832_v26, %v3673_v41 }
 0x2a5   : > { %5034 = vst [vmem:[%s6370_s16 + $0x8] sm:$0xff] %v5022_v14   ;;  %v3858_v18 = vadd.f32 %v6352_v54, %v3846_v31 }
 0x2a7   : > { %v3866_v24 = vadd.f32 %v3858_v18, %v586_v32 }
 0x2a9   : > { %v3874_v6 = vmax.f32 %v3866_v24, 0.0 }
 0x2aa   : > { %v3834_v58 = vpop.f32.mrf.mxu2 }
 0x2ab   : > { %v3847_v29 = vadd.f32 %v3834_v58, %v3674_v16 }
 0x2ad   : > { %v3859_v23 = vadd.f32 %v6352_v54, %v3847_v29 }
 0x2af   : > { %v3867_v35 = vadd.f32 %v3859_v23, %v588_v4 }
 0x2b1   : > { %v3875_v50 = vmax.f32 %v3867_v35, 0.0 }
 0x2b3   : > { %v5027_v39 = vpack.c.bf16 %v3875_v50, %v3874_v6 }
 0x2b5   : > { %5035 = vst [vmem:[%s6370_s16 + $0x10] sm:$0xff] %v5027_v39  }
 0x2b6   : > { %5296 = shalt.err (!%p5293_p10)
}
 0x2b7   : > { %s5351_s9 = smov 64   ;;  %s5352_s11 = smov 4  }
 0x2b8   : > { %5078 = dma.vmem_to_hbm [thread:$0]  (%p5485_p7), %s3908_s22, 512, %s3910_s2, %s3895_s28, %s5351_s9, %s5351_s9, %s5352_s11  }
 0x2b9 PF: > { %s3924_s14 = sand.u32 1, %s5331_s24   ;;  %p6468_p12 = scmp.ge.s32.totalorder %s5343_s27, 2 }
 0x2ba   : > { %s3925_s16 = scalar_lea.sflag [#allocation5], %s3924_s14 }
 0x2bb   : > { %p5095_p13 = pnand %p6468_p12, %p5428_p6 }
 0x2bd   : > { %p5096_p0 = pneg %p5095_p13 }
 0x2bf   : > { %5326 = dma.done.wait (%p5096_p0), %s3925_s16, 512  }
 0x2c0   : > { %5328 = vsyncadd (%p5096_p0), %s3925_s16, 4294966784  ;;  %p22_p3 = scmp.ge.s32.totalorder %s5466_s13, 4   ;;  %s6469_s24 = smov %s5335_s25 }
 0x2c1   : > { %s6470_s25 = smov %s5339_s26  ;;  %s6471_s26 = smov %s5481_s17 }
 0x2c2   : > { %s6472_s27 = smov %s5466_s13  ;;  %24 = sbr.rel (!%p22_p3) target bundleno = 11 (0xb), region = 110 }
 0x2c7   :  { %3931 = vsyncpa [#allocation4], 1 }
 0x2c8   :  { %3933 = vsyncpa [#allocation4 + $0x1], 1 }
 0x2c9   :  { %3934 = vsyncpa [#allocation7], 1 }
 0x2ca   :  { %3935 = vsyncpa [#allocation10], 1 }
 0x2cb   :  { %3936 = vsyncpa [#allocation5], 1 }
 0x2cc   :  { %3938 = vsyncpa [#allocation5 + $0x1], 1 }

</bundles_post_ra>
